<compile_context>
chip_gen: v5e
topology: v5e:2x2
jax: 0.10.0
libtpu: 0.0.40
codegen_flags: <defaults>
</compile_context>

<pallas_src>
import functools

import jax
import jax.numpy as jnp
from jax.experimental import pallas as pl
from jax.experimental.pallas import tpu as pltpu


def _round_up(x, m):
    return ((x + m - 1) // m) * m


def _pick_tm(m_out):
    """M tile: large (<=1024 rows) but >=2 tiles when possible (v7x megacore)."""
    if m_out >= 2048:
        return 1024
    if m_out >= 256:
        return _round_up((m_out + 1) // 2, 8)
    return _round_up(m_out, 8)


# ----------------------------------------------------------------------------
# Kernel 1: fused 3x3 conv (9 in-kernel taps) + masked BN partial statistics
# ----------------------------------------------------------------------------
def _conv3x3_tap_kernel(tap_offsets, slab_ref, w_ref, mask_ref,
                        y_ref, psum_ref, psq_ref):
    tm, tn = y_ref.shape
    acc = jnp.zeros((tm, tn), jnp.float32)
    # 9 MXU matmuls accumulated in f32; LHS slices are shifted windows of the
    # VMEM-resident padded-activation slab (im2col fused, never hits HBM).
    for t, ofs in enumerate(tap_offsets):
        lhs = slab_ref[ofs:ofs + tm, :]                  # (tm, cin_pad) bf16
        acc += jnp.dot(lhs, w_ref[t], preferred_element_type=jnp.float32)
    # bf16 y halves the write here and the read in the bn_relu pass.
    y_ref[...] = acc.astype(y_ref.dtype)
    # Per-tile BN partial sums from the f32 accumulator; invalid rows masked.
    m = mask_ref[...]                                    # (tm, 1) f32 in {0,1}
    am = acc * m
    psum_ref[...] = jnp.sum(am, axis=0, keepdims=True)   # (1, tn)
    psq_ref[...] = jnp.sum(acc * am, axis=0, keepdims=True)


def _conv3x3_bn_stats(slabs, w_packed, mask, tm, tn, tap_offsets):
    """slabs: (gm, S, Cin_pad) bf16, w: (9, Cin_pad, C_pad) bf16,
    mask: (gm*tm, 1) f32 -> (y bf16 (gm*tm, C_pad), psum (gm, C_pad), psq)."""
    gm, s, cin_pad = slabs.shape
    _, _, c_pad = w_packed.shape
    gn = c_pad // tn
    m_pad = gm * tm

    cost = pl.CostEstimate(
        flops=2 * m_pad * 9 * cin_pad * c_pad,
        transcendentals=0,
        bytes_accessed=(slabs.size * 2 + w_packed.size * 2 * gm
                        + m_pad * c_pad * 2 + mask.size * 4
                        + 2 * gm * c_pad * 4),
    )

    y, psum, psq = pl.pallas_call(
        functools.partial(_conv3x3_tap_kernel, tap_offsets),
        out_shape=(
            jax.ShapeDtypeStruct((m_pad, c_pad), jnp.bfloat16),
            jax.ShapeDtypeStruct((gm, 1, c_pad), jnp.float32),
            jax.ShapeDtypeStruct((gm, 1, c_pad), jnp.float32),
        ),
        grid=(gm, gn),
        in_specs=[
            pl.BlockSpec((None, s, cin_pad), lambda i, j: (i, 0, 0)),
            pl.BlockSpec((9, cin_pad, tn), lambda i, j: (0, 0, j)),
            pl.BlockSpec((tm, 1), lambda i, j: (i, 0)),
        ],
        out_specs=(
            pl.BlockSpec((tm, tn), lambda i, j: (i, j)),
            pl.BlockSpec((None, 1, tn), lambda i, j: (i, 0, j)),
            pl.BlockSpec((None, 1, tn), lambda i, j: (i, 0, j)),
        ),
        compiler_params=pltpu.CompilerParams(
            # Every (i, j) block is independent -> both axes megacore-shardable.
            dimension_semantics=("parallel", "parallel"),
            vmem_limit_bytes=32 * 1024 * 1024,
        ),
        cost_estimate=cost,
    )(slabs, w_packed, mask)
    return y, psum[:, 0, :], psq[:, 0, :]


# ----------------------------------------------------------------------------
# Kernel 2: BatchNorm (precomputed scale/shift) + ReLU epilogue, tiled over M
# ----------------------------------------------------------------------------
def _bn_relu_kernel(y_ref, scale_ref, shift_ref, o_ref):
    y = y_ref[...].astype(jnp.float32)
    o_ref[...] = jnp.maximum(y * scale_ref[...] + shift_ref[...],
                             0.0).astype(o_ref.dtype)


def _bn_relu(y, scale, shift, tm, out_dtype):
    m_pad, c_pad = y.shape
    gm = m_pad // tm
    # In-place update when dtypes match (saves an M_pad x C_pad HBM alloc).
    alias = {0: 0} if jnp.dtype(out_dtype) == y.dtype else {}
    return pl.pallas_call(
        _bn_relu_kernel,
        out_shape=jax.ShapeDtypeStruct((m_pad, c_pad), out_dtype),
        grid=(gm,),
        in_specs=[
            pl.BlockSpec((tm, c_pad), lambda i: (i, 0)),
            pl.BlockSpec((1, c_pad), lambda i: (0, 0)),
            pl.BlockSpec((1, c_pad), lambda i: (0, 0)),
        ],
        out_specs=pl.BlockSpec((tm, c_pad), lambda i: (i, 0)),
        compiler_params=pltpu.CompilerParams(
            dimension_semantics=("parallel",),
            vmem_limit_bytes=32 * 1024 * 1024,
        ),
        input_output_aliases=alias,
    )(y, scale, shift)


# ----------------------------------------------------------------------------
# Fused conv3x3 -> BN(batch stats) -> ReLU  (NHWC in / NHWC out)
# ----------------------------------------------------------------------------
def conv3x3_bn_relu(x_nhwc, w_oihw, gamma, beta, *, eps=1e-5,
                    out_dtype=jnp.float32):
    n, h, w, cin = x_nhwc.shape
    cout = w_oihw.shape[0]

    cin_pad = _round_up(cin, 128)
    c_pad = _round_up(cout, 128)
    tn = 256 if c_pad >= 256 else c_pad            # 256-wide MXU on v6e/v7x
    c_pad = _round_up(c_pad, tn)

    # Conv is evaluated over the zero-padded (H+2)x(W+2) grid; invalid rows are
    # masked out of the BN statistics and sliced away afterwards.
    m_out = n * (h + 2) * (w + 2)
    tm = _pick_tm(m_out)
    gm = -(-m_out // tm)
    m_pad = gm * tm
    s = _round_up(tm + 2 * (w + 2) + 2, 8)         # tile rows + tap halo

    # Zero-padded, channel-padded activation, flattened over (n, y, x).
    x_sp = jnp.pad(x_nhwc.astype(jnp.bfloat16),
                   ((0, 0), (1, 1), (1, 1), (0, cin_pad - cin)))
    x_flat = x_sp.reshape(m_out, cin_pad)
    x_flat = jnp.pad(x_flat, ((0, gm * tm + s - m_out), (0, 0)))

    # Halo'd per-M-tile slabs (~1.1-1.5x activation, vs 9x for HBM im2col).
    row_idx = jnp.arange(gm)[:, None] * tm + jnp.arange(s)[None, :]
    slabs = x_flat[row_idx]                        # (gm, s, cin_pad)

    # Validity mask over the padded output grid (explicit, independent of the
    # zero-padding trick, so BN stats stay exact).
    valid = (jnp.arange(h + 2)[:, None] < h) & (jnp.arange(w + 2)[None, :] < w)
    mask = jnp.broadcast_to(valid[None], (n, h + 2, w + 2)).reshape(-1)
    mask = jnp.pad(mask, (0, m_pad - m_out)).astype(jnp.float32)
    mask = mask.reshape(m_pad, 1)

    # Weights: (Cout, Cin, 3, 3) -> (9, Cin_pad, C_pad), tap-major (ky, kx).
    w_pk = jnp.transpose(w_oihw, (2, 3, 1, 0)).reshape(9, cin, cout)
    w_pk = jnp.pad(w_pk, ((0, 0), (0, cin_pad - cin),
                          (0, c_pad - cout))).astype(jnp.bfloat16)

    # Tap t = ky*3 + kx reads flat row  m' + ky*(W+2) + kx  of the slab.
    tap_offsets = tuple(ky * (w + 2) + kx for ky in range(3) for kx in range(3))

    y, psum, psq = _conv3x3_bn_stats(slabs, w_pk, mask, tm, tn, tap_offsets)

    # Global batch statistics over the valid (unmasked) rows.
    m_valid = n * h * w
    mean = jnp.sum(psum, axis=0) / m_valid
    # TODO(synk): per-tile centered sums + Chan merge to avoid E[x^2]-E[x]^2
    # cancellation for very large M with |mean| >> std.
    var = jnp.maximum(jnp.sum(psq, axis=0) / m_valid - mean * mean, 0.0)
    g = jnp.pad(gamma, (0, c_pad - cout))
    b = jnp.pad(beta, (0, c_pad - cout))
    scale = g * jax.lax.rsqrt(var + eps)
    shift = b - mean * scale

    tm_bn = tm * 2 if (gm % 2 == 0 and tm * 2 <= 2048) else tm
    out = _bn_relu(y, scale.reshape(1, c_pad), shift.reshape(1, c_pad),
                   tm_bn, out_dtype)

    out = out[:m_out, :cout].reshape(n, h + 2, w + 2, cout)[:, :h, :w, :]
    return out


# ----------------------------------------------------------------------------
# Plain-JAX glue: bilinear x2 upsample (align_corners=True) via interp matrices
# ----------------------------------------------------------------------------
def _interp_matrix(n_in, n_out):
    if n_in == 1:
        return jnp.ones((n_out, 1), jnp.float32)
    pos = jnp.arange(n_out, dtype=jnp.float32) * ((n_in - 1) / (n_out - 1))
    i0f = jnp.clip(jnp.floor(pos), 0.0, n_in - 2)
    frac = pos - i0f
    i0 = i0f.astype(jnp.int32)
    rows = jnp.arange(n_out)
    m = jnp.zeros((n_out, n_in), jnp.float32)
    m = m.at[rows, i0].add(1.0 - frac)
    m = m.at[rows, i0 + 1].add(frac)
    return m


def _upsample_bilinear_x2_nhwc(x):
    """(N, H, W, C) -> (N, 2H, 2W, C): nn.Upsample(2, 'bilinear', align_corners=True)."""
    _, h, w, _ = x.shape
    my = _interp_matrix(h, 2 * h)
    mx = _interp_matrix(w, 2 * w)
    y = jnp.einsum("oh,nhwc->nowc", my, x)
    return jnp.einsum("pw,nowc->nopc", mx, y)


# ----------------------------------------------------------------------------
# Up.forward
# ----------------------------------------------------------------------------
def up_forward(x1, x2, params):
    """x1, x2: NCHW float32 -> NCHW float32 (out_channels)."""
    # Single NCHW -> NHWC transpose in; everything stays NHWC (lane-dense).
    x1 = jnp.transpose(x1, (0, 2, 3, 1))
    x2 = jnp.transpose(x2, (0, 2, 3, 1))

    x1 = _upsample_bilinear_x2_nhwc(x1)
    diff_y = x2.shape[1] - x1.shape[1]
    diff_x = x2.shape[2] - x1.shape[2]
    x1 = jnp.pad(x1, ((0, 0),
                      (diff_y // 2, diff_y - diff_y // 2),
                      (diff_x // 2, diff_x - diff_x // 2),
                      (0, 0)))
    # TODO(synk): fold this concat into the conv by splitting the tap loop into
    # two K source groups (x2 channels, upsampled-x1 channels).
    x = jnp.concatenate([x2, x1], axis=-1)

    h1 = conv3x3_bn_relu(x, params["w1_oihw"], params["g1"], params["b1"],
                         out_dtype=jnp.bfloat16)   # bf16 feed into conv2 MXU
    h2 = conv3x3_bn_relu(h1, params["w2_oihw"], params["g2"], params["b2"],
                         out_dtype=jnp.float32)
    return jnp.transpose(h2, (0, 3, 1, 2))


def init_params(key, in_channels, out_channels):
    """Up(in, out, bilinear=True) => DoubleConv(in, out, mid=in//2)."""
    mid = in_channels // 2
    k1, k2, k3, k4, k5, k6 = jax.random.split(key, 6)
    w1 = jax.random.normal(k1, (mid, in_channels, 3, 3), jnp.float32) * 0.1
    w2 = jax.random.normal(k2, (out_channels, mid, 3, 3), jnp.float32) * 0.1
    g1 = 1.0 + 0.1 * jax.random.normal(k3, (mid,), jnp.float32)
    b1 = 0.1 * jax.random.normal(k4, (mid,), jnp.float32)
    g2 = 1.0 + 0.1 * jax.random.normal(k5, (out_channels,), jnp.float32)
    b2 = 0.1 * jax.random.normal(k6, (out_channels,), jnp.float32)
    return {"w1_oihw": w1, "g1": g1, "b1": b1,
            "w2_oihw": w2, "g2": g2, "b2": b2}


# ----------------------------------------------------------------------------
# Pure-JAX reference (f32) for a correctness sanity check
# ----------------------------------------------------------------------------
def _ref_conv_bn_relu(x_nchw, w_oihw, gamma, beta, eps=1e-5):
    y = jax.lax.conv_general_dilated(
        x_nchw, w_oihw, window_strides=(1, 1), padding=((1, 1), (1, 1)),
        dimension_numbers=("NCHW", "OIHW", "NCHW"))
    mean = jnp.mean(y, axis=(0, 2, 3), keepdims=True)
    var = jnp.var(y, axis=(0, 2, 3), keepdims=True)
    y = (y - mean) * jax.lax.rsqrt(var + eps)
    y = y * gamma[None, :, None, None] + beta[None, :, None, None]
    return jnp.maximum(y, 0.0)


def _ref_up_forward(x1, x2, params):
    x1h = _upsample_bilinear_x2_nhwc(jnp.transpose(x1, (0, 2, 3, 1)))
    x1 = jnp.transpose(x1h, (0, 3, 1, 2))
    diff_y = x2.shape[2] - x1.shape[2]
    diff_x = x2.shape[3] - x1.shape[3]
    x1 = jnp.pad(x1, ((0, 0), (0, 0),
                      (diff_y // 2, diff_y - diff_y // 2),
                      (diff_x // 2, diff_x - diff_x // 2)))
    x = jnp.concatenate([x2, x1], axis=1)
    h1 = _ref_conv_bn_relu(x, params["w1_oihw"], params["g1"], params["b1"])
    h2 = _ref_conv_bn_relu(h1, params["w2_oihw"], params["g2"], params["b2"])
    return h2


if __name__ == "__main__":
    key = jax.random.PRNGKey(0)
    kx1, kx2, kp = jax.random.split(key, 3)

    in_channels, out_channels = 8, 4
    # Standard UNet Up: x1 and x2 each carry in_channels // 2 channels.
    x1 = jax.random.normal(kx1, (2, in_channels // 2, 8, 8), jnp.float32)    # low-res
    x2 = jax.random.normal(kx2, (2, in_channels // 2, 16, 16), jnp.float32)  # skip conn

    params = init_params(kp, in_channels, out_channels)

    out = jax.jit(up_forward)(x1, x2, params)
    out = jax.block_until_ready(out)

    assert out.shape == (2, out_channels, 16, 16), out.shape
    assert bool(jnp.all(jnp.isfinite(out)))

    ref = _ref_up_forward(x1, x2, params)
    err = float(jnp.max(jnp.abs(out - ref)))
    assert err < 0.2, f"max abs diff vs f32 reference = {err}"

    print("KERNEL_OK")
</pallas_src>

<mosaic_0001>
module attributes {stable_mosaic.version = 11 : i64} {
  func.func @_conv3x3_tap_kernel(%arg0: i32, %arg1: i32, %arg2: memref<1x368x128xbf16, #tpu.memory_space<vmem>>, %arg3: memref<9x128x128xbf16, #tpu.memory_space<vmem>>, %arg4: memref<328x1xf32, #tpu.memory_space<vmem>>, %arg5: memref<328x128xbf16, #tpu.memory_space<vmem>>, %arg6: memref<1x1x128xf32, #tpu.memory_space<vmem>>, %arg7: memref<1x1x128xf32, #tpu.memory_space<vmem>>) attributes {dimension_semantics = [#tpu.dimension_semantics<parallel>, #tpu.dimension_semantics<parallel>], iteration_bounds = array<i64: 2, 1>, scalar_prefetch = 0 : i64, scratch_operands = 0 : i64, tpu.core_type = #tpu.core_type<tc>, window_params = [{transform_indices = @transform_0, window_bounds = array<i64: 1, 368, 128>}, {transform_indices = @transform_1, window_bounds = array<i64: 9, 128, 128>}, {transform_indices = @transform_2, window_bounds = array<i64: 328, 1>}, {transform_indices = @transform_3, window_bounds = array<i64: 328, 128>}, {transform_indices = @transform_4, window_bounds = array<i64: 1, 1, 128>}, {transform_indices = @transform_5, window_bounds = array<i64: 1, 1, 128>}]} {
    %cst = arith.constant 0.000000e+00 : f32
    %0 = vector.broadcast %cst : f32 to vector<328x128xf32>
    %c0 = arith.constant 0 : index
    %c0_0 = arith.constant 0 : index
    %c0_1 = arith.constant 0 : index
    %1 = vector.load %arg2[%c0, %c0_0, %c0_1] : memref<1x368x128xbf16, #tpu.memory_space<vmem>>, vector<1x328x128xbf16>
    %2 = vector.shape_cast %1 : vector<1x328x128xbf16> to vector<328x128xbf16>
    %c0_2 = arith.constant 0 : index
    %c0_3 = arith.constant 0 : index
    %c0_4 = arith.constant 0 : index
    %3 = vector.load %arg3[%c0_2, %c0_3, %c0_4] : memref<9x128x128xbf16, #tpu.memory_space<vmem>>, vector<1x128x128xbf16>
    %4 = vector.shape_cast %3 : vector<1x128x128xbf16> to vector<128x128xbf16>
    %cst_5 = arith.constant dense<0.000000e+00> : vector<328x128xf32>
    %5 = tpu.matmul %2, %4, %cst_5 {dimension_numbers = #tpu.dot_dimension_numbers<[1], [0], [0], [1], [0, 0, 1, 1], [], []>} : vector<328x128xbf16>, vector<128x128xbf16>, vector<328x128xf32> -> vector<328x128xf32>
    %6 = arith.addf %0, %5 : vector<328x128xf32>
    %c0_6 = arith.constant 0 : index
    %c1 = arith.constant 1 : index
    %c0_7 = arith.constant 0 : index
    %7 = vector.load %arg2[%c0_6, %c1, %c0_7] : memref<1x368x128xbf16, #tpu.memory_space<vmem>>, vector<1x328x128xbf16>
    %8 = vector.shape_cast %7 : vector<1x328x128xbf16> to vector<328x128xbf16>
    %c1_8 = arith.constant 1 : index
    %c0_9 = arith.constant 0 : index
    %c0_10 = arith.constant 0 : index
    %9 = vector.load %arg3[%c1_8, %c0_9, %c0_10] : memref<9x128x128xbf16, #tpu.memory_space<vmem>>, vector<1x128x128xbf16>
    %10 = vector.shape_cast %9 : vector<1x128x128xbf16> to vector<128x128xbf16>
    %cst_11 = arith.constant dense<0.000000e+00> : vector<328x128xf32>
    %11 = tpu.matmul %8, %10, %cst_11 {dimension_numbers = #tpu.dot_dimension_numbers<[1], [0], [0], [1], [0, 0, 1, 1], [], []>} : vector<328x128xbf16>, vector<128x128xbf16>, vector<328x128xf32> -> vector<328x128xf32>
    %12 = arith.addf %6, %11 : vector<328x128xf32>
    %c0_12 = arith.constant 0 : index
    %c2 = arith.constant 2 : index
    %c0_13 = arith.constant 0 : index
    %13 = vector.load %arg2[%c0_12, %c2, %c0_13] : memref<1x368x128xbf16, #tpu.memory_space<vmem>>, vector<1x328x128xbf16>
    %14 = vector.shape_cast %13 : vector<1x328x128xbf16> to vector<328x128xbf16>
    %c2_14 = arith.constant 2 : index
    %c0_15 = arith.constant 0 : index
    %c0_16 = arith.constant 0 : index
    %15 = vector.load %arg3[%c2_14, %c0_15, %c0_16] : memref<9x128x128xbf16, #tpu.memory_space<vmem>>, vector<1x128x128xbf16>
    %16 = vector.shape_cast %15 : vector<1x128x128xbf16> to vector<128x128xbf16>
    %cst_17 = arith.constant dense<0.000000e+00> : vector<328x128xf32>
    %17 = tpu.matmul %14, %16, %cst_17 {dimension_numbers = #tpu.dot_dimension_numbers<[1], [0], [0], [1], [0, 0, 1, 1], [], []>} : vector<328x128xbf16>, vector<128x128xbf16>, vector<328x128xf32> -> vector<328x128xf32>
    %18 = arith.addf %12, %17 : vector<328x128xf32>
    %c0_18 = arith.constant 0 : index
    %c18 = arith.constant 18 : index
    %c0_19 = arith.constant 0 : index
    %19 = vector.load %arg2[%c0_18, %c18, %c0_19] : memref<1x368x128xbf16, #tpu.memory_space<vmem>>, vector<1x328x128xbf16>
    %20 = vector.shape_cast %19 : vector<1x328x128xbf16> to vector<328x128xbf16>
    %c3 = arith.constant 3 : index
    %c0_20 = arith.constant 0 : index
    %c0_21 = arith.constant 0 : index
    %21 = vector.load %arg3[%c3, %c0_20, %c0_21] : memref<9x128x128xbf16, #tpu.memory_space<vmem>>, vector<1x128x128xbf16>
    %22 = vector.shape_cast %21 : vector<1x128x128xbf16> to vector<128x128xbf16>
    %cst_22 = arith.constant dense<0.000000e+00> : vector<328x128xf32>
    %23 = tpu.matmul %20, %22, %cst_22 {dimension_numbers = #tpu.dot_dimension_numbers<[1], [0], [0], [1], [0, 0, 1, 1], [], []>} : vector<328x128xbf16>, vector<128x128xbf16>, vector<328x128xf32> -> vector<328x128xf32>
    %24 = arith.addf %18, %23 : vector<328x128xf32>
    %c0_23 = arith.constant 0 : index
    %c19 = arith.constant 19 : index
    %c0_24 = arith.constant 0 : index
    %25 = vector.load %arg2[%c0_23, %c19, %c0_24] : memref<1x368x128xbf16, #tpu.memory_space<vmem>>, vector<1x328x128xbf16>
    %26 = vector.shape_cast %25 : vector<1x328x128xbf16> to vector<328x128xbf16>
    %c4 = arith.constant 4 : index
    %c0_25 = arith.constant 0 : index
    %c0_26 = arith.constant 0 : index
    %27 = vector.load %arg3[%c4, %c0_25, %c0_26] : memref<9x128x128xbf16, #tpu.memory_space<vmem>>, vector<1x128x128xbf16>
    %28 = vector.shape_cast %27 : vector<1x128x128xbf16> to vector<128x128xbf16>
    %cst_27 = arith.constant dense<0.000000e+00> : vector<328x128xf32>
    %29 = tpu.matmul %26, %28, %cst_27 {dimension_numbers = #tpu.dot_dimension_numbers<[1], [0], [0], [1], [0, 0, 1, 1], [], []>} : vector<328x128xbf16>, vector<128x128xbf16>, vector<328x128xf32> -> vector<328x128xf32>
    %30 = arith.addf %24, %29 : vector<328x128xf32>
    %c0_28 = arith.constant 0 : index
    %c20 = arith.constant 20 : index
    %c0_29 = arith.constant 0 : index
    %31 = vector.load %arg2[%c0_28, %c20, %c0_29] : memref<1x368x128xbf16, #tpu.memory_space<vmem>>, vector<1x328x128xbf16>
    %32 = vector.shape_cast %31 : vector<1x328x128xbf16> to vector<328x128xbf16>
    %c5 = arith.constant 5 : index
    %c0_30 = arith.constant 0 : index
    %c0_31 = arith.constant 0 : index
    %33 = vector.load %arg3[%c5, %c0_30, %c0_31] : memref<9x128x128xbf16, #tpu.memory_space<vmem>>, vector<1x128x128xbf16>
    %34 = vector.shape_cast %33 : vector<1x128x128xbf16> to vector<128x128xbf16>
    %cst_32 = arith.constant dense<0.000000e+00> : vector<328x128xf32>
    %35 = tpu.matmul %32, %34, %cst_32 {dimension_numbers = #tpu.dot_dimension_numbers<[1], [0], [0], [1], [0, 0, 1, 1], [], []>} : vector<328x128xbf16>, vector<128x128xbf16>, vector<328x128xf32> -> vector<328x128xf32>
    %36 = arith.addf %30, %35 : vector<328x128xf32>
    %c0_33 = arith.constant 0 : index
    %c36 = arith.constant 36 : index
    %c0_34 = arith.constant 0 : index
    %37 = vector.load %arg2[%c0_33, %c36, %c0_34] : memref<1x368x128xbf16, #tpu.memory_space<vmem>>, vector<1x328x128xbf16>
    %38 = vector.shape_cast %37 : vector<1x328x128xbf16> to vector<328x128xbf16>
    %c6 = arith.constant 6 : index
    %c0_35 = arith.constant 0 : index
    %c0_36 = arith.constant 0 : index
    %39 = vector.load %arg3[%c6, %c0_35, %c0_36] : memref<9x128x128xbf16, #tpu.memory_space<vmem>>, vector<1x128x128xbf16>
    %40 = vector.shape_cast %39 : vector<1x128x128xbf16> to vector<128x128xbf16>
    %cst_37 = arith.constant dense<0.000000e+00> : vector<328x128xf32>
    %41 = tpu.matmul %38, %40, %cst_37 {dimension_numbers = #tpu.dot_dimension_numbers<[1], [0], [0], [1], [0, 0, 1, 1], [], []>} : vector<328x128xbf16>, vector<128x128xbf16>, vector<328x128xf32> -> vector<328x128xf32>
    %42 = arith.addf %36, %41 : vector<328x128xf32>
    %c0_38 = arith.constant 0 : index
    %c37 = arith.constant 37 : index
    %c0_39 = arith.constant 0 : index
    %43 = vector.load %arg2[%c0_38, %c37, %c0_39] : memref<1x368x128xbf16, #tpu.memory_space<vmem>>, vector<1x328x128xbf16>
    %44 = vector.shape_cast %43 : vector<1x328x128xbf16> to vector<328x128xbf16>
    %c7 = arith.constant 7 : index
    %c0_40 = arith.constant 0 : index
    %c0_41 = arith.constant 0 : index
    %45 = vector.load %arg3[%c7, %c0_40, %c0_41] : memref<9x128x128xbf16, #tpu.memory_space<vmem>>, vector<1x128x128xbf16>
    %46 = vector.shape_cast %45 : vector<1x128x128xbf16> to vector<128x128xbf16>
    %cst_42 = arith.constant dense<0.000000e+00> : vector<328x128xf32>
    %47 = tpu.matmul %44, %46, %cst_42 {dimension_numbers = #tpu.dot_dimension_numbers<[1], [0], [0], [1], [0, 0, 1, 1], [], []>} : vector<328x128xbf16>, vector<128x128xbf16>, vector<328x128xf32> -> vector<328x128xf32>
    %48 = arith.addf %42, %47 : vector<328x128xf32>
    %c0_43 = arith.constant 0 : index
    %c38 = arith.constant 38 : index
    %c0_44 = arith.constant 0 : index
    %49 = vector.load %arg2[%c0_43, %c38, %c0_44] : memref<1x368x128xbf16, #tpu.memory_space<vmem>>, vector<1x328x128xbf16>
    %50 = vector.shape_cast %49 : vector<1x328x128xbf16> to vector<328x128xbf16>
    %c8 = arith.constant 8 : index
    %c0_45 = arith.constant 0 : index
    %c0_46 = arith.constant 0 : index
    %51 = vector.load %arg3[%c8, %c0_45, %c0_46] : memref<9x128x128xbf16, #tpu.memory_space<vmem>>, vector<1x128x128xbf16>
    %52 = vector.shape_cast %51 : vector<1x128x128xbf16> to vector<128x128xbf16>
    %cst_47 = arith.constant dense<0.000000e+00> : vector<328x128xf32>
    %53 = tpu.matmul %50, %52, %cst_47 {dimension_numbers = #tpu.dot_dimension_numbers<[1], [0], [0], [1], [0, 0, 1, 1], [], []>} : vector<328x128xbf16>, vector<128x128xbf16>, vector<328x128xf32> -> vector<328x128xf32>
    %54 = arith.addf %48, %53 : vector<328x128xf32>
    %55 = arith.truncf %54 : vector<328x128xf32> to vector<328x128xbf16>
    %c0_48 = arith.constant 0 : index
    %c0_49 = arith.constant 0 : index
    %56 = vector.load %arg5[%c0_48, %c0_49] : memref<328x128xbf16, #tpu.memory_space<vmem>>, vector<328x128xbf16>
    tpu.vector_store %arg5[%c0_48, %c0_49], %55 {strides = array<i32>} : memref<328x128xbf16, #tpu.memory_space<vmem>>, vector<328x128xbf16>,
    %c0_50 = arith.constant 0 : index
    %c0_51 = arith.constant 0 : index
    %57 = vector.load %arg4[%c0_50, %c0_51] : memref<328x1xf32, #tpu.memory_space<vmem>>, vector<328x1xf32>
    %58 = vector.broadcast %57 : vector<328x1xf32> to vector<328x128xf32>
    %59 = arith.mulf %54, %58 : vector<328x128xf32>
    %cst_52 = arith.constant dense<0.000000e+00> : vector<128xf32>
    %60 = vector.multi_reduction <add>, %59, %cst_52 [0] : vector<328x128xf32> to vector<128xf32>
    %61 = vector.shape_cast %60 : vector<128xf32> to vector<1x128xf32>
    %c0_53 = arith.constant 0 : index
    %c0_54 = arith.constant 0 : index
    %c0_55 = arith.constant 0 : index
    %62 = vector.load %arg6[%c0_53, %c0_54, %c0_55] : memref<1x1x128xf32, #tpu.memory_space<vmem>>, vector<1x1x128xf32>
    %63 = vector.shape_cast %62 : vector<1x1x128xf32> to vector<1x128xf32>
    %64 = vector.shape_cast %61 : vector<1x128xf32> to vector<1x1x128xf32>
    tpu.vector_store %arg6[%c0_53, %c0_54, %c0_55], %64 {strides = array<i32>} : memref<1x1x128xf32, #tpu.memory_space<vmem>>, vector<1x1x128xf32>,
    %65 = arith.mulf %54, %59 : vector<328x128xf32>
    %cst_56 = arith.constant dense<0.000000e+00> : vector<128xf32>
    %66 = vector.multi_reduction <add>, %65, %cst_56 [0] : vector<328x128xf32> to vector<128xf32>
    %67 = vector.shape_cast %66 : vector<128xf32> to vector<1x128xf32>
    %c0_57 = arith.constant 0 : index
    %c0_58 = arith.constant 0 : index
    %c0_59 = arith.constant 0 : index
    %68 = vector.load %arg7[%c0_57, %c0_58, %c0_59] : memref<1x1x128xf32, #tpu.memory_space<vmem>>, vector<1x1x128xf32>
    %69 = vector.shape_cast %68 : vector<1x1x128xf32> to vector<1x128xf32>
    %70 = vector.shape_cast %67 : vector<1x128xf32> to vector<1x1x128xf32>
    tpu.vector_store %arg7[%c0_57, %c0_58, %c0_59], %70 {strides = array<i32>} : memref<1x1x128xf32, #tpu.memory_space<vmem>>, vector<1x1x128xf32>,
    return
  }
  func.func @transform_0(%arg0: i32, %arg1: i32) -> (i32, i32, i32) {
    %c0_i32 = arith.constant 0 : i32
    %c0_i32_0 = arith.constant 0 : i32
    %c0_i32_1 = arith.constant 0 : i32
    return %arg0, %c0_i32, %c0_i32_0 : i32, i32, i32
  }
  func.func @transform_1(%arg0: i32, %arg1: i32) -> (i32, i32, i32) {
    %c0_i32 = arith.constant 0 : i32
    %c0_i32_0 = arith.constant 0 : i32
    %c0_i32_1 = arith.constant 0 : i32
    return %c0_i32, %c0_i32_0, %arg1 : i32, i32, i32
  }
  func.func @transform_2(%arg0: i32, %arg1: i32) -> (i32, i32) {
    %c0_i32 = arith.constant 0 : i32
    %c0_i32_0 = arith.constant 0 : i32
    return %arg0, %c0_i32 : i32, i32
  }
  func.func @transform_3(%arg0: i32, %arg1: i32) -> (i32, i32) {
    %c0_i32 = arith.constant 0 : i32
    return %arg0, %arg1 : i32, i32
  }
  func.func @transform_4(%arg0: i32, %arg1: i32) -> (i32, i32, i32) {
    %c0_i32 = arith.constant 0 : i32
    %c0_i32_0 = arith.constant 0 : i32
    return %arg0, %c0_i32, %arg1 : i32, i32, i32
  }
  func.func @transform_5(%arg0: i32, %arg1: i32) -> (i32, i32, i32) {
    %c0_i32 = arith.constant 0 : i32
    %c0_i32_0 = arith.constant 0 : i32
    return %arg0, %c0_i32, %arg1 : i32, i32, i32
  }
}

module attributes {stable_mosaic.version = 11 : i64} {
  func.func @_bn_relu_kernel(%arg0: i32, %arg1: memref<656x128xbf16, #tpu.memory_space<vmem>>, %arg2: memref<1x128xf32, #tpu.memory_space<vmem>>, %arg3: memref<1x128xf32, #tpu.memory_space<vmem>>, %arg4: memref<656x128xbf16, #tpu.memory_space<vmem>>) attributes {dimension_semantics = [#tpu.dimension_semantics<parallel>], iteration_bounds = array<i64: 1>, scalar_prefetch = 0 : i64, scratch_operands = 0 : i64, tpu.core_type = #tpu.core_type<tc>, window_params = [{transform_indices = @transform_0, window_bounds = array<i64: 656, 128>}, {pipeline_mode = #tpu.pipeline_mode<synchronous>, transform_indices = @transform_1, window_bounds = array<i64: 1, 128>}, {pipeline_mode = #tpu.pipeline_mode<synchronous>, transform_indices = @transform_2, window_bounds = array<i64: 1, 128>}, {transform_indices = @transform_3, window_bounds = array<i64: 656, 128>}]} {
    %c0 = arith.constant 0 : index
    %c0_0 = arith.constant 0 : index
    %0 = vector.load %arg1[%c0, %c0_0] : memref<656x128xbf16, #tpu.memory_space<vmem>>, vector<656x128xbf16>
    %1 = arith.extf %0 : vector<656x128xbf16> to vector<656x128xf32>
    %c0_1 = arith.constant 0 : index
    %c0_2 = arith.constant 0 : index
    %2 = vector.load %arg2[%c0_1, %c0_2] : memref<1x128xf32, #tpu.memory_space<vmem>>, vector<1x128xf32>
    %3 = vector.broadcast %2 : vector<1x128xf32> to vector<656x128xf32>
    %4 = arith.mulf %1, %3 : vector<656x128xf32>
    %c0_3 = arith.constant 0 : index
    %c0_4 = arith.constant 0 : index
    %5 = vector.load %arg3[%c0_3, %c0_4] : memref<1x128xf32, #tpu.memory_space<vmem>>, vector<1x128xf32>
    %6 = vector.broadcast %5 : vector<1x128xf32> to vector<656x128xf32>
    %7 = arith.addf %4, %6 : vector<656x128xf32>
    %cst = arith.constant 0.000000e+00 : f32
    %8 = vector.broadcast %cst : f32 to vector<656x128xf32>
    %9 = arith.maximumf %7, %8 : vector<656x128xf32>
    %10 = arith.truncf %9 : vector<656x128xf32> to vector<656x128xbf16>
    %c0_5 = arith.constant 0 : index
    %c0_6 = arith.constant 0 : index
    %11 = vector.load %arg4[%c0_5, %c0_6] : memref<656x128xbf16, #tpu.memory_space<vmem>>, vector<656x128xbf16>
    tpu.vector_store %arg4[%c0_5, %c0_6], %10 {strides = array<i32>} : memref<656x128xbf16, #tpu.memory_space<vmem>>, vector<656x128xbf16>,
    return
  }
  func.func @transform_0(%arg0: i32) -> (i32, i32) {
    %c0_i32 = arith.constant 0 : i32
    %c0_i32_0 = arith.constant 0 : i32
    return %arg0, %c0_i32 : i32, i32
  }
  func.func @transform_1(%arg0: i32) -> (i32, i32) {
    %c0_i32 = arith.constant 0 : i32
    %c0_i32_0 = arith.constant 0 : i32
    %c0_i32_1 = arith.constant 0 : i32
    return %c0_i32, %c0_i32_0 : i32, i32
  }
  func.func @transform_2(%arg0: i32) -> (i32, i32) {
    %c0_i32 = arith.constant 0 : i32
    %c0_i32_0 = arith.constant 0 : i32
    %c0_i32_1 = arith.constant 0 : i32
    return %c0_i32, %c0_i32_0 : i32, i32
  }
  func.func @transform_3(%arg0: i32) -> (i32, i32) {
    %c0_i32 = arith.constant 0 : i32
    %c0_i32_0 = arith.constant 0 : i32
    return %arg0, %c0_i32 : i32, i32
  }
}

module attributes {stable_mosaic.version = 11 : i64} {
  func.func @_bn_relu_kernel(%arg0: i32, %arg1: memref<656x128xbf16, #tpu.memory_space<vmem>>, %arg2: memref<1x128xf32, #tpu.memory_space<vmem>>, %arg3: memref<1x128xf32, #tpu.memory_space<vmem>>, %arg4: memref<656x128xf32, #tpu.memory_space<vmem>>) attributes {dimension_semantics = [#tpu.dimension_semantics<parallel>], iteration_bounds = array<i64: 1>, scalar_prefetch = 0 : i64, scratch_operands = 0 : i64, tpu.core_type = #tpu.core_type<tc>, window_params = [{transform_indices = @transform_0, window_bounds = array<i64: 656, 128>}, {pipeline_mode = #tpu.pipeline_mode<synchronous>, transform_indices = @transform_1, window_bounds = array<i64: 1, 128>}, {pipeline_mode = #tpu.pipeline_mode<synchronous>, transform_indices = @transform_2, window_bounds = array<i64: 1, 128>}, {transform_indices = @transform_3, window_bounds = array<i64: 656, 128>}]} {
    %c0 = arith.constant 0 : index
    %c0_0 = arith.constant 0 : index
    %0 = vector.load %arg1[%c0, %c0_0] : memref<656x128xbf16, #tpu.memory_space<vmem>>, vector<656x128xbf16>
    %1 = arith.extf %0 : vector<656x128xbf16> to vector<656x128xf32>
    %c0_1 = arith.constant 0 : index
    %c0_2 = arith.constant 0 : index
    %2 = vector.load %arg2[%c0_1, %c0_2] : memref<1x128xf32, #tpu.memory_space<vmem>>, vector<1x128xf32>
    %3 = vector.broadcast %2 : vector<1x128xf32> to vector<656x128xf32>
    %4 = arith.mulf %1, %3 : vector<656x128xf32>
    %c0_3 = arith.constant 0 : index
    %c0_4 = arith.constant 0 : index
    %5 = vector.load %arg3[%c0_3, %c0_4] : memref<1x128xf32, #tpu.memory_space<vmem>>, vector<1x128xf32>
    %6 = vector.broadcast %5 : vector<1x128xf32> to vector<656x128xf32>
    %7 = arith.addf %4, %6 : vector<656x128xf32>
    %cst = arith.constant 0.000000e+00 : f32
    %8 = vector.broadcast %cst : f32 to vector<656x128xf32>
    %9 = arith.maximumf %7, %8 : vector<656x128xf32>
    %c0_5 = arith.constant 0 : index
    %c0_6 = arith.constant 0 : index
    %10 = vector.load %arg4[%c0_5, %c0_6] : memref<656x128xf32, #tpu.memory_space<vmem>>, vector<656x128xf32>
    tpu.vector_store %arg4[%c0_5, %c0_6], %9 {strides = array<i32>} : memref<656x128xf32, #tpu.memory_space<vmem>>, vector<656x128xf32>,
    return
  }
  func.func @transform_0(%arg0: i32) -> (i32, i32) {
    %c0_i32 = arith.constant 0 : i32
    %c0_i32_0 = arith.constant 0 : i32
    return %arg0, %c0_i32 : i32, i32
  }
  func.func @transform_1(%arg0: i32) -> (i32, i32) {
    %c0_i32 = arith.constant 0 : i32
    %c0_i32_0 = arith.constant 0 : i32
    %c0_i32_1 = arith.constant 0 : i32
    return %c0_i32, %c0_i32_0 : i32, i32
  }
  func.func @transform_2(%arg0: i32) -> (i32, i32) {
    %c0_i32 = arith.constant 0 : i32
    %c0_i32_0 = arith.constant 0 : i32
    %c0_i32_1 = arith.constant 0 : i32
    return %c0_i32, %c0_i32_0 : i32, i32
  }
  func.func @transform_3(%arg0: i32) -> (i32, i32) {
    %c0_i32 = arith.constant 0 : i32
    %c0_i32_0 = arith.constant 0 : i32
    return %arg0, %c0_i32 : i32, i32
  }
}

</mosaic_0001>

<bundles_post_ra>
// kernel: up_forward.5
= control target key start
LH: loop header
LB: loop body
LE: loop exit
PB: predicated region body
PF: predicated region fallthrough
CT: control target
= control target key end

     0   :  { %s1491_s0 = inlined_call_operand.vmem [shape: bf16[656,128], index: 0, kind: input, shape index: {}, may-alias: {0,3}]   ;;  %s1492_s1 = inlined_call_operand.vmem [shape: f32[1,128], index: 1, kind: input, shape index: {}]   ;;  %s1493_s2 = inlined_call_operand.vmem [shape: f32[1,128], index: 2, kind: input, shape index: {}]   ;;  %s1494_s3 = inlined_call_operand.vmem [shape: bf16[656,128], index: 3, kind: output, shape index: {}, may-alias: {0,3}]  }
   0x1   :  { %v601_v0 = vld [vmem:[%s1491_s0] sm:$0xff]   ;;  %v969_v5 = vld [vmem:[%s1491_s0 + $0x8] sm:$0xff]   ;;  %v970_v8 = vld [vmem:[%s1491_s0 + $0x10] sm:$0xff]  }
   0x2   :  { %v1077_v1 = vld [vmem:[%s1492_s1] ss:$0 sm:$0xff]  ;;  %v602_v2 = vunpack.c.l.bf16 %v601_v0  ;;  %v603_v3 = vunpack.c.h.bf16 %v601_v0  ;;  %v606_v6 = vunpack.c.l.bf16 %v969_v5  ;;  %v607_v7 = vunpack.c.h.bf16 %v969_v5  ;;  %v971_v9 = vld [vmem:[%s1491_s0 + $0x18] sm:$0xff]   ;;  %v973_v35 = vld [vmem:[%s1491_s0 + $0x28] sm:$0xff]  }
   0x3   :  { %v1082_v4 = vld [vmem:[%s1493_s2] ss:$0 sm:$0xff]  ;;  %v610_v12 = vunpack.c.l.bf16 %v970_v8  ;;  %v611_v13 = vunpack.c.h.bf16 %v970_v8  ;;  %v614_v16 = vunpack.c.l.bf16 %v971_v9  ;;  %v615_v17 = vunpack.c.h.bf16 %v971_v9  ;;  %v974_v40 = vld [vmem:[%s1491_s0 + $0x30] sm:$0xff]   ;;  %v975_v45 = vld [vmem:[%s1491_s0 + $0x38] sm:$0xff]  }
   0x4   :  { %v182_v10 = vmul.f32 %v1077_v1, %v602_v2  ;;  %v183_v11 = vmul.f32 %v1077_v1, %v603_v3  ;;  %v184_v14 = vmul.f32 %v1077_v1, %v606_v6  ;;  %v185_v15 = vmul.f32 %v1077_v1, %v607_v7  ;;  %v972_v26 = vld [vmem:[%s1491_s0 + $0x20] sm:$0xff]  }
   0x5   :  { %v186_v20 = vmul.f32 %v1077_v1, %v610_v12  ;;  %v187_v21 = vmul.f32 %v1077_v1, %v611_v13  ;;  %v188_v24 = vmul.f32 %v1077_v1, %v614_v16  ;;  %v189_v25 = vmul.f32 %v1077_v1, %v615_v17 }
   0x6   :  { %v268_v18 = vadd.f32 %v1082_v4, %v182_v10  ;;  %v269_v19 = vadd.f32 %v1082_v4, %v183_v11  ;;  %v270_v22 = vadd.f32 %v1082_v4, %v184_v14  ;;  %v271_v23 = vadd.f32 %v1082_v4, %v185_v15 }
   0x7   :  { %v272_v29 = vadd.f32 %v1082_v4, %v186_v20  ;;  %v273_v30 = vadd.f32 %v1082_v4, %v187_v21  ;;  %v274_v33 = vadd.f32 %v1082_v4, %v188_v24  ;;  %v275_v34 = vadd.f32 %v1082_v4, %v189_v25 }
   0x8   :  { %v350_v27 = vmax.f32 %v268_v18, 0.0  ;;  %v351_v28 = vmax.f32 %v269_v19, 0.0  ;;  %v352_v31 = vmax.f32 %v270_v22, 0.0  ;;  %v353_v32 = vmax.f32 %v271_v23, 0.0 }
   0x9   :  { %v354_v37 = vmax.f32 %v272_v29, 0.0  ;;  %v355_v38 = vmax.f32 %v273_v30, 0.0  ;;  %v618_v39 = vunpack.c.l.bf16 %v972_v26  ;;  %v356_v42 = vmax.f32 %v274_v33, 0.0 }
   0xa   :  { %v767_v36 = vpack.c.bf16 %v351_v28, %v350_v27  ;;  %v772_v41 = vpack.c.bf16 %v353_v32, %v352_v31  ;;  %v357_v43 = vmax.f32 %v275_v34, 0.0  ;;  %v619_v44 = vunpack.c.h.bf16 %v972_v26 }
   0xb   :  { %v777_v46 = vpack.c.bf16 %v355_v38, %v354_v37  ;;  %v190_v47 = vmul.f32 %v1077_v1, %v618_v39  ;;  %v622_v48 = vunpack.c.l.bf16 %v973_v35  ;;  %v623_v49 = vunpack.c.h.bf16 %v973_v35 }
   0xc   :  { %768 = vst [vmem:[%s1494_s3] sm:$0xff] %v767_v36   ;;  %v782_v50 = vpack.c.bf16 %v357_v43, %v356_v42  ;;  %v191_v51 = vmul.f32 %v1077_v1, %v619_v44  ;;  %v626_v52 = vunpack.c.l.bf16 %v974_v40  ;;  %v627_v53 = vunpack.c.h.bf16 %v974_v40 }
   0xd   :  { %1009 = vst [vmem:[%s1494_s3 + $0x8] sm:$0xff] %v772_v41   ;;  %v276_v54 = vadd.f32 %v1082_v4, %v190_v47  ;;  %v192_v55 = vmul.f32 %v1077_v1, %v622_v48  ;;  %v193_v56 = vmul.f32 %v1077_v1, %v623_v49  ;;  %v630_v57 = vunpack.c.l.bf16 %v975_v45 }
   0xe   :  { %1010 = vst [vmem:[%s1494_s3 + $0x10] sm:$0xff] %v777_v46   ;;  %v277_v58 = vadd.f32 %v1082_v4, %v191_v51  ;;  %v194_v59 = vmul.f32 %v1077_v1, %v626_v52  ;;  %v195_v60 = vmul.f32 %v1077_v1, %v627_v53  ;;  %v631_v61 = vunpack.c.h.bf16 %v975_v45 }
   0xf   :  { %1011 = vst [vmem:[%s1494_s3 + $0x18] sm:$0xff] %v782_v50   ;;  %v358_v63 = vmax.f32 %v276_v54, 0.0  ;;  %v278_v0 = vadd.f32 %v1082_v4, %v192_v55  ;;  %v279_v2 = vadd.f32 %v1082_v4, %v193_v56  ;;  %v196_v3 = vmul.f32 %v1077_v1, %v630_v57 }
  0x10   :  { %v359_v5 = vmax.f32 %v277_v58, 0.0  ;;  %v280_v6 = vadd.f32 %v1082_v4, %v194_v59  ;;  %v281_v7 = vadd.f32 %v1082_v4, %v195_v60  ;;  %v197_v8 = vmul.f32 %v1077_v1, %v631_v61 }
  0x11   :  { %v360_v9 = vmax.f32 %v278_v0, 0.0  ;;  %v361_v10 = vmax.f32 %v279_v2, 0.0  ;;  %v282_v11 = vadd.f32 %v1082_v4, %v196_v3 }
  0x12   :  { %v787_v14 = vpack.c.bf16 %v359_v5, %v358_v63  ;;  %v362_v15 = vmax.f32 %v280_v6, 0.0  ;;  %v363_v16 = vmax.f32 %v281_v7, 0.0  ;;  %v283_v17 = vadd.f32 %v1082_v4, %v197_v8 }
  0x13   :  { %v792_v19 = vpack.c.bf16 %v361_v10, %v360_v9  ;;  %v364_v20 = vmax.f32 %v282_v11, 0.0 }
  0x14   :  { %v797_v24 = vpack.c.bf16 %v363_v16, %v362_v15  ;;  %v365_v25 = vmax.f32 %v283_v17, 0.0 }
  0x16   :  { %v976_v62 = vld [vmem:[%s1491_s0 + $0x40] sm:$0xff]   ;;  %v977_v13 = vld [vmem:[%s1491_s0 + $0x48] sm:$0xff]   ;;  %v978_v18 = vld [vmem:[%s1491_s0 + $0x50] sm:$0xff]   ;;  %v802_v32 = vpack.c.bf16 %v365_v25, %v364_v20 }
  0x17   :  { %v634_v12 = vunpack.c.l.bf16 %v976_v62  ;;  %v635_v21 = vunpack.c.h.bf16 %v976_v62  ;;  %v979_v23 = vld [vmem:[%s1491_s0 + $0x58] sm:$0xff]   ;;  %v638_v26 = vunpack.c.l.bf16 %v977_v13  ;;  %v639_v27 = vunpack.c.h.bf16 %v977_v13 }
  0x18   :  { %1012 = vst [vmem:[%s1494_s3 + $0x20] sm:$0xff] %v787_v14   ;;  %v642_v30 = vunpack.c.l.bf16 %v978_v18  ;;  %v643_v31 = vunpack.c.h.bf16 %v978_v18  ;;  %v646_v35 = vunpack.c.l.bf16 %v979_v23  ;;  %v647_v43 = vunpack.c.h.bf16 %v979_v23 }
  0x19   :  { %v198_v22 = vmul.f32 %v1077_v1, %v634_v12  ;;  %1013 = vst [vmem:[%s1494_s3 + $0x28] sm:$0xff] %v792_v19   ;;  %v199_v28 = vmul.f32 %v1077_v1, %v635_v21  ;;  %v200_v33 = vmul.f32 %v1077_v1, %v638_v26  ;;  %v201_v34 = vmul.f32 %v1077_v1, %v639_v27 }
  0x1a   :  { %1014 = vst [vmem:[%s1494_s3 + $0x30] sm:$0xff] %v797_v24   ;;  %v202_v39 = vmul.f32 %v1077_v1, %v642_v30  ;;  %v203_v40 = vmul.f32 %v1077_v1, %v643_v31  ;;  %v204_v44 = vmul.f32 %v1077_v1, %v646_v35  ;;  %v205_v51 = vmul.f32 %v1077_v1, %v647_v43 }
  0x1b   :  { %v284_v29 = vadd.f32 %v1082_v4, %v198_v22  ;;  %v285_v37 = vadd.f32 %v1082_v4, %v199_v28  ;;  %v286_v41 = vadd.f32 %v1082_v4, %v200_v33  ;;  %v287_v42 = vadd.f32 %v1082_v4, %v201_v34 }
  0x1c   :  { %v288_v46 = vadd.f32 %v1082_v4, %v202_v39  ;;  %v289_v47 = vadd.f32 %v1082_v4, %v203_v40  ;;  %v290_v52 = vadd.f32 %v1082_v4, %v204_v44  ;;  %v291_v60 = vadd.f32 %v1082_v4, %v205_v51 }
  0x1d   :  { %v366_v38 = vmax.f32 %v284_v29, 0.0  ;;  %v367_v45 = vmax.f32 %v285_v37, 0.0  ;;  %v368_v49 = vmax.f32 %v286_v41, 0.0  ;;  %v369_v50 = vmax.f32 %v287_v42, 0.0 }
  0x1e   :  { %v370_v55 = vmax.f32 %v288_v46, 0.0  ;;  %v371_v56 = vmax.f32 %v289_v47, 0.0  ;;  %v372_v61 = vmax.f32 %v290_v52, 0.0  ;;  %v373_v6 = vmax.f32 %v291_v60, 0.0 }
  0x1f   :  { %v807_v54 = vpack.c.bf16 %v367_v45, %v366_v38  ;;  %v812_v59 = vpack.c.bf16 %v369_v50, %v368_v49 }
  0x20   :  { %v817_v0 = vpack.c.bf16 %v371_v56, %v370_v55  ;;  %v822_v15 = vpack.c.bf16 %v373_v6, %v372_v61 }
  0x21   :  { %v980_v36 = vld [vmem:[%s1491_s0 + $0x60] sm:$0xff]  }
  0x22   :  { %1015 = vst [vmem:[%s1494_s3 + $0x38] sm:$0xff] %v802_v32   ;;  %v650_v48 = vunpack.c.l.bf16 %v980_v36  ;;  %v651_v57 = vunpack.c.h.bf16 %v980_v36 }
  0x24   :  { %v206_v62 = vmul.f32 %v1077_v1, %v650_v48  ;;  %v207_v2 = vmul.f32 %v1077_v1, %v651_v57 }
  0x26   :  { %v292_v7 = vadd.f32 %v1082_v4, %v206_v62  ;;  %v293_v10 = vadd.f32 %v1082_v4, %v207_v2 }
  0x28   :  { %v374_v16 = vmax.f32 %v292_v7, 0.0  ;;  %v375_v19 = vmax.f32 %v293_v10, 0.0 }
  0x29   :  { %v981_v53 = vld [vmem:[%s1491_s0 + $0x68] sm:$0xff]   ;;  %v982_v58 = vld [vmem:[%s1491_s0 + $0x70] sm:$0xff]   ;;  %v983_v63 = vld [vmem:[%s1491_s0 + $0x78] sm:$0xff]  }
  0x2a   :  { %1016 = vst [vmem:[%s1494_s3 + $0x40] sm:$0xff] %v807_v54   ;;  %v654_v3 = vunpack.c.l.bf16 %v981_v53  ;;  %v655_v5 = vunpack.c.h.bf16 %v981_v53  ;;  %v658_v8 = vunpack.c.l.bf16 %v982_v58  ;;  %v659_v9 = vunpack.c.h.bf16 %v982_v58 }
  0x2b   :  { %1017 = vst [vmem:[%s1494_s3 + $0x48] sm:$0xff] %v812_v59   ;;  %v662_v13 = vunpack.c.l.bf16 %v983_v63  ;;  %v663_v22 = vunpack.c.h.bf16 %v983_v63  ;;  %v827_v28 = vpack.c.bf16 %v375_v19, %v374_v16 }
  0x2c   :  { %1018 = vst [vmem:[%s1494_s3 + $0x50] sm:$0xff] %v817_v0   ;;  %v208_v11 = vmul.f32 %v1077_v1, %v654_v3  ;;  %v209_v12 = vmul.f32 %v1077_v1, %v655_v5  ;;  %v210_v17 = vmul.f32 %v1077_v1, %v658_v8  ;;  %v211_v18 = vmul.f32 %v1077_v1, %v659_v9 }
  0x2d   :  { %v212_v25 = vmul.f32 %v1077_v1, %v662_v13  ;;  %v213_v31 = vmul.f32 %v1077_v1, %v663_v22 }
  0x2e   :  { %v294_v20 = vadd.f32 %v1082_v4, %v208_v11  ;;  %v295_v21 = vadd.f32 %v1082_v4, %v209_v12  ;;  %v296_v23 = vadd.f32 %v1082_v4, %v210_v17  ;;  %v297_v24 = vadd.f32 %v1082_v4, %v211_v18 }
  0x2f   :  { %v298_v34 = vadd.f32 %v1082_v4, %v212_v25  ;;  %v299_v38 = vadd.f32 %v1082_v4, %v213_v31 }
  0x30   :  { %v376_v29 = vmax.f32 %v294_v20, 0.0  ;;  %v377_v30 = vmax.f32 %v295_v21, 0.0  ;;  %v378_v32 = vmax.f32 %v296_v23, 0.0  ;;  %v379_v33 = vmax.f32 %v297_v24, 0.0 }
  0x31   :  { %v380_v43 = vmax.f32 %v298_v34, 0.0  ;;  %v381_v46 = vmax.f32 %v299_v38, 0.0 }
  0x32   :  { %v832_v37 = vpack.c.bf16 %v377_v30, %v376_v29  ;;  %v837_v42 = vpack.c.bf16 %v379_v33, %v378_v32 }
  0x33   :  { %v984_v14 = vld [vmem:[%s1491_s0 + $0x80] sm:$0xff]   ;;  %v842_v55 = vpack.c.bf16 %v381_v46, %v380_v43 }
  0x34   :  { %1019 = vst [vmem:[%s1494_s3 + $0x58] sm:$0xff] %v822_v15   ;;  %v666_v26 = vunpack.c.l.bf16 %v984_v14  ;;  %v667_v35 = vunpack.c.h.bf16 %v984_v14 }
  0x36   :  { %v214_v39 = vmul.f32 %v1077_v1, %v666_v26  ;;  %v215_v44 = vmul.f32 %v1077_v1, %v667_v35 }
  0x38   :  { %v300_v47 = vadd.f32 %v1082_v4, %v214_v39  ;;  %v301_v50 = vadd.f32 %v1082_v4, %v215_v44 }
  0x3a   :  { %v382_v56 = vmax.f32 %v300_v47, 0.0  ;;  %v383_v59 = vmax.f32 %v301_v50, 0.0 }
  0x3b   :  { %v985_v27 = vld [vmem:[%s1491_s0 + $0x88] sm:$0xff]   ;;  %v986_v36 = vld [vmem:[%s1491_s0 + $0x90] sm:$0xff]  }
  0x3c   :  { %1020 = vst [vmem:[%s1494_s3 + $0x60] sm:$0xff] %v827_v28   ;;  %v670_v40 = vunpack.c.l.bf16 %v985_v27  ;;  %v671_v45 = vunpack.c.h.bf16 %v985_v27  ;;  %v674_v49 = vunpack.c.l.bf16 %v986_v36  ;;  %v675_v52 = vunpack.c.h.bf16 %v986_v36 }
  0x3d   :  { %v847_v6 = vpack.c.bf16 %v383_v59, %v382_v56 }
  0x3e   :  { %v216_v48 = vmul.f32 %v1077_v1, %v670_v40  ;;  %v217_v51 = vmul.f32 %v1077_v1, %v671_v45  ;;  %v218_v58 = vmul.f32 %v1077_v1, %v674_v49  ;;  %v219_v61 = vmul.f32 %v1077_v1, %v675_v52 }
  0x40   :  { %v302_v57 = vadd.f32 %v1082_v4, %v216_v48  ;;  %v303_v60 = vadd.f32 %v1082_v4, %v217_v51  ;;  %v304_v0 = vadd.f32 %v1082_v4, %v218_v58  ;;  %v305_v8 = vadd.f32 %v1082_v4, %v219_v61 }
  0x42   :  { %v384_v63 = vmax.f32 %v302_v57, 0.0  ;;  %v385_v7 = vmax.f32 %v303_v60, 0.0  ;;  %v386_v10 = vmax.f32 %v304_v0, 0.0  ;;  %v387_v16 = vmax.f32 %v305_v8, 0.0 }
  0x43   :  { %v987_v41 = vld [vmem:[%s1491_s0 + $0x98] sm:$0xff]  }
  0x44   :  { %1021 = vst [vmem:[%s1494_s3 + $0x68] sm:$0xff] %v832_v37   ;;  %v678_v53 = vunpack.c.l.bf16 %v987_v41  ;;  %v679_v62 = vunpack.c.h.bf16 %v987_v41  ;;  %v852_v15 = vpack.c.bf16 %v385_v7, %v384_v63  ;;  %v857_v24 = vpack.c.bf16 %v387_v16, %v386_v10 }
  0x45   :  { %1022 = vst [vmem:[%s1494_s3 + $0x70] sm:$0xff] %v837_v42  }
  0x46   :  { %v220_v2 = vmul.f32 %v1077_v1, %v678_v53  ;;  %v221_v9 = vmul.f32 %v1077_v1, %v679_v62 }
  0x48   :  { %v306_v11 = vadd.f32 %v1082_v4, %v220_v2  ;;  %v307_v17 = vadd.f32 %v1082_v4, %v221_v9 }
  0x4a   :  { %v388_v19 = vmax.f32 %v306_v11, 0.0  ;;  %v389_v25 = vmax.f32 %v307_v17, 0.0 }
  0x4c   :  { %v988_v54 = vld [vmem:[%s1491_s0 + $0xa0] sm:$0xff]   ;;  %v862_v33 = vpack.c.bf16 %v389_v25, %v388_v19 }
  0x4d   :  { %1023 = vst [vmem:[%s1494_s3 + $0x78] sm:$0xff] %v842_v55   ;;  %v682_v3 = vunpack.c.l.bf16 %v988_v54  ;;  %v683_v12 = vunpack.c.h.bf16 %v988_v54 }
  0x4f   :  { %v222_v13 = vmul.f32 %v1077_v1, %v682_v3  ;;  %v223_v20 = vmul.f32 %v1077_v1, %v683_v12 }
  0x51   :  { %v308_v21 = vadd.f32 %v1082_v4, %v222_v13  ;;  %v309_v28 = vadd.f32 %v1082_v4, %v223_v20 }
  0x53   :  { %v390_v29 = vmax.f32 %v308_v21, 0.0  ;;  %v391_v37 = vmax.f32 %v309_v28, 0.0 }
  0x54   :  { %v989_v5 = vld [vmem:[%s1491_s0 + $0xa8] sm:$0xff]   ;;  %v990_v14 = vld [vmem:[%s1491_s0 + $0xb0] sm:$0xff]  }
  0x55   :  { %1024 = vst [vmem:[%s1494_s3 + $0x80] sm:$0xff] %v847_v6   ;;  %v686_v18 = vunpack.c.l.bf16 %v989_v5  ;;  %v687_v22 = vunpack.c.h.bf16 %v989_v5  ;;  %v690_v27 = vunpack.c.l.bf16 %v990_v14  ;;  %v691_v31 = vunpack.c.h.bf16 %v990_v14 }
  0x56   :  { %v867_v46 = vpack.c.bf16 %v391_v37, %v390_v29 }
  0x57   :  { %v224_v26 = vmul.f32 %v1077_v1, %v686_v18  ;;  %v225_v30 = vmul.f32 %v1077_v1, %v687_v22  ;;  %v226_v35 = vmul.f32 %v1077_v1, %v690_v27  ;;  %v227_v39 = vmul.f32 %v1077_v1, %v691_v31 }
  0x59   :  { %v310_v34 = vadd.f32 %v1082_v4, %v224_v26  ;;  %v311_v38 = vadd.f32 %v1082_v4, %v225_v30  ;;  %v312_v42 = vadd.f32 %v1082_v4, %v226_v35  ;;  %v313_v48 = vadd.f32 %v1082_v4, %v227_v39 }
  0x5b   :  { %v392_v41 = vmax.f32 %v310_v34, 0.0  ;;  %v393_v47 = vmax.f32 %v311_v38, 0.0  ;;  %v394_v50 = vmax.f32 %v312_v42, 0.0  ;;  %v395_v56 = vmax.f32 %v313_v48, 0.0 }
  0x5c   :  { %v991_v23 = vld [vmem:[%s1491_s0 + $0xb8] sm:$0xff]  }
  0x5d   :  { %1025 = vst [vmem:[%s1494_s3 + $0x88] sm:$0xff] %v852_v15   ;;  %v694_v36 = vunpack.c.l.bf16 %v991_v23  ;;  %v695_v40 = vunpack.c.h.bf16 %v991_v23  ;;  %v872_v55 = vpack.c.bf16 %v393_v47, %v392_v41  ;;  %v877_v0 = vpack.c.bf16 %v395_v56, %v394_v50 }
  0x5f   :  { %v228_v43 = vmul.f32 %v1077_v1, %v694_v36  ;;  %v229_v49 = vmul.f32 %v1077_v1, %v695_v40 }
  0x61   :  { %v314_v51 = vadd.f32 %v1082_v4, %v228_v43  ;;  %v315_v57 = vadd.f32 %v1082_v4, %v229_v49 }
  0x63   :  { %v396_v59 = vmax.f32 %v314_v51, 0.0  ;;  %v397_v2 = vmax.f32 %v315_v57, 0.0 }
  0x64   :  { %v992_v32 = vld [vmem:[%s1491_s0 + $0xc0] sm:$0xff]  }
  0x65   :  { %1026 = vst [vmem:[%s1494_s3 + $0x90] sm:$0xff] %v857_v24   ;;  %v698_v44 = vunpack.c.l.bf16 %v992_v32  ;;  %v699_v52 = vunpack.c.h.bf16 %v992_v32  ;;  %v882_v11 = vpack.c.bf16 %v397_v2, %v396_v59 }
  0x66   :  { %1027 = vst [vmem:[%s1494_s3 + $0x98] sm:$0xff] %v862_v33  }
  0x67   :  { %v230_v53 = vmul.f32 %v1077_v1, %v698_v44  ;;  %v231_v60 = vmul.f32 %v1077_v1, %v699_v52 }
  0x69   :  { %v316_v61 = vadd.f32 %v1082_v4, %v230_v53  ;;  %v317_v6 = vadd.f32 %v1082_v4, %v231_v60 }
  0x6b   :  { %v398_v7 = vmax.f32 %v316_v61, 0.0  ;;  %v399_v15 = vmax.f32 %v317_v6, 0.0 }
  0x6d   :  { %v993_v45 = vld [vmem:[%s1491_s0 + $0xc8] sm:$0xff]   ;;  %v994_v54 = vld [vmem:[%s1491_s0 + $0xd0] sm:$0xff]   ;;  %v887_v24 = vpack.c.bf16 %v399_v15, %v398_v7 }
  0x6e   :  { %1028 = vst [vmem:[%s1494_s3 + $0xa0] sm:$0xff] %v867_v46   ;;  %v702_v58 = vunpack.c.l.bf16 %v993_v45  ;;  %v703_v62 = vunpack.c.h.bf16 %v993_v45  ;;  %v706_v5 = vunpack.c.l.bf16 %v994_v54  ;;  %v707_v9 = vunpack.c.h.bf16 %v994_v54 }
  0x70   :  { %v232_v3 = vmul.f32 %v1077_v1, %v702_v58  ;;  %v233_v8 = vmul.f32 %v1077_v1, %v703_v62  ;;  %v234_v13 = vmul.f32 %v1077_v1, %v706_v5  ;;  %v235_v17 = vmul.f32 %v1077_v1, %v707_v9 }
  0x72   :  { %v318_v12 = vadd.f32 %v1082_v4, %v232_v3  ;;  %v319_v16 = vadd.f32 %v1082_v4, %v233_v8  ;;  %v320_v20 = vadd.f32 %v1082_v4, %v234_v13  ;;  %v321_v26 = vadd.f32 %v1082_v4, %v235_v17 }
  0x74   :  { %v400_v19 = vmax.f32 %v318_v12, 0.0  ;;  %v401_v25 = vmax.f32 %v319_v16, 0.0  ;;  %v402_v28 = vmax.f32 %v320_v20, 0.0  ;;  %v403_v34 = vmax.f32 %v321_v26, 0.0 }
  0x75   :  { %v995_v63 = vld [vmem:[%s1491_s0 + $0xd8] sm:$0xff]  }
  0x76   :  { %1029 = vst [vmem:[%s1494_s3 + $0xa8] sm:$0xff] %v872_v55   ;;  %v710_v14 = vunpack.c.l.bf16 %v995_v63  ;;  %v711_v18 = vunpack.c.h.bf16 %v995_v63  ;;  %v892_v33 = vpack.c.bf16 %v401_v25, %v400_v19  ;;  %v897_v42 = vpack.c.bf16 %v403_v34, %v402_v28 }
  0x78   :  { %v236_v21 = vmul.f32 %v1077_v1, %v710_v14  ;;  %v237_v27 = vmul.f32 %v1077_v1, %v711_v18 }
  0x7a   :  { %v322_v29 = vadd.f32 %v1082_v4, %v236_v21  ;;  %v323_v35 = vadd.f32 %v1082_v4, %v237_v27 }
  0x7c   :  { %v404_v37 = vmax.f32 %v322_v29, 0.0  ;;  %v405_v43 = vmax.f32 %v323_v35, 0.0 }
  0x7d   :  { %v996_v10 = vld [vmem:[%s1491_s0 + $0xe0] sm:$0xff]  }
  0x7e   :  { %1030 = vst [vmem:[%s1494_s3 + $0xb0] sm:$0xff] %v877_v0   ;;  %v714_v22 = vunpack.c.l.bf16 %v996_v10  ;;  %v715_v30 = vunpack.c.h.bf16 %v996_v10  ;;  %v902_v51 = vpack.c.bf16 %v405_v43, %v404_v37 }
  0x7f   :  { %1031 = vst [vmem:[%s1494_s3 + $0xb8] sm:$0xff] %v882_v11  }
  0x80   :  { %v238_v31 = vmul.f32 %v1077_v1, %v714_v22  ;;  %v239_v38 = vmul.f32 %v1077_v1, %v715_v30 }
  0x82   :  { %v324_v39 = vadd.f32 %v1082_v4, %v238_v31  ;;  %v325_v46 = vadd.f32 %v1082_v4, %v239_v38 }
  0x84   :  { %v406_v47 = vmax.f32 %v324_v39, 0.0  ;;  %v407_v55 = vmax.f32 %v325_v46, 0.0 }
  0x86   :  { %v997_v23 = vld [vmem:[%s1491_s0 + $0xe8] sm:$0xff]   ;;  %v998_v32 = vld [vmem:[%s1491_s0 + $0xf0] sm:$0xff]   ;;  %v907_v0 = vpack.c.bf16 %v407_v55, %v406_v47 }
  0x87   :  { %1032 = vst [vmem:[%s1494_s3 + $0xc0] sm:$0xff] %v887_v24   ;;  %v718_v36 = vunpack.c.l.bf16 %v997_v23  ;;  %v719_v40 = vunpack.c.h.bf16 %v997_v23  ;;  %v722_v45 = vunpack.c.l.bf16 %v998_v32  ;;  %v723_v49 = vunpack.c.h.bf16 %v998_v32 }
  0x89   :  { %v240_v44 = vmul.f32 %v1077_v1, %v718_v36  ;;  %v241_v48 = vmul.f32 %v1077_v1, %v719_v40  ;;  %v242_v53 = vmul.f32 %v1077_v1, %v722_v45  ;;  %v243_v57 = vmul.f32 %v1077_v1, %v723_v49 }
  0x8b   :  { %v326_v52 = vadd.f32 %v1082_v4, %v240_v44  ;;  %v327_v56 = vadd.f32 %v1082_v4, %v241_v48  ;;  %v328_v60 = vadd.f32 %v1082_v4, %v242_v53  ;;  %v329_v3 = vadd.f32 %v1082_v4, %v243_v57 }
  0x8d   :  { %v408_v59 = vmax.f32 %v326_v52, 0.0  ;;  %v409_v2 = vmax.f32 %v327_v56, 0.0  ;;  %v410_v6 = vmax.f32 %v328_v60, 0.0  ;;  %v411_v12 = vmax.f32 %v329_v3, 0.0 }
  0x8e   :  { %v999_v41 = vld [vmem:[%s1491_s0 + $0xf8] sm:$0xff]  }
  0x8f   :  { %1033 = vst [vmem:[%s1494_s3 + $0xc8] sm:$0xff] %v892_v33   ;;  %v726_v54 = vunpack.c.l.bf16 %v999_v41  ;;  %v727_v58 = vunpack.c.h.bf16 %v999_v41  ;;  %v912_v11 = vpack.c.bf16 %v409_v2, %v408_v59  ;;  %v917_v20 = vpack.c.bf16 %v411_v12, %v410_v6 }
  0x91   :  { %v244_v61 = vmul.f32 %v1077_v1, %v726_v54  ;;  %v245_v5 = vmul.f32 %v1077_v1, %v727_v58 }
  0x93   :  { %v330_v7 = vadd.f32 %v1082_v4, %v244_v61  ;;  %v331_v13 = vadd.f32 %v1082_v4, %v245_v5 }
  0x95   :  { %v412_v15 = vmax.f32 %v330_v7, 0.0  ;;  %v413_v21 = vmax.f32 %v331_v13, 0.0 }
  0x96   :  { %v1000_v50 = vld [vmem:[%s1491_s0 + $0x100] sm:$0xff]  }
  0x97   :  { %1034 = vst [vmem:[%s1494_s3 + $0xd0] sm:$0xff] %v897_v42   ;;  %v730_v62 = vunpack.c.l.bf16 %v1000_v50  ;;  %v731_v8 = vunpack.c.h.bf16 %v1000_v50  ;;  %v922_v29 = vpack.c.bf16 %v413_v21, %v412_v15 }
  0x98   :  { %1035 = vst [vmem:[%s1494_s3 + $0xd8] sm:$0xff] %v902_v51  }
  0x99   :  { %v246_v9 = vmul.f32 %v1077_v1, %v730_v62  ;;  %v247_v16 = vmul.f32 %v1077_v1, %v731_v8 }
  0x9b   :  { %v332_v17 = vadd.f32 %v1082_v4, %v246_v9  ;;  %v333_v24 = vadd.f32 %v1082_v4, %v247_v16 }
  0x9d   :  { %v414_v25 = vmax.f32 %v332_v17, 0.0  ;;  %v415_v33 = vmax.f32 %v333_v24, 0.0 }
  0x9f   :  { %v1001_v63 = vld [vmem:[%s1491_s0 + $0x108] sm:$0xff]   ;;  %v1002_v10 = vld [vmem:[%s1491_s0 + $0x110] sm:$0xff]   ;;  %v927_v42 = vpack.c.bf16 %v415_v33, %v414_v25 }
  0xa0   :  { %1036 = vst [vmem:[%s1494_s3 + $0xe0] sm:$0xff] %v907_v0   ;;  %v734_v14 = vunpack.c.l.bf16 %v1001_v63  ;;  %v735_v18 = vunpack.c.h.bf16 %v1001_v63  ;;  %v738_v23 = vunpack.c.l.bf16 %v1002_v10  ;;  %v739_v27 = vunpack.c.h.bf16 %v1002_v10 }
  0xa2   :  { %v248_v22 = vmul.f32 %v1077_v1, %v734_v14  ;;  %v249_v26 = vmul.f32 %v1077_v1, %v735_v18  ;;  %v250_v31 = vmul.f32 %v1077_v1, %v738_v23  ;;  %v251_v35 = vmul.f32 %v1077_v1, %v739_v27 }
  0xa4   :  { %v334_v30 = vadd.f32 %v1082_v4, %v248_v22  ;;  %v335_v34 = vadd.f32 %v1082_v4, %v249_v26  ;;  %v336_v38 = vadd.f32 %v1082_v4, %v250_v31  ;;  %v337_v44 = vadd.f32 %v1082_v4, %v251_v35 }
  0xa6   :  { %v416_v37 = vmax.f32 %v334_v30, 0.0  ;;  %v417_v43 = vmax.f32 %v335_v34, 0.0  ;;  %v418_v46 = vmax.f32 %v336_v38, 0.0  ;;  %v419_v52 = vmax.f32 %v337_v44, 0.0 }
  0xa7   :  { %v1003_v19 = vld [vmem:[%s1491_s0 + $0x118] sm:$0xff]  }
  0xa8   :  { %1037 = vst [vmem:[%s1494_s3 + $0xe8] sm:$0xff] %v912_v11   ;;  %v742_v32 = vunpack.c.l.bf16 %v1003_v19  ;;  %v743_v36 = vunpack.c.h.bf16 %v1003_v19  ;;  %v932_v51 = vpack.c.bf16 %v417_v43, %v416_v37  ;;  %v937_v60 = vpack.c.bf16 %v419_v52, %v418_v46 }
  0xaa   :  { %v252_v39 = vmul.f32 %v1077_v1, %v742_v32  ;;  %v253_v45 = vmul.f32 %v1077_v1, %v743_v36 }
  0xac   :  { %v338_v47 = vadd.f32 %v1082_v4, %v252_v39  ;;  %v339_v53 = vadd.f32 %v1082_v4, %v253_v45 }
  0xae   :  { %v420_v55 = vmax.f32 %v338_v47, 0.0  ;;  %v421_v61 = vmax.f32 %v339_v53, 0.0 }
  0xaf   :  { %v1004_v28 = vld [vmem:[%s1491_s0 + $0x120] sm:$0xff]  }
  0xb0   :  { %1038 = vst [vmem:[%s1494_s3 + $0xf0] sm:$0xff] %v917_v20   ;;  %v746_v40 = vunpack.c.l.bf16 %v1004_v28  ;;  %v747_v48 = vunpack.c.h.bf16 %v1004_v28  ;;  %v942_v7 = vpack.c.bf16 %v421_v61, %v420_v55 }
  0xb1   :  { %1039 = vst [vmem:[%s1494_s3 + $0xf8] sm:$0xff] %v922_v29  }
  0xb2   :  { %v254_v49 = vmul.f32 %v1077_v1, %v746_v40  ;;  %v255_v56 = vmul.f32 %v1077_v1, %v747_v48 }
  0xb4   :  { %v340_v57 = vadd.f32 %v1082_v4, %v254_v49  ;;  %v341_v0 = vadd.f32 %v1082_v4, %v255_v56 }
  0xb6   :  { %v422_v2 = vmax.f32 %v340_v57, 0.0  ;;  %v423_v11 = vmax.f32 %v341_v0, 0.0 }
  0xb8   :  { %v1005_v41 = vld [vmem:[%s1491_s0 + $0x128] sm:$0xff]   ;;  %v1006_v50 = vld [vmem:[%s1491_s0 + $0x130] sm:$0xff]   ;;  %v947_v19 = vpack.c.bf16 %v423_v11, %v422_v2 }
  0xb9   :  { %1040 = vst [vmem:[%s1494_s3 + $0x100] sm:$0xff] %v927_v42   ;;  %v750_v54 = vunpack.c.l.bf16 %v1005_v41  ;;  %v751_v58 = vunpack.c.h.bf16 %v1005_v41  ;;  %v754_v63 = vunpack.c.l.bf16 %v1006_v50  ;;  %v755_v5 = vunpack.c.h.bf16 %v1006_v50 }
  0xbb   :  { %v256_v62 = vmul.f32 %v1077_v1, %v750_v54  ;;  %v257_v3 = vmul.f32 %v1077_v1, %v751_v58  ;;  %v258_v9 = vmul.f32 %v1077_v1, %v754_v63  ;;  %v259_v13 = vmul.f32 %v1077_v1, %v755_v5 }
  0xbd   :  { %v342_v8 = vadd.f32 %v1082_v4, %v256_v62  ;;  %v343_v12 = vadd.f32 %v1082_v4, %v257_v3  ;;  %v344_v16 = vadd.f32 %v1082_v4, %v258_v9  ;;  %v345_v21 = vadd.f32 %v1082_v4, %v259_v13 }
  0xbf   :  { %v424_v15 = vmax.f32 %v342_v8, 0.0  ;;  %v425_v20 = vmax.f32 %v343_v12, 0.0  ;;  %v426_v23 = vmax.f32 %v344_v16, 0.0  ;;  %v427_v28 = vmax.f32 %v345_v21, 0.0 }
  0xc0   :  { %v1007_v59 = vld [vmem:[%s1491_s0 + $0x138] sm:$0xff]  }
  0xc1   :  { %1041 = vst [vmem:[%s1494_s3 + $0x108] sm:$0xff] %v932_v51   ;;  %v758_v10 = vunpack.c.l.bf16 %v1007_v59  ;;  %v759_v14 = vunpack.c.h.bf16 %v1007_v59  ;;  %v952_v27 = vpack.c.bf16 %v425_v20, %v424_v15  ;;  %v957_v33 = vpack.c.bf16 %v427_v28, %v426_v23 }
  0xc3   :  { %v260_v17 = vmul.f32 %v1077_v1, %v758_v10  ;;  %v261_v22 = vmul.f32 %v1077_v1, %v759_v14 }
  0xc5   :  { %v346_v24 = vadd.f32 %v1082_v4, %v260_v17  ;;  %v347_v29 = vadd.f32 %v1082_v4, %v261_v22 }
  0xc7   :  { %v428_v30 = vmax.f32 %v346_v24, 0.0  ;;  %v429_v34 = vmax.f32 %v347_v29, 0.0 }
  0xc8   :  { %v1008_v6 = vld [vmem:[%s1491_s0 + $0x140] sm:$0xff]  }
  0xc9   :  { %1042 = vst [vmem:[%s1494_s3 + $0x110] sm:$0xff] %v937_v60   ;;  %v762_v18 = vunpack.c.l.bf16 %v1008_v6  ;;  %v763_v25 = vunpack.c.h.bf16 %v1008_v6  ;;  %v962_v37 = vpack.c.bf16 %v429_v34, %v428_v30 }
  0xca   :  { %1043 = vst [vmem:[%s1494_s3 + $0x118] sm:$0xff] %v942_v7  }
  0xcb   :  { %v262_v26 = vmul.f32 %v1077_v1, %v762_v18  ;;  %1044 = vst [vmem:[%s1494_s3 + $0x120] sm:$0xff] %v947_v19   ;;  %v263_v31 = vmul.f32 %v1077_v1, %v763_v25 }
  0xcc   :  { %1045 = vst [vmem:[%s1494_s3 + $0x128] sm:$0xff] %v952_v27  }
  0xcd   :  { %v348_v32 = vadd.f32 %v1082_v4, %v262_v26  ;;  %v349_v35 = vadd.f32 %v1082_v4, %v263_v31  ;;  %1046 = vst [vmem:[%s1494_s3 + $0x130] sm:$0xff] %v957_v33  }
  0xce   :  { %1047 = vst [vmem:[%s1494_s3 + $0x138] sm:$0xff] %v962_v37  }
  0xcf   :  { %v430_v36 = vmax.f32 %v348_v32, 0.0  ;;  %v431_v38 = vmax.f32 %v349_v35, 0.0 }
  0xd1   :  { %v967_v1 = vpack.c.bf16 %v431_v38, %v430_v36 }
  0xd3   :  { %1048 = vst [vmem:[%s1494_s3 + $0x140] sm:$0xff] %v967_v1  }

// kernel: up_forward.7
= control target key start
LH: loop header
LB: loop body
LE: loop exit
PB: predicated region body
PF: predicated region fallthrough
CT: control target
= control target key end

     0   :  { %s1287_s0 = inlined_call_operand.vmem [shape: bf16[656,128], index: 0, kind: input, shape index: {}]   ;;  %s1288_s1 = inlined_call_operand.vmem [shape: f32[1,128], index: 1, kind: input, shape index: {}]   ;;  %s1289_s2 = inlined_call_operand.vmem [shape: f32[1,128], index: 2, kind: input, shape index: {}]   ;;  %s1290_s3 = inlined_call_operand.vmem [shape: f32[656,128], index: 3, kind: output, shape index: {}]  }
   0x1   :  { %v519_v0 = vld [vmem:[%s1287_s0] sm:$0xff]   ;;  %v682_v5 = vld [vmem:[%s1287_s0 + $0x8] sm:$0xff]   ;;  %v683_v8 = vld [vmem:[%s1287_s0 + $0x10] sm:$0xff]  }
   0x2   :  { %v750_v1 = vld [vmem:[%s1288_s1] ss:$0 sm:$0xff]  ;;  %v520_v2 = vunpack.c.l.bf16 %v519_v0  ;;  %v521_v4 = vunpack.c.h.bf16 %v519_v0  ;;  %v524_v6 = vunpack.c.l.bf16 %v682_v5  ;;  %v525_v7 = vunpack.c.h.bf16 %v682_v5  ;;  %v684_v9 = vld [vmem:[%s1287_s0 + $0x18] sm:$0xff]   ;;  %v686_v31 = vld [vmem:[%s1287_s0 + $0x28] sm:$0xff]  }
   0x3   :  { %v755_v3 = vld [vmem:[%s1289_s2] ss:$0 sm:$0xff]  ;;  %v528_v12 = vunpack.c.l.bf16 %v683_v8  ;;  %v529_v13 = vunpack.c.h.bf16 %v683_v8  ;;  %v532_v16 = vunpack.c.l.bf16 %v684_v9  ;;  %v533_v17 = vunpack.c.h.bf16 %v684_v9  ;;  %v687_v36 = vld [vmem:[%s1287_s0 + $0x30] sm:$0xff]   ;;  %v688_v41 = vld [vmem:[%s1287_s0 + $0x38] sm:$0xff]  }
   0x4   :  { %v182_v10 = vmul.f32 %v750_v1, %v520_v2  ;;  %v183_v11 = vmul.f32 %v750_v1, %v521_v4  ;;  %v184_v14 = vmul.f32 %v750_v1, %v524_v6  ;;  %v185_v15 = vmul.f32 %v750_v1, %v525_v7  ;;  %v685_v26 = vld [vmem:[%s1287_s0 + $0x20] sm:$0xff]   ;;  %v690_v5 = vld [vmem:[%s1287_s0 + $0x48] sm:$0xff]  }
   0x5   :  { %v186_v20 = vmul.f32 %v750_v1, %v528_v12  ;;  %v187_v21 = vmul.f32 %v750_v1, %v529_v13  ;;  %v188_v24 = vmul.f32 %v750_v1, %v532_v16  ;;  %v189_v25 = vmul.f32 %v750_v1, %v533_v17  ;;  %v689_v62 = vld [vmem:[%s1287_s0 + $0x40] sm:$0xff]  }
   0x6   :  { %v268_v18 = vadd.f32 %v755_v3, %v182_v10  ;;  %v269_v19 = vadd.f32 %v755_v3, %v183_v11  ;;  %v270_v22 = vadd.f32 %v755_v3, %v184_v14  ;;  %v271_v23 = vadd.f32 %v755_v3, %v185_v15  ;;  %v691_v10 = vld [vmem:[%s1287_s0 + $0x50] sm:$0xff]   ;;  %v692_v15 = vld [vmem:[%s1287_s0 + $0x58] sm:$0xff]  }
   0x7   :  { %v272_v29 = vadd.f32 %v755_v3, %v186_v20  ;;  %v273_v30 = vadd.f32 %v755_v3, %v187_v21  ;;  %v274_v34 = vadd.f32 %v755_v3, %v188_v24  ;;  %v275_v35 = vadd.f32 %v755_v3, %v189_v25 }
   0x8   :  { %v350_v27 = vmax.f32 %v268_v18, 0.0  ;;  %v351_v28 = vmax.f32 %v269_v19, 0.0  ;;  %v352_v32 = vmax.f32 %v270_v22, 0.0  ;;  %v353_v33 = vmax.f32 %v271_v23, 0.0 }
   0x9   :  { %v354_v37 = vmax.f32 %v272_v29, 0.0  ;;  %v355_v38 = vmax.f32 %v273_v30, 0.0  ;;  %v536_v39 = vunpack.c.l.bf16 %v685_v26  ;;  %v537_v40 = vunpack.c.h.bf16 %v685_v26 }
   0xa   :  { %432 = vst [vmem:[%s1290_s3] sm:$0xff] %v350_v27  ;;  %v356_v42 = vmax.f32 %v274_v34, 0.0  ;;  %v357_v43 = vmax.f32 %v275_v35, 0.0  ;;  %v540_v44 = vunpack.c.l.bf16 %v686_v31  ;;  %v541_v45 = vunpack.c.h.bf16 %v686_v31 }
   0xb   :  { %433 = vst [vmem:[%s1290_s3 + $0x8] sm:$0xff] %v351_v28  ;;  %v190_v46 = vmul.f32 %v750_v1, %v536_v39  ;;  %v191_v47 = vmul.f32 %v750_v1, %v537_v40  ;;  %v544_v48 = vunpack.c.l.bf16 %v687_v36  ;;  %v545_v49 = vunpack.c.h.bf16 %v687_v36  ;;  %v693_v36 = vld [vmem:[%s1287_s0 + $0x60] sm:$0xff]  }
   0xc   :  { %434 = vst [vmem:[%s1290_s3 + $0x10] sm:$0xff] %v352_v32  ;;  %v192_v50 = vmul.f32 %v750_v1, %v540_v44  ;;  %v193_v51 = vmul.f32 %v750_v1, %v541_v45  ;;  %v548_v52 = vunpack.c.l.bf16 %v688_v41  ;;  %v549_v53 = vunpack.c.h.bf16 %v688_v41  ;;  %v694_v41 = vld [vmem:[%s1287_s0 + $0x68] sm:$0xff]  }
   0xd   :  { %435 = vst [vmem:[%s1290_s3 + $0x18] sm:$0xff] %v353_v33  ;;  %v276_v54 = vadd.f32 %v755_v3, %v190_v46  ;;  %v277_v55 = vadd.f32 %v755_v3, %v191_v47  ;;  %v194_v56 = vmul.f32 %v750_v1, %v544_v48  ;;  %v195_v57 = vmul.f32 %v750_v1, %v545_v49  ;;  %v695_v46 = vld [vmem:[%s1287_s0 + $0x70] sm:$0xff]  }
   0xe   :  { %436 = vst [vmem:[%s1290_s3 + $0x20] sm:$0xff] %v354_v37  ;;  %v278_v58 = vadd.f32 %v755_v3, %v192_v50  ;;  %v279_v59 = vadd.f32 %v755_v3, %v193_v51  ;;  %v196_v60 = vmul.f32 %v750_v1, %v548_v52  ;;  %v197_v61 = vmul.f32 %v750_v1, %v549_v53  ;;  %v696_v51 = vld [vmem:[%s1287_s0 + $0x78] sm:$0xff]  }
   0xf   :  { %437 = vst [vmem:[%s1290_s3 + $0x28] sm:$0xff] %v355_v38  ;;  %v358_v63 = vmax.f32 %v276_v54, 0.0  ;;  %v359_v0 = vmax.f32 %v277_v55, 0.0  ;;  %v280_v2 = vadd.f32 %v755_v3, %v194_v56  ;;  %v281_v4 = vadd.f32 %v755_v3, %v195_v57 }
  0x10   :  { %438 = vst [vmem:[%s1290_s3 + $0x30] sm:$0xff] %v356_v42  ;;  %v360_v6 = vmax.f32 %v278_v58, 0.0  ;;  %v361_v7 = vmax.f32 %v279_v59, 0.0  ;;  %v282_v8 = vadd.f32 %v755_v3, %v196_v60  ;;  %v283_v9 = vadd.f32 %v755_v3, %v197_v61 }
  0x11   :  { %439 = vst [vmem:[%s1290_s3 + $0x38] sm:$0xff] %v357_v43  ;;  %v362_v11 = vmax.f32 %v280_v2, 0.0  ;;  %v363_v12 = vmax.f32 %v281_v4, 0.0  ;;  %v552_v13 = vunpack.c.l.bf16 %v689_v62  ;;  %v553_v14 = vunpack.c.h.bf16 %v689_v62 }
  0x12   :  { %440 = vst [vmem:[%s1290_s3 + $0x40] sm:$0xff] %v358_v63  ;;  %v364_v16 = vmax.f32 %v282_v8, 0.0  ;;  %v365_v17 = vmax.f32 %v283_v9, 0.0  ;;  %v556_v18 = vunpack.c.l.bf16 %v690_v5  ;;  %v557_v19 = vunpack.c.h.bf16 %v690_v5 }
  0x13   :  { %441 = vst [vmem:[%s1290_s3 + $0x48] sm:$0xff] %v359_v0  ;;  %v198_v20 = vmul.f32 %v750_v1, %v552_v13  ;;  %v199_v21 = vmul.f32 %v750_v1, %v553_v14  ;;  %v560_v22 = vunpack.c.l.bf16 %v691_v10  ;;  %v561_v23 = vunpack.c.h.bf16 %v691_v10  ;;  %v697_v10 = vld [vmem:[%s1287_s0 + $0x80] sm:$0xff]  }
  0x14   :  { %442 = vst [vmem:[%s1290_s3 + $0x50] sm:$0xff] %v360_v6  ;;  %v200_v24 = vmul.f32 %v750_v1, %v556_v18  ;;  %v201_v25 = vmul.f32 %v750_v1, %v557_v19  ;;  %v564_v26 = vunpack.c.l.bf16 %v692_v15  ;;  %v565_v27 = vunpack.c.h.bf16 %v692_v15  ;;  %v698_v15 = vld [vmem:[%s1287_s0 + $0x88] sm:$0xff]  }
  0x15   :  { %443 = vst [vmem:[%s1290_s3 + $0x58] sm:$0xff] %v361_v7  ;;  %v284_v28 = vadd.f32 %v755_v3, %v198_v20  ;;  %v285_v29 = vadd.f32 %v755_v3, %v199_v21  ;;  %v202_v30 = vmul.f32 %v750_v1, %v560_v22  ;;  %v203_v31 = vmul.f32 %v750_v1, %v561_v23  ;;  %v699_v20 = vld [vmem:[%s1287_s0 + $0x90] sm:$0xff]  }
  0x16   :  { %444 = vst [vmem:[%s1290_s3 + $0x60] sm:$0xff] %v362_v11  ;;  %v286_v32 = vadd.f32 %v755_v3, %v200_v24  ;;  %v287_v33 = vadd.f32 %v755_v3, %v201_v25  ;;  %v204_v34 = vmul.f32 %v750_v1, %v564_v26  ;;  %v205_v35 = vmul.f32 %v750_v1, %v565_v27  ;;  %v700_v25 = vld [vmem:[%s1287_s0 + $0x98] sm:$0xff]  }
  0x17   :  { %445 = vst [vmem:[%s1290_s3 + $0x68] sm:$0xff] %v363_v12  ;;  %v366_v37 = vmax.f32 %v284_v28, 0.0  ;;  %v367_v38 = vmax.f32 %v285_v29, 0.0  ;;  %v288_v39 = vadd.f32 %v755_v3, %v202_v30  ;;  %v289_v40 = vadd.f32 %v755_v3, %v203_v31 }
  0x18   :  { %446 = vst [vmem:[%s1290_s3 + $0x70] sm:$0xff] %v364_v16  ;;  %v368_v42 = vmax.f32 %v286_v32, 0.0  ;;  %v369_v43 = vmax.f32 %v287_v33, 0.0  ;;  %v290_v44 = vadd.f32 %v755_v3, %v204_v34  ;;  %v291_v45 = vadd.f32 %v755_v3, %v205_v35 }
  0x19   :  { %447 = vst [vmem:[%s1290_s3 + $0x78] sm:$0xff] %v365_v17  ;;  %v370_v47 = vmax.f32 %v288_v39, 0.0  ;;  %v371_v48 = vmax.f32 %v289_v40, 0.0  ;;  %v568_v49 = vunpack.c.l.bf16 %v693_v36  ;;  %v569_v50 = vunpack.c.h.bf16 %v693_v36 }
  0x1a   :  { %448 = vst [vmem:[%s1290_s3 + $0x80] sm:$0xff] %v366_v37  ;;  %v372_v52 = vmax.f32 %v290_v44, 0.0  ;;  %v373_v53 = vmax.f32 %v291_v45, 0.0  ;;  %v572_v54 = vunpack.c.l.bf16 %v694_v41  ;;  %v573_v55 = vunpack.c.h.bf16 %v694_v41 }
  0x1b   :  { %449 = vst [vmem:[%s1290_s3 + $0x88] sm:$0xff] %v367_v38  ;;  %v206_v56 = vmul.f32 %v750_v1, %v568_v49  ;;  %v207_v57 = vmul.f32 %v750_v1, %v569_v50  ;;  %v576_v58 = vunpack.c.l.bf16 %v695_v46  ;;  %v577_v59 = vunpack.c.h.bf16 %v695_v46  ;;  %v701_v46 = vld [vmem:[%s1287_s0 + $0xa0] sm:$0xff]  }
  0x1c   :  { %450 = vst [vmem:[%s1290_s3 + $0x90] sm:$0xff] %v368_v42  ;;  %v208_v60 = vmul.f32 %v750_v1, %v572_v54  ;;  %v209_v61 = vmul.f32 %v750_v1, %v573_v55  ;;  %v580_v62 = vunpack.c.l.bf16 %v696_v51  ;;  %v581_v63 = vunpack.c.h.bf16 %v696_v51  ;;  %v702_v51 = vld [vmem:[%s1287_s0 + $0xa8] sm:$0xff]  }
  0x1d   :  { %451 = vst [vmem:[%s1290_s3 + $0x98] sm:$0xff] %v369_v43  ;;  %v292_v0 = vadd.f32 %v755_v3, %v206_v56  ;;  %v293_v2 = vadd.f32 %v755_v3, %v207_v57  ;;  %v210_v4 = vmul.f32 %v750_v1, %v576_v58  ;;  %v211_v5 = vmul.f32 %v750_v1, %v577_v59  ;;  %v703_v56 = vld [vmem:[%s1287_s0 + $0xb0] sm:$0xff]  }
  0x1e   :  { %452 = vst [vmem:[%s1290_s3 + $0xa0] sm:$0xff] %v370_v47  ;;  %v294_v6 = vadd.f32 %v755_v3, %v208_v60  ;;  %v295_v7 = vadd.f32 %v755_v3, %v209_v61  ;;  %v212_v8 = vmul.f32 %v750_v1, %v580_v62  ;;  %v213_v9 = vmul.f32 %v750_v1, %v581_v63  ;;  %v704_v61 = vld [vmem:[%s1287_s0 + $0xb8] sm:$0xff]  }
  0x1f   :  { %453 = vst [vmem:[%s1290_s3 + $0xa8] sm:$0xff] %v371_v48  ;;  %v374_v11 = vmax.f32 %v292_v0, 0.0  ;;  %v375_v12 = vmax.f32 %v293_v2, 0.0  ;;  %v296_v13 = vadd.f32 %v755_v3, %v210_v4  ;;  %v297_v14 = vadd.f32 %v755_v3, %v211_v5 }
  0x20   :  { %454 = vst [vmem:[%s1290_s3 + $0xb0] sm:$0xff] %v372_v52  ;;  %v376_v16 = vmax.f32 %v294_v6, 0.0  ;;  %v377_v17 = vmax.f32 %v295_v7, 0.0  ;;  %v298_v18 = vadd.f32 %v755_v3, %v212_v8  ;;  %v299_v19 = vadd.f32 %v755_v3, %v213_v9 }
  0x21   :  { %455 = vst [vmem:[%s1290_s3 + $0xb8] sm:$0xff] %v373_v53  ;;  %v378_v21 = vmax.f32 %v296_v13, 0.0  ;;  %v379_v22 = vmax.f32 %v297_v14, 0.0  ;;  %v584_v23 = vunpack.c.l.bf16 %v697_v10  ;;  %v585_v24 = vunpack.c.h.bf16 %v697_v10 }
  0x22   :  { %456 = vst [vmem:[%s1290_s3 + $0xc0] sm:$0xff] %v374_v11  ;;  %v380_v26 = vmax.f32 %v298_v18, 0.0  ;;  %v381_v27 = vmax.f32 %v299_v19, 0.0  ;;  %v588_v28 = vunpack.c.l.bf16 %v698_v15  ;;  %v589_v29 = vunpack.c.h.bf16 %v698_v15 }
  0x23   :  { %457 = vst [vmem:[%s1290_s3 + $0xc8] sm:$0xff] %v375_v12  ;;  %v214_v30 = vmul.f32 %v750_v1, %v584_v23  ;;  %v215_v31 = vmul.f32 %v750_v1, %v585_v24  ;;  %v592_v32 = vunpack.c.l.bf16 %v699_v20  ;;  %v593_v33 = vunpack.c.h.bf16 %v699_v20  ;;  %v705_v20 = vld [vmem:[%s1287_s0 + $0xc0] sm:$0xff]  }
  0x24   :  { %458 = vst [vmem:[%s1290_s3 + $0xd0] sm:$0xff] %v376_v16  ;;  %v216_v34 = vmul.f32 %v750_v1, %v588_v28  ;;  %v217_v35 = vmul.f32 %v750_v1, %v589_v29  ;;  %v596_v36 = vunpack.c.l.bf16 %v700_v25  ;;  %v597_v37 = vunpack.c.h.bf16 %v700_v25  ;;  %v706_v25 = vld [vmem:[%s1287_s0 + $0xc8] sm:$0xff]  }
  0x25   :  { %459 = vst [vmem:[%s1290_s3 + $0xd8] sm:$0xff] %v377_v17  ;;  %v300_v38 = vadd.f32 %v755_v3, %v214_v30  ;;  %v301_v39 = vadd.f32 %v755_v3, %v215_v31  ;;  %v218_v40 = vmul.f32 %v750_v1, %v592_v32  ;;  %v219_v41 = vmul.f32 %v750_v1, %v593_v33  ;;  %v707_v30 = vld [vmem:[%s1287_s0 + $0xd0] sm:$0xff]  }
  0x26   :  { %460 = vst [vmem:[%s1290_s3 + $0xe0] sm:$0xff] %v378_v21  ;;  %v302_v42 = vadd.f32 %v755_v3, %v216_v34  ;;  %v303_v43 = vadd.f32 %v755_v3, %v217_v35  ;;  %v220_v44 = vmul.f32 %v750_v1, %v596_v36  ;;  %v221_v45 = vmul.f32 %v750_v1, %v597_v37  ;;  %v708_v35 = vld [vmem:[%s1287_s0 + $0xd8] sm:$0xff]  }
  0x27   :  { %461 = vst [vmem:[%s1290_s3 + $0xe8] sm:$0xff] %v379_v22  ;;  %v382_v47 = vmax.f32 %v300_v38, 0.0  ;;  %v383_v48 = vmax.f32 %v301_v39, 0.0  ;;  %v304_v49 = vadd.f32 %v755_v3, %v218_v40  ;;  %v305_v50 = vadd.f32 %v755_v3, %v219_v41 }
  0x28   :  { %462 = vst [vmem:[%s1290_s3 + $0xf0] sm:$0xff] %v380_v26  ;;  %v384_v52 = vmax.f32 %v302_v42, 0.0  ;;  %v385_v53 = vmax.f32 %v303_v43, 0.0  ;;  %v306_v54 = vadd.f32 %v755_v3, %v220_v44  ;;  %v307_v55 = vadd.f32 %v755_v3, %v221_v45 }
  0x29   :  { %463 = vst [vmem:[%s1290_s3 + $0xf8] sm:$0xff] %v381_v27  ;;  %v386_v57 = vmax.f32 %v304_v49, 0.0  ;;  %v387_v58 = vmax.f32 %v305_v50, 0.0  ;;  %v600_v59 = vunpack.c.l.bf16 %v701_v46  ;;  %v601_v60 = vunpack.c.h.bf16 %v701_v46 }
  0x2a   :  { %464 = vst [vmem:[%s1290_s3 + $0x100] sm:$0xff] %v382_v47  ;;  %v388_v62 = vmax.f32 %v306_v54, 0.0  ;;  %v389_v63 = vmax.f32 %v307_v55, 0.0  ;;  %v604_v0 = vunpack.c.l.bf16 %v702_v51  ;;  %v605_v2 = vunpack.c.h.bf16 %v702_v51 }
  0x2b   :  { %465 = vst [vmem:[%s1290_s3 + $0x108] sm:$0xff] %v383_v48  ;;  %v222_v4 = vmul.f32 %v750_v1, %v600_v59  ;;  %v223_v5 = vmul.f32 %v750_v1, %v601_v60  ;;  %v608_v6 = vunpack.c.l.bf16 %v703_v56  ;;  %v609_v7 = vunpack.c.h.bf16 %v703_v56  ;;  %v709_v56 = vld [vmem:[%s1287_s0 + $0xe0] sm:$0xff]  }
  0x2c   :  { %466 = vst [vmem:[%s1290_s3 + $0x110] sm:$0xff] %v384_v52  ;;  %v224_v8 = vmul.f32 %v750_v1, %v604_v0  ;;  %v225_v9 = vmul.f32 %v750_v1, %v605_v2  ;;  %v612_v10 = vunpack.c.l.bf16 %v704_v61  ;;  %v613_v11 = vunpack.c.h.bf16 %v704_v61  ;;  %v710_v61 = vld [vmem:[%s1287_s0 + $0xe8] sm:$0xff]  }
  0x2d   :  { %467 = vst [vmem:[%s1290_s3 + $0x118] sm:$0xff] %v385_v53  ;;  %v308_v12 = vadd.f32 %v755_v3, %v222_v4  ;;  %v309_v13 = vadd.f32 %v755_v3, %v223_v5  ;;  %v226_v14 = vmul.f32 %v750_v1, %v608_v6  ;;  %v227_v15 = vmul.f32 %v750_v1, %v609_v7  ;;  %v711_v4 = vld [vmem:[%s1287_s0 + $0xf0] sm:$0xff]  }
  0x2e   :  { %468 = vst [vmem:[%s1290_s3 + $0x120] sm:$0xff] %v386_v57  ;;  %v310_v16 = vadd.f32 %v755_v3, %v224_v8  ;;  %v311_v17 = vadd.f32 %v755_v3, %v225_v9  ;;  %v228_v18 = vmul.f32 %v750_v1, %v612_v10  ;;  %v229_v19 = vmul.f32 %v750_v1, %v613_v11  ;;  %v712_v9 = vld [vmem:[%s1287_s0 + $0xf8] sm:$0xff]  }
  0x2f   :  { %469 = vst [vmem:[%s1290_s3 + $0x128] sm:$0xff] %v387_v58  ;;  %v390_v21 = vmax.f32 %v308_v12, 0.0  ;;  %v391_v22 = vmax.f32 %v309_v13, 0.0  ;;  %v312_v23 = vadd.f32 %v755_v3, %v226_v14  ;;  %v313_v24 = vadd.f32 %v755_v3, %v227_v15 }
  0x30   :  { %470 = vst [vmem:[%s1290_s3 + $0x130] sm:$0xff] %v388_v62  ;;  %v392_v26 = vmax.f32 %v310_v16, 0.0  ;;  %v393_v27 = vmax.f32 %v311_v17, 0.0  ;;  %v314_v28 = vadd.f32 %v755_v3, %v228_v18  ;;  %v315_v29 = vadd.f32 %v755_v3, %v229_v19 }
  0x31   :  { %471 = vst [vmem:[%s1290_s3 + $0x138] sm:$0xff] %v389_v63  ;;  %v394_v31 = vmax.f32 %v312_v23, 0.0  ;;  %v395_v32 = vmax.f32 %v313_v24, 0.0  ;;  %v616_v33 = vunpack.c.l.bf16 %v705_v20  ;;  %v617_v34 = vunpack.c.h.bf16 %v705_v20 }
  0x32   :  { %472 = vst [vmem:[%s1290_s3 + $0x140] sm:$0xff] %v390_v21  ;;  %v396_v36 = vmax.f32 %v314_v28, 0.0  ;;  %v397_v37 = vmax.f32 %v315_v29, 0.0  ;;  %v620_v38 = vunpack.c.l.bf16 %v706_v25  ;;  %v621_v39 = vunpack.c.h.bf16 %v706_v25 }
  0x33   :  { %473 = vst [vmem:[%s1290_s3 + $0x148] sm:$0xff] %v391_v22  ;;  %v230_v40 = vmul.f32 %v750_v1, %v616_v33  ;;  %v231_v41 = vmul.f32 %v750_v1, %v617_v34  ;;  %v624_v42 = vunpack.c.l.bf16 %v707_v30  ;;  %v625_v43 = vunpack.c.h.bf16 %v707_v30  ;;  %v713_v30 = vld [vmem:[%s1287_s0 + $0x100] sm:$0xff]  }
  0x34   :  { %474 = vst [vmem:[%s1290_s3 + $0x150] sm:$0xff] %v392_v26  ;;  %v232_v44 = vmul.f32 %v750_v1, %v620_v38  ;;  %v233_v45 = vmul.f32 %v750_v1, %v621_v39  ;;  %v628_v46 = vunpack.c.l.bf16 %v708_v35  ;;  %v629_v47 = vunpack.c.h.bf16 %v708_v35  ;;  %v714_v35 = vld [vmem:[%s1287_s0 + $0x108] sm:$0xff]  }
  0x35   :  { %475 = vst [vmem:[%s1290_s3 + $0x158] sm:$0xff] %v393_v27  ;;  %v316_v48 = vadd.f32 %v755_v3, %v230_v40  ;;  %v317_v49 = vadd.f32 %v755_v3, %v231_v41  ;;  %v234_v50 = vmul.f32 %v750_v1, %v624_v42  ;;  %v235_v51 = vmul.f32 %v750_v1, %v625_v43  ;;  %v715_v40 = vld [vmem:[%s1287_s0 + $0x110] sm:$0xff]  }
  0x36   :  { %476 = vst [vmem:[%s1290_s3 + $0x160] sm:$0xff] %v394_v31  ;;  %v318_v52 = vadd.f32 %v755_v3, %v232_v44  ;;  %v319_v53 = vadd.f32 %v755_v3, %v233_v45  ;;  %v236_v54 = vmul.f32 %v750_v1, %v628_v46  ;;  %v237_v55 = vmul.f32 %v750_v1, %v629_v47  ;;  %v716_v45 = vld [vmem:[%s1287_s0 + $0x118] sm:$0xff]  }
  0x37   :  { %477 = vst [vmem:[%s1290_s3 + $0x168] sm:$0xff] %v395_v32  ;;  %v398_v57 = vmax.f32 %v316_v48, 0.0  ;;  %v399_v58 = vmax.f32 %v317_v49, 0.0  ;;  %v320_v59 = vadd.f32 %v755_v3, %v234_v50  ;;  %v321_v60 = vadd.f32 %v755_v3, %v235_v51 }
  0x38   :  { %478 = vst [vmem:[%s1290_s3 + $0x170] sm:$0xff] %v396_v36  ;;  %v400_v62 = vmax.f32 %v318_v52, 0.0  ;;  %v401_v63 = vmax.f32 %v319_v53, 0.0  ;;  %v322_v0 = vadd.f32 %v755_v3, %v236_v54  ;;  %v323_v2 = vadd.f32 %v755_v3, %v237_v55 }
  0x39   :  { %479 = vst [vmem:[%s1290_s3 + $0x178] sm:$0xff] %v397_v37  ;;  %v402_v5 = vmax.f32 %v320_v59, 0.0  ;;  %v403_v6 = vmax.f32 %v321_v60, 0.0  ;;  %v632_v7 = vunpack.c.l.bf16 %v709_v56  ;;  %v633_v8 = vunpack.c.h.bf16 %v709_v56 }
  0x3a   :  { %480 = vst [vmem:[%s1290_s3 + $0x180] sm:$0xff] %v398_v57  ;;  %v404_v10 = vmax.f32 %v322_v0, 0.0  ;;  %v405_v11 = vmax.f32 %v323_v2, 0.0  ;;  %v636_v12 = vunpack.c.l.bf16 %v710_v61  ;;  %v637_v13 = vunpack.c.h.bf16 %v710_v61 }
  0x3b   :  { %481 = vst [vmem:[%s1290_s3 + $0x188] sm:$0xff] %v399_v58  ;;  %v238_v14 = vmul.f32 %v750_v1, %v632_v7  ;;  %v239_v15 = vmul.f32 %v750_v1, %v633_v8  ;;  %v640_v16 = vunpack.c.l.bf16 %v711_v4  ;;  %v641_v17 = vunpack.c.h.bf16 %v711_v4  ;;  %v717_v4 = vld [vmem:[%s1287_s0 + $0x120] sm:$0xff]  }
  0x3c   :  { %482 = vst [vmem:[%s1290_s3 + $0x190] sm:$0xff] %v400_v62  ;;  %v240_v18 = vmul.f32 %v750_v1, %v636_v12  ;;  %v241_v19 = vmul.f32 %v750_v1, %v637_v13  ;;  %v644_v20 = vunpack.c.l.bf16 %v712_v9  ;;  %v645_v21 = vunpack.c.h.bf16 %v712_v9  ;;  %v718_v9 = vld [vmem:[%s1287_s0 + $0x128] sm:$0xff]  }
  0x3d   :  { %483 = vst [vmem:[%s1290_s3 + $0x198] sm:$0xff] %v401_v63  ;;  %v324_v22 = vadd.f32 %v755_v3, %v238_v14  ;;  %v325_v23 = vadd.f32 %v755_v3, %v239_v15  ;;  %v242_v24 = vmul.f32 %v750_v1, %v640_v16  ;;  %v243_v25 = vmul.f32 %v750_v1, %v641_v17  ;;  %v719_v14 = vld [vmem:[%s1287_s0 + $0x130] sm:$0xff]  }
  0x3e   :  { %484 = vst [vmem:[%s1290_s3 + $0x1a0] sm:$0xff] %v402_v5  ;;  %v326_v26 = vadd.f32 %v755_v3, %v240_v18  ;;  %v327_v27 = vadd.f32 %v755_v3, %v241_v19  ;;  %v244_v28 = vmul.f32 %v750_v1, %v644_v20  ;;  %v245_v29 = vmul.f32 %v750_v1, %v645_v21  ;;  %v720_v19 = vld [vmem:[%s1287_s0 + $0x138] sm:$0xff]  }
  0x3f   :  { %485 = vst [vmem:[%s1290_s3 + $0x1a8] sm:$0xff] %v403_v6  ;;  %v406_v31 = vmax.f32 %v324_v22, 0.0  ;;  %v407_v32 = vmax.f32 %v325_v23, 0.0  ;;  %v328_v33 = vadd.f32 %v755_v3, %v242_v24  ;;  %v329_v34 = vadd.f32 %v755_v3, %v243_v25 }
  0x40   :  { %486 = vst [vmem:[%s1290_s3 + $0x1b0] sm:$0xff] %v404_v10  ;;  %v408_v36 = vmax.f32 %v326_v26, 0.0  ;;  %v409_v37 = vmax.f32 %v327_v27, 0.0  ;;  %v330_v38 = vadd.f32 %v755_v3, %v244_v28  ;;  %v331_v39 = vadd.f32 %v755_v3, %v245_v29 }
  0x41   :  { %487 = vst [vmem:[%s1290_s3 + $0x1b8] sm:$0xff] %v405_v11  ;;  %v410_v41 = vmax.f32 %v328_v33, 0.0  ;;  %v411_v42 = vmax.f32 %v329_v34, 0.0  ;;  %v648_v43 = vunpack.c.l.bf16 %v713_v30  ;;  %v649_v44 = vunpack.c.h.bf16 %v713_v30 }
  0x42   :  { %488 = vst [vmem:[%s1290_s3 + $0x1c0] sm:$0xff] %v406_v31  ;;  %v412_v46 = vmax.f32 %v330_v38, 0.0  ;;  %v413_v47 = vmax.f32 %v331_v39, 0.0  ;;  %v652_v48 = vunpack.c.l.bf16 %v714_v35  ;;  %v653_v49 = vunpack.c.h.bf16 %v714_v35 }
  0x43   :  { %489 = vst [vmem:[%s1290_s3 + $0x1c8] sm:$0xff] %v407_v32  ;;  %v246_v50 = vmul.f32 %v750_v1, %v648_v43  ;;  %v247_v51 = vmul.f32 %v750_v1, %v649_v44  ;;  %v656_v52 = vunpack.c.l.bf16 %v715_v40  ;;  %v657_v53 = vunpack.c.h.bf16 %v715_v40  ;;  %v721_v40 = vld [vmem:[%s1287_s0 + $0x140] sm:$0xff]  }
  0x44   :  { %490 = vst [vmem:[%s1290_s3 + $0x1d0] sm:$0xff] %v408_v36  ;;  %v248_v54 = vmul.f32 %v750_v1, %v652_v48  ;;  %v249_v55 = vmul.f32 %v750_v1, %v653_v49  ;;  %v660_v56 = vunpack.c.l.bf16 %v716_v45  ;;  %v661_v57 = vunpack.c.h.bf16 %v716_v45 }
  0x45   :  { %491 = vst [vmem:[%s1290_s3 + $0x1d8] sm:$0xff] %v409_v37  ;;  %v332_v58 = vadd.f32 %v755_v3, %v246_v50  ;;  %v333_v59 = vadd.f32 %v755_v3, %v247_v51  ;;  %v250_v60 = vmul.f32 %v750_v1, %v656_v52  ;;  %v251_v61 = vmul.f32 %v750_v1, %v657_v53 }
  0x46   :  { %492 = vst [vmem:[%s1290_s3 + $0x1e0] sm:$0xff] %v410_v41  ;;  %v334_v62 = vadd.f32 %v755_v3, %v248_v54  ;;  %v335_v63 = vadd.f32 %v755_v3, %v249_v55  ;;  %v252_v0 = vmul.f32 %v750_v1, %v660_v56  ;;  %v253_v2 = vmul.f32 %v750_v1, %v661_v57 }
  0x47   :  { %493 = vst [vmem:[%s1290_s3 + $0x1e8] sm:$0xff] %v411_v42  ;;  %v414_v5 = vmax.f32 %v332_v58, 0.0  ;;  %v415_v6 = vmax.f32 %v333_v59, 0.0  ;;  %v336_v7 = vadd.f32 %v755_v3, %v250_v60  ;;  %v337_v8 = vadd.f32 %v755_v3, %v251_v61 }
  0x48   :  { %494 = vst [vmem:[%s1290_s3 + $0x1f0] sm:$0xff] %v412_v46  ;;  %v416_v10 = vmax.f32 %v334_v62, 0.0  ;;  %v417_v11 = vmax.f32 %v335_v63, 0.0  ;;  %v338_v12 = vadd.f32 %v755_v3, %v252_v0  ;;  %v339_v13 = vadd.f32 %v755_v3, %v253_v2 }
  0x49   :  { %495 = vst [vmem:[%s1290_s3 + $0x1f8] sm:$0xff] %v413_v47  ;;  %v418_v15 = vmax.f32 %v336_v7, 0.0  ;;  %v419_v16 = vmax.f32 %v337_v8, 0.0  ;;  %v664_v17 = vunpack.c.l.bf16 %v717_v4  ;;  %v665_v18 = vunpack.c.h.bf16 %v717_v4 }
  0x4a   :  { %496 = vst [vmem:[%s1290_s3 + $0x200] sm:$0xff] %v414_v5  ;;  %v420_v20 = vmax.f32 %v338_v12, 0.0  ;;  %v421_v21 = vmax.f32 %v339_v13, 0.0  ;;  %v668_v22 = vunpack.c.l.bf16 %v718_v9  ;;  %v669_v23 = vunpack.c.h.bf16 %v718_v9 }
  0x4b   :  { %497 = vst [vmem:[%s1290_s3 + $0x208] sm:$0xff] %v415_v6  ;;  %v254_v24 = vmul.f32 %v750_v1, %v664_v17  ;;  %v255_v25 = vmul.f32 %v750_v1, %v665_v18  ;;  %v672_v26 = vunpack.c.l.bf16 %v719_v14  ;;  %v673_v27 = vunpack.c.h.bf16 %v719_v14 }
  0x4c   :  { %498 = vst [vmem:[%s1290_s3 + $0x210] sm:$0xff] %v416_v10  ;;  %v256_v28 = vmul.f32 %v750_v1, %v668_v22  ;;  %v257_v29 = vmul.f32 %v750_v1, %v669_v23  ;;  %v676_v30 = vunpack.c.l.bf16 %v720_v19  ;;  %v677_v31 = vunpack.c.h.bf16 %v720_v19 }
  0x4d   :  { %499 = vst [vmem:[%s1290_s3 + $0x218] sm:$0xff] %v417_v11  ;;  %v340_v32 = vadd.f32 %v755_v3, %v254_v24  ;;  %v341_v33 = vadd.f32 %v755_v3, %v255_v25  ;;  %v258_v34 = vmul.f32 %v750_v1, %v672_v26  ;;  %v259_v35 = vmul.f32 %v750_v1, %v673_v27 }
  0x4e   :  { %500 = vst [vmem:[%s1290_s3 + $0x220] sm:$0xff] %v418_v15  ;;  %v342_v36 = vadd.f32 %v755_v3, %v256_v28  ;;  %v343_v37 = vadd.f32 %v755_v3, %v257_v29  ;;  %v260_v38 = vmul.f32 %v750_v1, %v676_v30  ;;  %v261_v39 = vmul.f32 %v750_v1, %v677_v31 }
  0x4f   :  { %501 = vst [vmem:[%s1290_s3 + $0x228] sm:$0xff] %v419_v16  ;;  %v422_v41 = vmax.f32 %v340_v32, 0.0  ;;  %v423_v42 = vmax.f32 %v341_v33, 0.0  ;;  %v344_v43 = vadd.f32 %v755_v3, %v258_v34  ;;  %v345_v44 = vadd.f32 %v755_v3, %v259_v35 }
  0x50   :  { %502 = vst [vmem:[%s1290_s3 + $0x230] sm:$0xff] %v420_v20  ;;  %v424_v45 = vmax.f32 %v342_v36, 0.0  ;;  %v425_v46 = vmax.f32 %v343_v37, 0.0  ;;  %v346_v47 = vadd.f32 %v755_v3, %v260_v38  ;;  %v347_v48 = vadd.f32 %v755_v3, %v261_v39 }
  0x51   :  { %503 = vst [vmem:[%s1290_s3 + $0x238] sm:$0xff] %v421_v21  ;;  %v426_v49 = vmax.f32 %v344_v43, 0.0  ;;  %v680_v50 = vunpack.c.l.bf16 %v721_v40  ;;  %v681_v51 = vunpack.c.h.bf16 %v721_v40  ;;  %v427_v52 = vmax.f32 %v345_v44, 0.0 }
  0x52   :  { %504 = vst [vmem:[%s1290_s3 + $0x240] sm:$0xff] %v422_v41  ;;  %v428_v53 = vmax.f32 %v346_v47, 0.0  ;;  %v429_v56 = vmax.f32 %v347_v48, 0.0 }
  0x53   :  { %505 = vst [vmem:[%s1290_s3 + $0x248] sm:$0xff] %v423_v42  ;;  %v262_v54 = vmul.f32 %v750_v1, %v680_v50  ;;  %v263_v55 = vmul.f32 %v750_v1, %v681_v51 }
  0x54   :  { %506 = vst [vmem:[%s1290_s3 + $0x250] sm:$0xff] %v424_v45 }
  0x55   :  { %507 = vst [vmem:[%s1290_s3 + $0x258] sm:$0xff] %v425_v46  ;;  %v348_v57 = vadd.f32 %v755_v3, %v262_v54  ;;  %v349_v58 = vadd.f32 %v755_v3, %v263_v55 }
  0x56   :  { %508 = vst [vmem:[%s1290_s3 + $0x260] sm:$0xff] %v426_v49 }
  0x57   :  { %509 = vst [vmem:[%s1290_s3 + $0x268] sm:$0xff] %v427_v52  ;;  %v430_v1 = vmax.f32 %v348_v57, 0.0  ;;  %v431_v59 = vmax.f32 %v349_v58, 0.0 }
  0x58   :  { %510 = vst [vmem:[%s1290_s3 + $0x270] sm:$0xff] %v428_v53 }
  0x59   :  { %511 = vst [vmem:[%s1290_s3 + $0x278] sm:$0xff] %v429_v56 }
  0x5a   :  { %512 = vst [vmem:[%s1290_s3 + $0x280] sm:$0xff] %v430_v1 }
  0x5b   :  { %513 = vst [vmem:[%s1290_s3 + $0x288] sm:$0xff] %v431_v59 }

// kernel: up_forward.4
= control target key start
LH: loop header
LB: loop body
LE: loop exit
PB: predicated region body
PF: predicated region fallthrough
CT: control target
= control target key end

     0   :  { %s5332_s18 = smov 0   ;;  %s5334_s19 = smov 0   ;;  %s6853_s0 = inlined_call_operand.vmem [shape: bf16[2,368,128], index: 0, kind: input, shape index: {}]   ;;  %s6854_s1 = inlined_call_operand.vmem [shape: bf16[9,128,128], index: 1, kind: input, shape index: {}]   ;;  %s6855_s2 = inlined_call_operand.vmem [shape: f32[656,1], index: 2, kind: input, shape index: {}]   ;;  %s6856_s3 = inlined_call_operand.vmem [shape: bf16[656,128], index: 3, kind: output, shape index: {0}]   ;;  %s6857_s4 = inlined_call_operand.vmem [shape: f32[2,1,128], index: 4, kind: output, shape index: {1}]   ;;  %s6858_s5 = inlined_call_operand.vmem [shape: f32[2,1,128], index: 5, kind: output, shape index: {2}]  }
   0x1   :  { %s5336_s20 = smov 0  }
   0x2 LB: > { %s28_s21 = sadd.s32 1, %s5295_s19  ;;  %p4292_p0 = scmp.ge.s32.totalorder %s5299_s20, 1  ;;  %s5299_s20 = sphi %s5336_s20, %s16_s20   ;;  %s5295_s19 = sphi %s5334_s19, %s6915_s19   ;;  %s5291_s18 = sphi %s5332_s18, %s6914_s18  }
   0x3   : > { %p30_p1 = scmp.ge.s32.totalorder %s28_s21, 2  ;;  %p230_p2 = scmp.lt.s32.totalorder %s5299_s20, 3 }
   0x5   : > { %s6917_s21 = smov (%p30_p1, %s28_s21), 0  ;;  %p231_p3 = pnand %p4292_p0, %p230_p2 }
   0x7   : > { %234 = sbr.rel (%p231_p3) target bundleno = 953 (0x3b9), region = 32 }
   0xc   : > { %v4976_v0 = vld [vmem:[%s6854_s1 + $0x78] sm:$0xff]  ;;  %p282_p4 = scmp.lt.s32.totalorder %s5291_s18, 1  ;;  %v4975_v1 = vld [vmem:[%s6854_s1 + $0x70] sm:$0xff]  ;;  %v4974_v2 = vld [vmem:[%s6854_s1 + $0x68] sm:$0xff]  ;;  %vm498_vm0 = vsmask.f32 7424 }
   0xd   : > { %5197 = vmatpush.bf16.msra.mxu1 %v4976_v0  ;;  %5198 = vmatpush.bf16.msra.mxu2 %v4976_v0  ;;  %v4973_v3 = vld [vmem:[%s6854_s1 + $0x60] sm:$0xff]  ;;  %v4972_v4 = vld [vmem:[%s6854_s1 + $0x58] sm:$0xff]  ;;  %v4971_v9 = vld [vmem:[%s6854_s1 + $0x50] sm:$0xff]  ;;  %vm1052_vm1 = vcmask 1046528   ;;  %vm1766_vm2 = vsmask.f32 6400 }
   0xe   : > { %735 = vmatpush.bf16.msra.mxu0 %v4976_v0  ;;  %s5360_s26 = scalar_select %p282_p4, %s5291_s18, 1  ;;  %5199 = vmatpush.bf16.msra.mxu3 %v4976_v0  ;;  %v4970_v17 = vld [vmem:[%s6854_s1 + $0x48] sm:$0xff]  ;;  %v4969_v25 = vld [vmem:[%s6854_s1 + $0x40] sm:$0xff]  ;;  %v4984_v30 = vld [vmem:[%s6854_s1 + $0xb8] sm:$0xff]  ;;  %vm2913_vm3 = vsmask.f32 5376 }
   0xf   : > { %v4968_v33 = vld [vmem:[%s6854_s1 + $0x38] sm:$0xff]  ;;  %v4983_v38 = vld [vmem:[%s6854_s1 + $0xb0] sm:$0xff]  ;;  %v4982_v44 = vld [vmem:[%s6854_s1 + $0xa8] sm:$0xff]  ;;  %s291_s13 = smul.u32 41, %s5291_s18  ;;  %vm2199_vm4 = vcmask 1045504   ;;  %vm3346_vm5 = vcmask 1044480  }
  0x10   : > { %s5221_s29 = smul.u32 184, %s5360_s26  ;;  %v5019_v34 = vld [vmem:[%s6854_s1 + $0x138] sm:$0xff]  ;;  %v4967_v39 = vld [vmem:[%s6854_s1 + $0x30] sm:$0xff]  ;;  %v4966_v47 = vld [vmem:[%s6854_s1 + $0x28] sm:$0xff]  ;;  %s311_s27 = scalar_lea.vmem %s6857_s4, %s5360_s26 }
  0x11   : > { %5200 = vmatpush.bf16.msra.mxu1 %v4975_v1  ;;  %5201 = vmatpush.bf16.msra.mxu2 %v4975_v1  ;;  %v5018_v40 = vld [vmem:[%s6854_s1 + $0x130] sm:$0xff]  ;;  %v5017_v48 = vld [vmem:[%s6854_s1 + $0x128] sm:$0xff]  ;;  %v4981_v58 = vld [vmem:[%s6854_s1 + $0xa0] sm:$0xff]  ;;  %p292_p5 = scmp.lt.s32.totalorder %s291_s13, 81  ;;  %s317_s30 = scalar_lea.vmem %s6858_s5, %s5360_s26 }
  0x12   : > { %736 = vmatpush.bf16.msra.mxu0 %v4975_v1  ;;  %5202 = vmatpush.bf16.msra.mxu3 %v4975_v1  ;;  %s5372_s9 = scalar_lea.vmem %s6853_s0, %s5221_s29  ;;  %v4965_v61 = vld [vmem:[%s6854_s1 + $0x20] sm:$0xff] }
  0x13   : > { %v5378_v5 = vld [vmem:[%s5372_s9 + $0x30] sm:$0xff]  ;;  %v4953_v6 = vld [vmem:[%s5372_s9 + $0x60] sm:$0xff]  ;;  %v5385_v8 = vld [vmem:[%s5372_s9 + $0x38] sm:$0xff]  ;;  %s6919_s13 = smov (!%p292_p5, %s291_s13), 81 }
  0x14   : > { %v5382_v7 = vld [vmem:[%s5372_s9] sm:$0xff]   ;;  %v547_v10 = vshll.u32 %v5378_v5, 16  ;;  %v5392_v11 = vld [vmem:[%s5372_s9 + $0x68] sm:$0xff]  ;;  %v595_v12 = vshll.u32 %v4953_v6, 16  ;;  %v551_v15 = vshrl.u32 %v5378_v5, 16  ;;  %v555_v16 = vshll.u32 %v5385_v8, 16 }
  0x15   : > { %5203 = vmatpush.bf16.msra.mxu1 %v4974_v2  ;;  %5204 = vmatpush.bf16.msra.mxu2 %v4974_v2  ;;  %v5395_v13 = vld [vmem:[%s5372_s9 + $0x8] sm:$0xff]  ;;  %v502_v14 = vshll.u32 %v5382_v7, 16  ;;  %v599_v20 = vshrl.u32 %v4953_v6, 16  ;;  %v603_v21 = vshll.u32 %v5392_v11, 16  ;;  %v500_v22 = vshrl.u32 %v5382_v7, 16  ;;  %v5437_v41 = vld [vmem:[%s5372_s9 + $0x40] sm:$0xff] }
  0x16   : > { %737 = vmatpush.bf16.msra.mxu0 %v4974_v2  ;;  %5205 = vmatpush.bf16.msra.mxu3 %v4974_v2  ;;  %v5403_v18 = vrot.slane %v547_v10, 1  ;;  %v5405_v19 = vrot.slane %v595_v12, 1  ;;  %v507_v24 = vshll.u32 %v5395_v13, 16  ;;  %v557_v27 = vrot.slane %v555_v16, 1  ;;  %v5440_v42 = vld [vmem:[%s5372_s9 + $0x70] sm:$0xff]  ;;  %v5450_v46 = vld [vmem:[%s5372_s9 + $0x98] sm:$0xff] }
  0x17   : > { %v504_v23 = vrot.slane %v502_v14, 1  ;;  %v605_v29 = vrot.slane %v603_v21, 1  ;;  %v5443_v43 = vld [vmem:[%s5372_s9 + $0x10] sm:$0xff]  ;;  %v651_v51 = vshll.u32 %v5450_v46, 16  ;;  %v559_v52 = vshrl.u32 %v5385_v8, 16  ;;  %v5016_v63 = vld [vmem:[%s6854_s1 + $0x120] sm:$0xff] }
  0x18   : > { %v553_v26 = vor.u32 %v551_v15, %v5403_v18  ;;  %v601_v28 = vor.u32 %v599_v20, %v5405_v19  ;;  %v509_v32 = vrot.slane %v507_v24, 1  ;;  %v4959_v45 = vld [vmem:[%s5372_s9 + $0x90] sm:$0xff]  ;;  %v563_v53 = vshll.u32 %v5437_v41, 16  ;;  %v5482_v14 = vld [vmem:[%s5372_s9 + $0x48] sm:$0xff]  ;;  %v4980_v15 = vld [vmem:[%s6854_s1 + $0x98] sm:$0xff]  ;;  %s4294_s18 = sshll.u32 %s6919_s13, 3 }
  0x19   : > { %5206 = vmatpush.bf16.msra.mxu1 %v4973_v3  ;;  %5207 = vmatpush.bf16.msra.mxu2 %v4973_v3  ;;  %v505_v31 = vor.u32 %v504_v23, %v500_v22  ;;  %v643_v49 = vshll.u32 %v4959_v45, 16  ;;  %v647_v50 = vshrl.u32 %v4959_v45, 16  ;;  %v607_v54 = vshrl.u32 %v5392_v11, 16  ;;  %v358_v16 = vld [vmem:[%s5372_s9 + $0xa0] sm:$0xf]  ;;  %v5490_v20 = vld [vmem:[%s5372_s9 + $0x78] sm:$0xff]  ;;  %s6165_s16 = scalar_lea.vmem %s6855_s2, %s4294_s18 }
  0x1a   : > { %738 = vmatpush.bf16.msra.mxu0 %v4973_v3  ;;  %5208 = vmatpush.bf16.msra.mxu3 %v4973_v3  ;;  %v558_v35 = vsel %vm498_vm0, %v553_v26, %v557_v27  ;;  %v606_v36 = vsel %vm498_vm0, %v601_v28, %v605_v29  ;;  %v611_v55 = vshll.u32 %v5440_v42, 16  ;;  %v511_v56 = vshrl.u32 %v5395_v13, 16  ;;  %v5011_v21 = vld [vmem:[%s6854_s1 + $0xf8] sm:$0xff]  ;;  %v4979_v28 = vld [vmem:[%s6854_s1 + $0x90] sm:$0xff]  ;;  %s4295_s17 = sshll.u32 %s6919_s13, 2 }
  0x1b   : > { %v510_v37 = vsel %vm498_vm0, %v505_v31, %v509_v32  ;;  %v515_v57 = vshll.u32 %v5443_v43, 16  ;;  %v5468_v59 = vrot.slane %v643_v49, 1  ;;  %v653_v60 = vrot.slane %v651_v51, 1  ;;  %v4964_v22 = vld [vmem:[%s6854_s1 + $0x18] sm:$0xff]  ;;  %s6430_s24 = scalar_lea.vmem %s6856_s3, %s4295_s17 }
  0x1c   : > { %v561_v0 = vor.u32 %v559_v52, %v557_v27  ;;  %v565_v1 = vrot.slane %v563_v53, 1  ;;  %v609_v2 = vor.u32 %v607_v54, %v605_v29  ;;  %v613_v3 = vrot.slane %v611_v55, 1  ;;  %v5502_v26 = vld [vmem:[%s5372_s9 + $0x18] sm:$0xff]  ;;  %v5010_v29 = vld [vmem:[%s6854_s1 + $0xf0] sm:$0xff]  ;;  %v5534_v54 = vld [vmem:[%s5372_s9 + $0x80] sm:$0xff] }
  0x1d   : > { %5209 = vmatpush.bf16.msra.mxu1 %v4972_v4  ;;  %5210 = vmatpush.bf16.msra.mxu2 %v4972_v4  ;;  %v649_v62 = vor.u32 %v647_v50, %v5468_v59  ;;  %v517_v6 = vrot.slane %v515_v57, 1  ;;  %v5498_v23 = vunpack.c.l.b16 %v358_v16  ;;  %v5015_v27 = vld [vmem:[%s6854_s1 + $0x118] sm:$0xff]  ;;  %v567_v31 = vshrl.u32 %v5437_v41, 16  ;;  %v5531_v53 = vld [vmem:[%s5372_s9 + $0x50] sm:$0xff] }
  0x1e   : > { %739 = vmatpush.bf16.msra.mxu0 %v4972_v4  ;;  %5211 = vmatpush.bf16.msra.mxu3 %v4972_v4  ;;  %v513_v4 = vor.u32 %v511_v56, %v509_v32  ;;  %v566_v10 = vsel %vm498_vm0, %v561_v0, %v565_v1  ;;  %v614_v11 = vsel %vm498_vm0, %v609_v2, %v613_v3  ;;  %v571_v32 = vshll.u32 %v5482_v14, 16  ;;  %v4963_v55 = vld [vmem:[%s6854_s1 + $0x10] sm:$0xff]  ;;  %v5008_v56 = vld [vmem:[%s6854_s1 + $0xe0] sm:$0xff] }
  0x1f   : > { %v5014_v57 = vld [vmem:[%s6854_s1 + $0x110] sm:$0xff]  ;;  %v575_v0 = vshrl.u32 %v5482_v14, 16  ;;  %v623_v2 = vshrl.u32 %v5490_v20, 16 }
  0x20   : > { %v518_v12 = vsel %vm498_vm0, %v513_v4, %v517_v6  ;;  %v527_v4 = vshrl.u32 %v5502_v26, 16 }
  0x21   : > { %5212 = vmatpush.bf16.msra.mxu1 %v4971_v9  ;;  %5213 = vmatpush.bf16.msra.mxu2 %v4971_v9 }
  0x22   : > { %740 = vmatpush.bf16.msra.mxu0 %v4971_v9  ;;  %5214 = vmatpush.bf16.msra.mxu3 %v4971_v9  ;;  %v654_v9 = vsel %vm498_vm0, %v649_v62, %v653_v60 }
  0x25   : > { %5215 = vmatpush.bf16.msra.mxu1 %v4970_v17  ;;  %5216 = vmatpush.bf16.msra.mxu2 %v4970_v17 }
  0x26   : > { %741 = vmatpush.bf16.msra.mxu0 %v4970_v17  ;;  %5217 = vmatpush.bf16.msra.mxu3 %v4970_v17  ;;  %v375_v17 = vld [vmem:[%s5372_s9 + $0xa4] sm:$0x1] }
  0x27   : > { %v476_v24 = vunpack.c.l.b16 %v375_v17 }
  0x29   : > { %5218 = vmatpush.bf16.msra.mxu1 %v4969_v25  ;;  %5219 = vmatpush.bf16.msra.mxu2 %v4969_v25 }
  0x2a   : > { %742 = vmatpush.bf16.msra.mxu0 %v4969_v25  ;;  %5220 = vmatpush.bf16.msra.mxu3 %v4969_v25  ;;  %v655_v25 = vshrl.u32 %v5450_v46, 16 }
  0x2c   : > { %773 = vmatmul.bf16.vlgmr.msra.gmra.mxu1 %v558_v35  ;;  %803 = vmatmul.bf16.vlgmr.msra.gmra.mxu2 %v606_v36  ;;  %v657_v35 = vor.u32 %v655_v25, %v653_v60  ;;  %v5549_v60 = vld [vmem:[%s5372_s9 + $0x20] sm:$0xff]  ;;  %v5571_v25 = vld [vmem:[%s5372_s9 + $0x58] sm:$0xff] }
  0x2d   : > { %1163 = vmatpush.bf16.msrb.mxu2 %v4984_v30  ;;  %918 = vmatpush.bf16.msrb.mxu1 %v4968_v33  ;;  %v5514_v30 = vpack.c.b16 %v476_v24, %v5498_v23  ;;  %v615_v33 = vshrl.u32 %v5440_v42, 16  ;;  %v573_v42 = vrot.slane %v571_v32, 1  ;;  %v4977_v32 = vld [vmem:[%s6854_s1 + $0x80] sm:$0xff] }
  0x2e   : > { %2024 = vmatpush.bf16.msrb.mxu0 %v5019_v34  ;;  %833 = vmatmul.bf16.vlgmr.msra.gmra.mxu3 %v654_v9  ;;  %v619_v34 = vshll.u32 %v5490_v20, 16 }
  0x2f   : > { %743 = vmatmul.bf16.vlgmr.msra.gmra.mxu0 %v510_v37  ;;  %1591 = vmatpush.bf16.msrb.mxu3 %v5011_v21  ;;  %v659_v36 = vshll.u32 %v5514_v30, 16  ;;  %v519_v37 = vshrl.u32 %v5443_v43, 16  ;;  %v617_v45 = vor.u32 %v615_v33, %v613_v3  ;;  %v663_v62 = vshrl.u32 %v5514_v30, 16  ;;  %v5004_v33 = vld [vmem:[%s6854_s1 + $0xc0] sm:$0xff] }
  0x30   : > { %v621_v46 = vrot.slane %v619_v34, 1  ;;  %v627_v3 = vshll.u32 %v5534_v54, 16  ;;  %v4961_v34 = vld [vmem:[%s6854_s1] sm:$0xff] }
  0x31   : > { %1164 = vmatpush.bf16.msrb.mxu2 %v4983_v38  ;;  %919 = vmatpush.bf16.msrb.mxu1 %v4967_v39  ;;  %v523_v38 = vshll.u32 %v5502_v26, 16  ;;  %v661_v39 = vrot.slane %v659_v36, 1  ;;  %v5594_v36 = vld [vmem:[%s5372_s9 + $0xc] sm:$0xf] }
  0x32   : > { %2025 = vmatpush.bf16.msrb.mxu0 %v5018_v40  ;;  %v569_v40 = vor.u32 %v567_v31, %v565_v1  ;;  %v622_v51 = vsel %vm498_vm0, %v617_v45, %v621_v46  ;;  %v579_v1 = vshll.u32 %v5531_v53, 16  ;;  %v629_v16 = vrot.slane %v627_v3, 1  ;;  %v5005_v31 = vld [vmem:[%s6854_s1 + $0xc8] sm:$0xff]  ;;  %v5027_v3 = vld [vmem:[%s6854_s1 + $0x178] sm:$0xff] }
  0x33   : > { %1592 = vmatpush.bf16.msrb.mxu3 %v5010_v29  ;;  %v525_v49 = vrot.slane %v523_v38, 1  ;;  %v665_v9 = vor.u32 %v663_v62, %v661_v39  ;;  %v5013_v29 = vld [vmem:[%s6854_s1 + $0x108] sm:$0xff]  ;;  %v631_v45 = vshrl.u32 %v5534_v54, 16 }
  0x34   : > { %v574_v50 = vsel %vm498_vm0, %v569_v40, %v573_v42  ;;  %v6859_v40 = vunpack.c.l.b16 %v5594_v36 }
  0x35   : > { %1165 = vmatpush.bf16.msrb.mxu2 %v4982_v44  ;;  %920 = vmatpush.bf16.msrb.mxu1 %v4966_v47  ;;  %v5009_v44 = vld [vmem:[%s6854_s1 + $0xe8] sm:$0xff]  ;;  %v662_v47 = vsel %vm498_vm0, %v657_v35, %v661_v39  ;;  %v529_v17 = vor.u32 %v527_v4, %v525_v49  ;;  %v5012_v39 = vld [vmem:[%s6854_s1 + $0x100] sm:$0xff]  ;;  %v4986_v4 = vld [vmem:[%s5372_s9 + $0x18] sm:$0xff] }
  0x36   : > { %2026 = vmatpush.bf16.msrb.mxu0 %v5017_v48  ;;  %v521_v48 = vor.u32 %v519_v37, %v517_v6  ;;  %v531_v6 = vshll.u32 %v5549_v60, 16  ;;  %v1317_v35 = vld [vmem:[%s5372_s9 + $0x8] sm:$0xe]  ;;  %v5597_v37 = vld [vmem:[%s5372_s9 + $0x10] sm:$0xff] }
  0x37   : > { %1593 = vmatpush.bf16.msrb.mxu3 %v5009_v44  ;;  %v1418_v38 = vunpack.c.l.b16 %v1317_v35  ;;  %v583_v44 = vshrl.u32 %v5531_v53, 16  ;;  %v1779_v35 = vshll.u32 %v5597_v37, 16 }
  0x38   : > { %v526_v52 = vsel %vm498_vm0, %v521_v48, %v525_v49  ;;  %v533_v20 = vrot.slane %v531_v6, 1  ;;  %v5070_v6 = vld [vmem:[%s6854_s1 + $0x238] sm:$0xff] }
  0x39   : > { %1166 = vmatpush.bf16.msrb.mxu2 %v4981_v58  ;;  %921 = vmatpush.bf16.msrb.mxu1 %v4965_v61  ;;  %v4978_v58 = vld [vmem:[%s6854_s1 + $0x88] sm:$0xff]  ;;  %v1460_v49 = vpack.c.b16 %v6859_v40, %v1418_v38 }
  0x3a   : > { %2027 = vmatpush.bf16.msrb.mxu0 %v5016_v63  ;;  %v4962_v61 = vld [vmem:[%s6854_s1 + $0x8] sm:$0xff]  ;;  %v5007_v63 = vld [vmem:[%s6854_s1 + $0xd8] sm:$0xff]  ;;  %v534_v24 = vsel %vm498_vm0, %v529_v17, %v533_v20 }
  0x3b   : > { %1594 = vmatpush.bf16.msrb.mxu3 %v5008_v56  ;;  %v633_v56 = vor.u32 %v631_v45, %v629_v16 }
  0x3c   : > { %778 = vmatmul.bf16.gmra.mxu1 %v566_v10  ;;  %808 = vmatmul.bf16.gmra.mxu2 %v614_v11  ;;  %v5006_v10 = vld [vmem:[%s6854_s1 + $0xd0] sm:$0xff]  ;;  %v577_v11 = vor.u32 %v575_v0, %v573_v42  ;;  %v587_v42 = vshll.u32 %v5571_v25, 16 }
  0x3d   : > { %1167 = vmatpush.bf16.msrb.mxu2 %v4980_v15  ;;  %922 = vmatpush.bf16.msrb.mxu1 %v4964_v22  ;;  %v625_v15 = vor.u32 %v623_v2, %v621_v46  ;;  %v5062_v2 = vld [vmem:[%s6854_s1 + $0x1f8] sm:$0xff] }
  0x3e   : > { %2028 = vmatpush.bf16.msrb.mxu0 %v5015_v27  ;;  %838 = vmatmul.bf16.gmra.mxu3 %v662_v47  ;;  %v4958_v27 = vld [vmem:[%s5372_s9 + $0x88] sm:$0xff]  ;;  %v535_v47 = vshrl.u32 %v5549_v60, 16 }
  0x3f   : > { %748 = vmatmul.bf16.gmra.mxu0 %v518_v12  ;;  %1595 = vmatpush.bf16.msrb.mxu3 %v5007_v63  ;;  %v581_v12 = vrot.slane %v579_v1, 1  ;;  %v630_v22 = vsel %vm498_vm0, %v625_v15, %v629_v16  ;;  %v635_v46 = vshll.u32 %v4958_v27, 16  ;;  %v5054_v1 = vld [vmem:[%s6854_s1 + $0x1b8] sm:$0xff] }
  0x40   : > { %v537_v54 = vor.u32 %v535_v47, %v533_v20 }
  0x41   : > { %1168 = vmatpush.bf16.msrb.mxu2 %v4979_v28  ;;  %923 = vmatpush.bf16.msrb.mxu1 %v4963_v55  ;;  %v582_v21 = vsel %vm498_vm0, %v577_v11, %v581_v12  ;;  %v5575_v28 = vld [vmem:[%s5372_s9 + $0x28] sm:$0xff]  ;;  %v589_v55 = vrot.slane %v587_v42, 1  ;;  %v639_v11 = vshrl.u32 %v4958_v27, 16  ;;  %v5175_v27 = vld [vmem:[%s5372_s9] sm:$0xf0]  ;;  %v1781_v42 = vrot.slane %v1779_v35, 2 }
  0x42   : > { %2029 = vmatpush.bf16.msrb.mxu0 %v5014_v57  ;;  %v539_v48 = vshll.u32 %v5575_v28, 16  ;;  %v637_v57 = vrot.slane %v635_v46, 1  ;;  %v1054_v46 = vrot.slane %v5395_v13, 1 }
  0x43   : > { %1596 = vmatpush.bf16.msrb.mxu3 %v5006_v10  ;;  %v591_v10 = vshrl.u32 %v5571_v25, 16 }
  0x44   : > { %v638_v63 = vsel %vm498_vm0, %v633_v56, %v637_v57  ;;  %v641_v17 = vor.u32 %v639_v11, %v637_v57  ;;  %v5053_v57 = vld [vmem:[%s6854_s1 + $0x1b0] sm:$0xff] }
  0x45   : > { %1169 = vmatpush.bf16.msrb.mxu2 %v4978_v58  ;;  %924 = vmatpush.bf16.msrb.mxu1 %v4962_v61  ;;  %v541_v58 = vrot.slane %v539_v48, 1  ;;  %v593_v16 = vor.u32 %v591_v10, %v589_v55 }
  0x46   : > { %2030 = vmatpush.bf16.msrb.mxu0 %v5013_v29  ;;  %v4987_v29 = vld [vmem:[%s5372_s9 + $0x20] sm:$0xff] }
  0x47   : > { %1597 = vmatpush.bf16.msrb.mxu3 %v5005_v31  ;;  %v542_v0 = vsel %vm498_vm0, %v537_v54, %v541_v58  ;;  %v5176_v31 = vld [vmem:[%s5372_s9] sm:$0xe]  ;;  %v1486_v38 = vrot.slane %v4987_v29, 1 }
  0x49   : > { %1170 = vmatpush.bf16.msrb.mxu2 %v4977_v32  ;;  %925 = vmatpush.bf16.msrb.mxu1 %v4961_v34  ;;  %v1768_v32 = vshrl.u32 %v1460_v49, 16  ;;  %v1776_v34 = vshrl.u32 %v5597_v37, 16 }
  0x4a   : > { %2031 = vmatpush.bf16.msrb.mxu0 %v5012_v39 }
  0x4b   : > { %1598 = vmatpush.bf16.msrb.mxu3 %v5004_v33  ;;  %v1771_v33 = vshll.u32 %v1460_v49, 16  ;;  %v1770_v39 = vrot.slane %v1768_v32, 1 }
  0x4c   : > { %783 = vmatmul.bf16.gmra.mxu1 %v574_v50  ;;  %813 = vmatmul.bf16.gmra.mxu2 %v622_v51  ;;  %v1482_v50 = vrot.slane %v5597_v37, 1  ;;  %v1481_v51 = vrot.slane %v1460_v49, 1 }
  0x4d   : > { %2738 = vmatpush.bf16.msra.mxu2 %v5054_v1  ;;  %2310 = vmatpush.bf16.msra.mxu1 %v5027_v3  ;;  %v1797_v3 = vshll.u32 %v4987_v29, 16 }
  0x4e   : > { %843 = vmatmul.bf16.gmra.mxu3 %v665_v9  ;;  %v1483_v61 = vsel %vm1052_vm1, %v1481_v51, %v1482_v50  ;;  %v1484_v9 = vrot.slane %v4986_v4, 1  ;;  %3457 = vmatpush.bf16.msra.mxu0 %v5070_v6  ;;  %v1788_v51 = vshll.u32 %v4986_v4, 16  ;;  %v4989_v6 = vld [vmem:[%s5372_s9 + $0x30] sm:$0xff] }
  0x4f   : > { %753 = vmatmul.bf16.gmra.mxu0 %v526_v52  ;;  %v585_v52 = vor.u32 %v583_v44, %v581_v12  ;;  %3171 = vmatpush.bf16.msra.mxu3 %v5062_v2  ;;  %v543_v12 = vshrl.u32 %v5575_v28, 16  ;;  %v1773_v44 = vrot.slane %v1771_v33, 2  ;;  %v1794_v2 = vshrl.u32 %v4987_v29, 16 }
  0x50   : > { %v1485_v15 = vsel %vm1052_vm1, %v1482_v50, %v1484_v9  ;;  %v1785_v50 = vshrl.u32 %v4986_v4, 16  ;;  %v1790_v56 = vrot.slane %v1788_v51, 2  ;;  %v5069_v4 = vld [vmem:[%s6854_s1 + $0x230] sm:$0xff]  ;;  %v1799_v10 = vrot.slane %v1797_v3, 2  ;;  %v4991_v51 = vld [vmem:[%s5372_s9 + $0x40] sm:$0xff] }
  0x51   : > { %v590_v62 = vsel %vm498_vm0, %v585_v52, %v589_v55  ;;  %v545_v20 = vor.u32 %v543_v12, %v541_v58  ;;  %v1774_v47 = vor.u32 %v1773_v44, %v1770_v39  ;;  %v4988_v52 = vld [vmem:[%s5372_s9 + $0x28] sm:$0xff]  ;;  %2739 = vmatpush.bf16.msra.mxu2 %v5053_v57  ;;  %v1056_v58 = vrot.slane %v5443_v43, 1 }
  0x52   : > { %v1787_v55 = vrot.slane %v1785_v50, 1  ;;  %v1488_v54 = vrot.slane %v4988_v52, 1  ;;  %3458 = vmatpush.bf16.msra.mxu0 %v5069_v4  ;;  %v1490_v11 = vrot.slane %v4989_v6, 1  ;;  %v1058_v12 = vrot.slane %v5502_v26, 1  ;;  %v5060_v50 = vld [vmem:[%s6854_s1 + $0x1e8] sm:$0xff] }
  0x53   : > { %v5025_v57 = vld [vmem:[%s6854_s1 + $0x168] sm:$0xff] }
  0x5c   : > { %788 = vmatmul.bf16.gmra.mxu1 %v582_v21  ;;  %818 = vmatmul.bf16.gmra.mxu2 %v630_v22  ;;  %v598_v21 = vsel %vm498_vm0, %v593_v16, %v5405_v19  ;;  %v646_v22 = vsel %vm498_vm0, %v641_v17, %v5468_v59  ;;  %v5177_v19 = vor.u32 %v5176_v31, %v5175_v27  ;;  %v1778_v59 = vrot.slane %v1776_v34, 1  ;;  %v4990_v31 = vld [vmem:[%s5372_s9 + $0x38] sm:$0xff] }
  0x5d   : > { %v1059_v17 = vsel %vm1052_vm1, %v1056_v58, %v1058_v12  ;;  %v1492_v35 = vrot.slane %v4990_v31, 1 }
  0x5e   : > { %1599 = vmatmul.bf16.vlgmr.msrb.gmra.mxu3 %v1483_v61  ;;  %v1053_v45 = vrot.slane %v5177_v19, 1  ;;  %v1782_v48 = vor.u32 %v1781_v42, %v1778_v59  ;;  %v1489_v61 = vsel %vm1052_vm1, %v1486_v38, %v1488_v54 }
  0x5f   : > { %758 = vmatmul.bf16.gmra.mxu0 %v534_v24  ;;  %v550_v24 = vsel %vm498_vm0, %v545_v20, %v5403_v18  ;;  %v1487_v18 = vsel %vm1052_vm1, %v1484_v9, %v1486_v38  ;;  %v1796_v9 = vrot.slane %v1794_v2, 1  ;;  %v1060_v38 = vrot.slane %v5549_v60, 1 }
  0x60   : > { %v1055_v49 = vsel %vm1052_vm1, %v1053_v45, %v1054_v46  ;;  %v1783_v37 = vsel %vm1766_vm2, %v1774_v47, %v1782_v48  ;;  %v1493_v19 = vsel %vm1052_vm1, %v1490_v11, %v1492_v35  ;;  %v1815_v47 = vshll.u32 %v4989_v6, 16 }
  0x61   : > { %v1800_v16 = vor.u32 %v1799_v10, %v1796_v9  ;;  %v1061_v59 = vsel %vm1052_vm1, %v1058_v12, %v1060_v38  ;;  %v1824_v9 = vshll.u32 %v4990_v31, 16  ;;  %v4992_v12 = vld [vmem:[%s5372_s9 + $0x48] sm:$0xff] }
  0x6c   : > { %793 = vmatmul.bf16.gmra.mxu1 %v590_v62  ;;  %823 = vmatmul.bf16.gmra.mxu2 %v638_v63  ;;  %v1791_v62 = vor.u32 %v1790_v56, %v1787_v55  ;;  %v1057_v63 = vsel %vm1052_vm1, %v1054_v46, %v1056_v58  ;;  %v1812_v46 = vshrl.u32 %v4989_v6, 16  ;;  %v1817_v55 = vrot.slane %v1815_v47, 2 }
  0x6d   : > { %v1062_v58 = vrot.slane %v5575_v28, 1  ;;  %v1821_v6 = vshrl.u32 %v4990_v31, 16 }
  0x6e   : > { %1604 = vmatmul.bf16.gmra.mxu3 %v1485_v15  ;;  %v1792_v1 = vsel %vm1766_vm2, %v1782_v48, %v1791_v62  ;;  %v1491_v15 = vsel %vm1052_vm1, %v1488_v54, %v1490_v11  ;;  %v1494_v54 = vrot.slane %v4991_v51, 1 }
  0x6f   : > { %763 = vmatmul.bf16.gmra.mxu0 %v542_v0  ;;  %v5026_v0 = vld [vmem:[%s6854_s1 + $0x170] sm:$0xff] }
  0x70   : > { %2311 = vmatpush.bf16.msra.mxu1 %v5026_v0  ;;  %v1063_v0 = vsel %vm1052_vm1, %v1060_v38, %v1062_v58 }
  0x74   : > { %2312 = vmatpush.bf16.msra.mxu1 %v5025_v57 }
  0x7c   : > { %798 = vmatmul.bf16.gmra.mxu1 %v598_v21  ;;  %828 = vmatmul.bf16.gmra.mxu2 %v646_v22  ;;  %v1801_v21 = vsel %vm1766_vm2, %v1791_v62, %v1800_v16  ;;  %v1803_v22 = vshrl.u32 %v4988_v52, 16 }
  0x7e   : > { %1609 = vmatmul.bf16.gmra.mxu3 %v1487_v18  ;;  %v1805_v33 = vrot.slane %v1803_v22, 1  ;;  %v1496_v22 = vrot.slane %v4992_v12, 1 }
  0x7f   : > { %768 = vmatmul.bf16.gmra.mxu0 %v550_v24  ;;  %v1806_v24 = vshll.u32 %v4988_v52, 16 }
  0x81   : > { %v1808_v34 = vrot.slane %v1806_v24, 2  ;;  %v1064_v24 = vrot.slane %v5378_v5, 1 }
  0x83   : > { %v1809_v39 = vor.u32 %v1808_v34, %v1805_v33 }
  0x85   : > { %v1810_v18 = vsel %vm1766_vm2, %v1800_v16, %v1809_v39  ;;  %v1823_v16 = vrot.slane %v1821_v6, 1 }
  0x8c   : > { %926 = vmatmul.bf16.vlgmr.msrb.gmra.mxu1 %v5382_v7  ;;  %1171 = vmatmul.bf16.vlgmr.msrb.gmra.mxu2 %v1055_v49  ;;  %v5061_v7 = vld [vmem:[%s6854_s1 + $0x1f0] sm:$0xff]  ;;  %v5052_v49 = vld [vmem:[%s6854_s1 + $0x1a8] sm:$0xff] }
  0x8d   : > { %3172 = vmatpush.bf16.msra.mxu3 %v5061_v7  ;;  %2740 = vmatpush.bf16.msra.mxu2 %v5052_v49  ;;  %v4993_v49 = vld [vmem:[%s5372_s9 + $0x50] sm:$0xff] }
  0x8e   : > { %1614 = vmatmul.bf16.gmra.mxu3 %v1489_v61  ;;  %v1495_v61 = vsel %vm1052_vm1, %v1492_v35, %v1494_v54  ;;  %v1065_v35 = vsel %vm1052_vm1, %v1062_v58, %v1064_v24  ;;  %v1066_v58 = vrot.slane %v5385_v8, 1 }
  0x8f   : > { %2032 = vmatmul.bf16.vlgmr.msrb.gmra.mxu0 %v1783_v37 }
  0x91   : > { %3173 = vmatpush.bf16.msra.mxu3 %v5060_v50 }
  0x9c   : > { %931 = vmatmul.bf16.gmra.mxu1 %v5395_v13  ;;  %1176 = vmatmul.bf16.gmra.mxu2 %v1057_v63 }
  0x9e   : > { %1619 = vmatmul.bf16.gmra.mxu3 %v1491_v15 }
  0x9f   : > { %2037 = vmatmul.bf16.gmra.mxu0 %v1792_v1  ;;  %v5068_v1 = vld [vmem:[%s6854_s1 + $0x228] sm:$0xff] }
  0xa0   : > { %3459 = vmatpush.bf16.msra.mxu0 %v5068_v1 }
  0xa9   : > { %v5668_v13 = vpop.f32.mrf.mxu1 }
  0xac   : > { %v5671_v20 = vpop.f32.mrf.mxu0  ;;  %936 = vmatmul.bf16.gmra.mxu1 %v5443_v43  ;;  %1181 = vmatmul.bf16.gmra.mxu2 %v1059_v17  ;;  %v1826_v17 = vrot.slane %v1824_v9, 2  ;;  %v5051_v9 = vld [vmem:[%s6854_s1 + $0x1a0] sm:$0xff] }
  0xad   : > { %2741 = vmatpush.bf16.msra.mxu2 %v5051_v9 }
  0xae   : > { %1624 = vmatmul.bf16.gmra.mxu3 %v1493_v19  ;;  %v1827_v33 = vor.u32 %v1826_v17, %v1823_v16  ;;  %v5059_v16 = vld [vmem:[%s6854_s1 + $0x1e0] sm:$0xff] }
  0xaf   : > { %2042 = vmatmul.bf16.gmra.mxu0 %v1801_v21  ;;  %v5675_v27 = vpop.f32.mrf.mxu2  ;;  %v5024_v17 = vld [vmem:[%s6854_s1 + $0x160] sm:$0xff]  ;;  %3174 = vmatpush.bf16.msra.mxu3 %v5059_v16 }
  0xb0   : > { %2313 = vmatpush.bf16.msra.mxu1 %v5024_v17 }
  0xb1   : > { %v5677_v29 = vpop.f32.mrf.mxu1  ;;  %v5692_v45 = vpop.f32.mrf.mxu3 }
  0xb2   : > { %6865 = vst [vmem:[#allocation2_spill] sm:$0xff] %v5692_v45 }
  0xb4   : > { %v5680_v32 = vpop.f32.mrf.mxu0 }
  0xb7   : > { %v5684_v43 = vpop.f32.mrf.mxu2 }
  0xb9   : > { %v5686_v44 = vpop.f32.mrf.mxu1  ;;  %v5708_v56 = vpop.f32.mrf.mxu3 }
  0xba   : > { %6866 = vst [vmem:[#allocation3_spill] sm:$0xff] %v5708_v56 }
  0xbc   : > { %v5689_v42 = vpop.f32.mrf.mxu0  ;;  %941 = vmatmul.bf16.gmra.mxu1 %v5502_v26  ;;  %1186 = vmatmul.bf16.gmra.mxu2 %v1061_v59  ;;  %v1814_v26 = vrot.slane %v1812_v46, 1  ;;  %v1830_v59 = vshrl.u32 %v4991_v51, 16 }
  0xbe   : > { %v1818_v62 = vor.u32 %v1817_v55, %v1814_v26  ;;  %1629 = vmatmul.bf16.gmra.mxu3 %v1495_v61  ;;  %v1832_v26 = vrot.slane %v1830_v59, 1 }
  0xbf   : > { %2047 = vmatmul.bf16.gmra.mxu0 %v1810_v18  ;;  %v5695_v48 = vpop.f32.mrf.mxu2  ;;  %v1833_v18 = vshll.u32 %v4991_v51, 16 }
  0xc0   : > { %v1819_v3 = vsel %vm1766_vm2, %v1809_v39, %v1818_v62  ;;  %v1828_v19 = vsel %vm1766_vm2, %v1818_v62, %v1827_v33 }
  0xc1   : > { %v5700_v37 = vpop.f32.mrf.mxu1  ;;  %v5726_v4 = vpop.f32.mrf.mxu3  ;;  %v1835_v55 = vrot.slane %v1833_v18, 2 }
  0xc2   : > { %6867 = vst [vmem:[#allocation4_spill] sm:$0xff] %v5726_v4 }
  0xc4   : > { %v5706_v52 = vpop.f32.mrf.mxu0 }
  0xc7   : > { %v5715_v7 = vpop.f32.mrf.mxu2 }
  0xc9   : > { %v5717_v63 = vpop.f32.mrf.mxu1  ;;  %v5736_v21 = vpop.f32.mrf.mxu3 }
  0xca   : > { %6868 = vst [vmem:[#allocation5_spill] sm:$0xff] %v5736_v21 }
  0xcc   : > { %v5723_v2 = vpop.f32.mrf.mxu0  ;;  %946 = vmatmul.bf16.gmra.mxu1 %v5549_v60  ;;  %1191 = vmatmul.bf16.gmra.mxu2 %v1063_v0  ;;  %v1497_v60 = vsel %vm1052_vm1, %v1494_v54, %v1496_v22  ;;  %v1498_v54 = vrot.slane %v4993_v49, 1  ;;  %v1067_v0 = vsel %vm1052_vm1, %v1064_v24, %v1066_v58  ;;  %v1842_v24 = vshll.u32 %v4992_v12, 16 }
  0xce   : > { %1634 = vmatmul.bf16.gmra.mxu3 %v1497_v60  ;;  %v1499_v61 = vsel %vm1052_vm1, %v1496_v22, %v1498_v54  ;;  %v1839_v22 = vshrl.u32 %v4992_v12, 16  ;;  %v1844_v59 = vrot.slane %v1842_v24, 2  ;;  %v1068_v12 = vrot.slane %v5437_v41, 1 }
  0xcf   : > { %2052 = vmatmul.bf16.gmra.mxu0 %v1819_v3  ;;  %v5729_v10 = vpop.f32.mrf.mxu2  ;;  %v1851_v24 = vshll.u32 %v4993_v49, 16 }
  0xd0   : > { %v1069_v9 = vsel %vm1052_vm1, %v1066_v58, %v1068_v12 }
  0xd1   : > { %v5731_v11 = vpop.f32.mrf.mxu1  ;;  %v5748_v39 = vpop.f32.mrf.mxu3  ;;  %v1853_v40 = vrot.slane %v1851_v24, 2 }
  0xd2   : > { %6870 = vst [vmem:[#allocation7_spill] sm:$0xff] %v5748_v39 }
  0xd4   : > { %v5734_v15 = vpop.f32.mrf.mxu0 }
  0xd7   : > { %v5740_v34 = vpop.f32.mrf.mxu2 }
  0xd8   : > { %6869 = vst [vmem:[#allocation6_spill] sm:$0xff] %v5740_v34 }
  0xd9   : > { %v5742_v31 = vpop.f32.mrf.mxu1  ;;  %v846_v57 = vpop.f32.mrf.mxu3 }
  0xdc   : > { %v5745_v38 = vpop.f32.mrf.mxu0  ;;  %951 = vmatmul.bf16.gmra.mxu1 %v5575_v28  ;;  %1196 = vmatmul.bf16.gmra.mxu2 %v1065_v35  ;;  %v1836_v28 = vor.u32 %v1835_v55, %v1832_v26  ;;  %v5067_v26 = vld [vmem:[%s6854_s1 + $0x220] sm:$0xff] }
  0xdd   : > { %3460 = vmatpush.bf16.msra.mxu0 %v5067_v26  ;;  %v5810_v26 = vld [vmem:[%s5372_s9 + $0x60] sm:$0xff] }
  0xde   : > { %1639 = vmatmul.bf16.gmra.mxu3 %v1499_v61  ;;  %v1837_v3 = vsel %vm1766_vm2, %v1827_v33, %v1836_v28 }
  0xdf   : > { %2057 = vmatmul.bf16.gmra.mxu0 %v1828_v19  ;;  %v5751_v46 = vpop.f32.mrf.mxu2  ;;  %v1841_v19 = vrot.slane %v1839_v22, 1 }
  0xe0   : > { %6871 = vst [vmem:[#allocation8_spill] sm:$0xff] %v5751_v46 }
  0xe1   : > { %v5753_v47 = vpop.f32.mrf.mxu1  ;;  %v5768_v6 = vpop.f32.mrf.mxu3  ;;  %v1845_v61 = vor.u32 %v1844_v59, %v1841_v19 }
  0xe3   : > { %v1846_v17 = vsel %vm1766_vm2, %v1836_v28, %v1845_v61  ;;  %v1502_v28 = vrot.slane %v5810_v26, 1 }
  0xe4   : > { %v5756_v50 = vpop.f32.mrf.mxu0 }
  0xe7   : > { %v5760_v62 = vpop.f32.mrf.mxu2 }
  0xe8   : > { %6872 = vst [vmem:[#allocation9_spill] sm:$0xff] %v5760_v62 }
  0xe9   : > { %v5762_v51 = vpop.f32.mrf.mxu1  ;;  %v5787_v18 = vpop.f32.mrf.mxu3 }
  0xec   : > { %v5765_v1 = vpop.f32.mrf.mxu0  ;;  %956 = vmatmul.bf16.gmra.mxu1 %v5378_v5  ;;  %1201 = vmatmul.bf16.gmra.mxu2 %v1067_v0  ;;  %v4994_v5 = vld [vmem:[%s5372_s9 + $0x58] sm:$0xff] }
  0xed   : > { %v1500_v55 = vrot.slane %v4994_v5, 1 }
  0xef   : > { %2062 = vmatmul.bf16.gmra.mxu0 %v1837_v3  ;;  %v5780_v60 = vpop.f32.mrf.mxu2  ;;  %v1501_v57 = vsel %vm1052_vm1, %v1498_v54, %v1500_v55  ;;  %v1848_v54 = vshrl.u32 %v4993_v49, 16 }
  0xf0   : > { %6873 = vst [vmem:[#allocation10_spill] sm:$0xff] %v5780_v60  ;;  %1644 = vmatmul.bf16.gmra.mxu3 %v1501_v57 }
  0xf1   : > { %v5782_v33 = vpop.f32.mrf.mxu1  ;;  %v5802_v22 = vpop.f32.mrf.mxu3  ;;  %v1850_v58 = vrot.slane %v1848_v54, 1 }
  0xf4   : > { %v5785_v35 = vpop.f32.mrf.mxu0 }
  0xf7   : > { %v5794_v0 = vpop.f32.mrf.mxu2 }
  0xf8   : > { %6874 = vst [vmem:[#allocation11_spill] sm:$0xff] %v5794_v0 }
  0xf9   : > { %v5796_v3 = vpop.f32.mrf.mxu1  ;;  %v5814_v39 = vpop.f32.mrf.mxu3 }
  0xfc   : > { %v5799_v16 = vpop.f32.mrf.mxu0  ;;  %961 = vmatmul.bf16.gmra.mxu1 %v5385_v8  ;;  %1206 = vmatmul.bf16.gmra.mxu2 %v1069_v9  ;;  %v1070_v8 = vrot.slane %v5482_v14, 1  ;;  %v1503_v9 = vsel %vm1052_vm1, %v1500_v55, %v1502_v28  ;;  %v1857_v55 = vshrl.u32 %v4994_v5, 16 }
  0xfe   : > { %v1071_v4 = vsel %vm1052_vm1, %v1068_v12, %v1070_v8  ;;  %v1859_v60 = vrot.slane %v1857_v55, 1 }
  0xff   : > { %2067 = vmatmul.bf16.gmra.mxu0 %v1846_v17  ;;  %v5805_v19 = vpop.f32.mrf.mxu2  ;;  %v1854_v17 = vor.u32 %v1853_v40, %v1850_v58  ;;  %v1860_v40 = vshll.u32 %v4994_v5, 16 }
 0x100   : > { %6875 = vst [vmem:[#allocation12_spill] sm:$0xff] %v5805_v19  ;;  %1649 = vmatmul.bf16.gmra.mxu3 %v1503_v9  ;;  %v5828_v9 = vld [vmem:[%s5372_s9 + $0x68] sm:$0xff] }
 0x101   : > { %v5807_v59 = vpop.f32.mrf.mxu1  ;;  %v1855_v54 = vsel %vm1766_vm2, %v1845_v61, %v1854_v17  ;;  %v5823_v24 = vpop.f32.mrf.mxu3  ;;  %v1862_v61 = vrot.slane %v1860_v40, 2 }
 0x104   : > { %v5812_v57 = vpop.f32.mrf.mxu0 }
 0x107   : > { %v5819_v49 = vpop.f32.mrf.mxu2 }
 0x108   : > { %6876 = vst [vmem:[#allocation13_spill] sm:$0xff] %v5819_v49 }
 0x109   : > { %v927_v21 = vpop.f32.mrf.mxu1  ;;  %v5831_v62 = vpop.f32.mrf.mxu3 }
 0x10a   : > { %v928_v45 = vadd.f32 %v927_v21, %v5671_v20  ;;  %v5058_v20 = vld [vmem:[%s6854_s1 + $0x1d8] sm:$0xff]  ;;  %v1072_v21 = vrot.slane %v5531_v53, 1 }
 0x10b   : > { %3175 = vmatpush.bf16.msra.mxu3 %v5058_v20 }
 0x10c   : > { %v2033_v56 = vpop.f32.mrf.mxu0  ;;  %966 = vmatmul.bf16.gmra.mxu1 %v5437_v41  ;;  %1211 = vmatmul.bf16.gmra.mxu2 %v1071_v4  ;;  %v5050_v41 = vld [vmem:[%s6854_s1 + $0x198] sm:$0xff] }
 0x10d   : > { %2742 = vmatpush.bf16.msra.mxu2 %v5050_v41 }
 0x10f   : > { %2072 = vmatmul.bf16.gmra.mxu0 %v1855_v54  ;;  %v1172_v58 = vpop.f32.mrf.mxu2 }
 0x110   : > { %v1276_v49 = vadd.f32 %v1172_v58, %v928_v45  ;;  %v1504_v45 = vrot.slane %v5828_v9, 1  ;;  %v1073_v58 = vsel %vm1052_vm1, %v1070_v8, %v1072_v21  ;;  %v1869_v8 = vshll.u32 %v5810_v26, 16 }
 0x111   : > { %v929_v19 = vpop.f32.mrf.mxu1 }
 0x112   : > { %v1704_v12 = vadd.f32 %v5768_v6, %v1276_v49  ;;  %v1505_v6 = vsel %vm1052_vm1, %v1502_v28, %v1504_v45  ;;  %v930_v5 = vadd.f32 %v929_v19, %v5680_v32  ;;  %v1863_v49 = vor.u32 %v1862_v61, %v1859_v60  ;;  %v5851_v28 = vpop.f32.mrf.mxu3  ;;  %v5066_v60 = vld [vmem:[%s6854_s1 + $0x218] sm:$0xff] }
 0x113   : > { %1654 = vmatmul.bf16.gmra.mxu3 %v1505_v6  ;;  %v1866_v19 = vshrl.u32 %v5810_v26, 16  ;;  %3461 = vmatpush.bf16.msra.mxu0 %v5066_v60  ;;  %v1871_v6 = vrot.slane %v1869_v8, 2 }
 0x114   : > { %v2035_v0 = vpop.f32.mrf.mxu0  ;;  %v5840_v4 = vadd.f32 %v2033_v56, %v1704_v12  ;;  %v1864_v41 = vsel %vm1766_vm2, %v1854_v17, %v1863_v49  ;;  %v5023_v56 = vld [vmem:[%s6854_s1 + $0x158] sm:$0xff] }
 0x115   : > { %2314 = vmatpush.bf16.msra.mxu1 %v5023_v56  ;;  %v1868_v20 = vrot.slane %v1866_v19, 1 }
 0x117   : > { %v1174_v54 = vpop.f32.mrf.mxu2 }
 0x118   : > { %v1277_v55 = vadd.f32 %v1174_v54, %v930_v5 }
 0x119   : > { %v932_v40 = vpop.f32.mrf.mxu1 }
 0x11a   : > { %v1705_v46 = vadd.f32 %v5787_v18, %v1277_v55  ;;  %v933_v18 = vadd.f32 %v932_v40, %v5689_v42  ;;  %v5866_v5 = vpop.f32.mrf.mxu3  ;;  %v1074_v55 = vrot.slane %v5571_v25, 1 }
 0x11c   : > { %v2038_v34 = vpop.f32.mrf.mxu0  ;;  %971 = vmatmul.bf16.gmra.mxu1 %v5482_v14  ;;  %1216 = vmatmul.bf16.gmra.mxu2 %v1073_v58  ;;  %v5854_v32 = vadd.f32 %v2035_v0, %v1705_v46  ;;  %v5863_v14 = vld [vmem:[%s5372_s9 + $0x70] sm:$0xff]  ;;  %v1872_v58 = vor.u32 %v1871_v6, %v1868_v20  ;;  %v1075_v60 = vsel %vm1052_vm1, %v1072_v21, %v1074_v55  ;;  %v1878_v21 = vshll.u32 %v5828_v9, 16 }
 0x11d   : > { %v1506_v54 = vrot.slane %v5863_v14, 1 }
 0x11e   : > { %v1880_v6 = vrot.slane %v1878_v21, 2 }
 0x11f   : > { %2077 = vmatmul.bf16.gmra.mxu0 %v1864_v41  ;;  %v1177_v17 = vpop.f32.mrf.mxu2  ;;  %v1507_v26 = vsel %vm1052_vm1, %v1504_v45, %v1506_v54 }
 0x120   : > { %v1278_v12 = vadd.f32 %v1177_v17, %v933_v18  ;;  %v1875_v17 = vshrl.u32 %v5828_v9, 16 }
 0x121   : > { %v934_v61 = vpop.f32.mrf.mxu1 }
 0x122   : > { %v1706_v46 = vadd.f32 %v5802_v22, %v1278_v12  ;;  %v935_v40 = vadd.f32 %v934_v61, %v5706_v52  ;;  %v5877_v8 = vpop.f32.mrf.mxu3 }
 0x123   : > { %1659 = vmatmul.bf16.gmra.mxu3 %v1507_v26 }
 0x124   : > { %v2040_v0 = vpop.f32.mrf.mxu0  ;;  %v5869_v42 = vadd.f32 %v2038_v34, %v1706_v46  ;;  %v1873_v34 = vsel %vm1766_vm2, %v1863_v49, %v1872_v58  ;;  %v5886_v46 = vld [vmem:[%s5372_s9 + $0x78] sm:$0xff] }
 0x125   : > { %v1508_v26 = vrot.slane %v5886_v46, 1 }
 0x127   : > { %v1179_v41 = vpop.f32.mrf.mxu2  ;;  %v1509_v9 = vsel %vm1052_vm1, %v1506_v54, %v1508_v26 }
 0x128   : > { %v1279_v56 = vadd.f32 %v1179_v41, %v935_v40 }
 0x129   : > { %v937_v22 = vpop.f32.mrf.mxu1 }
 0x12a   : > { %v1707_v18 = vadd.f32 %v5814_v39, %v1279_v56  ;;  %v938_v52 = vadd.f32 %v937_v22, %v5723_v2  ;;  %v5250_v2 = vld [vmem:[%s5372_s9 + $0x60] sm:$0xff] }
 0x12b   : > { %v1076_v41 = vrot.slane %v5250_v2, 1 }
 0x12c   : > { %v2043_v19 = vpop.f32.mrf.mxu0  ;;  %976 = vmatmul.bf16.gmra.mxu1 %v5531_v53  ;;  %1221 = vmatmul.bf16.gmra.mxu2 %v1075_v60  ;;  %v5880_v45 = vadd.f32 %v2040_v0, %v1707_v18  ;;  %v1877_v53 = vrot.slane %v1875_v17, 1  ;;  %v5889_v0 = vpop.f32.mrf.mxu3 }
 0x12e   : > { %v1881_v22 = vor.u32 %v1880_v6, %v1877_v53 }
 0x12f   : > { %2082 = vmatmul.bf16.gmra.mxu0 %v1873_v34  ;;  %v1182_v12 = vpop.f32.mrf.mxu2  ;;  %v1077_v34 = vsel %vm1052_vm1, %v1074_v55, %v1076_v41 }
 0x130   : > { %v1280_v39 = vadd.f32 %v1182_v12, %v938_v52  ;;  %v1887_v12 = vshll.u32 %v5863_v14, 16 }
 0x131   : > { %v939_v61 = vpop.f32.mrf.mxu1 }
 0x132   : > { %v1708_v49 = vadd.f32 %v5823_v24, %v1280_v39  ;;  %v940_v56 = vadd.f32 %v939_v61, %v5734_v15  ;;  %v5049_v15 = vld [vmem:[%s6854_s1 + $0x190] sm:$0xff]  ;;  %v1889_v6 = vrot.slane %v1887_v12, 2 }
 0x133   : > { %1664 = vmatmul.bf16.gmra.mxu3 %v1509_v9  ;;  %2743 = vmatpush.bf16.msra.mxu2 %v5049_v15 }
 0x134   : > { %v2045_v20 = vpop.f32.mrf.mxu0  ;;  %v5892_v40 = vadd.f32 %v2043_v19, %v1708_v49  ;;  %v1882_v19 = vsel %vm1766_vm2, %v1872_v58, %v1881_v22  ;;  %v5900_v21 = vpop.f32.mrf.mxu3 }
 0x137   : > { %v1184_v60 = vpop.f32.mrf.mxu2 }
 0x138   : > { %v1281_v18 = vadd.f32 %v1184_v60, %v940_v56 }
 0x139   : > { %v942_v24 = vpop.f32.mrf.mxu1 }
 0x13a   : > { %v1709_v52 = vadd.f32 %v5831_v62, %v1281_v18  ;;  %v943_v55 = vadd.f32 %v942_v24, %v5745_v38  ;;  %v1884_v62 = vshrl.u32 %v5863_v14, 16  ;;  %v5057_v38 = vld [vmem:[%s6854_s1 + $0x1d0] sm:$0xff] }
 0x13b   : > { %v5022_v14 = vld [vmem:[%s6854_s1 + $0x150] sm:$0xff]  ;;  %3176 = vmatpush.bf16.msra.mxu3 %v5057_v38 }
 0x13c   : > { %v2048_v17 = vpop.f32.mrf.mxu0  ;;  %981 = vmatmul.bf16.gmra.mxu1 %v5571_v25  ;;  %1226 = vmatmul.bf16.gmra.mxu2 %v1077_v34  ;;  %v5903_v54 = vadd.f32 %v2045_v20, %v1709_v52  ;;  %v5912_v25 = vld [vmem:[%s5372_s9 + $0x80] sm:$0xff]  ;;  %v1886_v53 = vrot.slane %v1884_v62, 1  ;;  %v5918_v9 = vpop.f32.mrf.mxu3 }
 0x13d   : > { %v1510_v56 = vrot.slane %v5912_v25, 1  ;;  %2315 = vmatpush.bf16.msra.mxu1 %v5022_v14 }
 0x13e   : > { %v1890_v52 = vor.u32 %v1889_v6, %v1886_v53  ;;  %v5943_v6 = vld [vmem:[%s5372_s9 + $0x88] sm:$0xff] }
 0x13f   : > { %2087 = vmatmul.bf16.gmra.mxu0 %v1882_v19  ;;  %v1187_v39 = vpop.f32.mrf.mxu2  ;;  %v1511_v24 = vsel %vm1052_vm1, %v1508_v26, %v1510_v56 }
 0x140   : > { %v1282_v58 = vadd.f32 %v1187_v39, %v943_v55 }
 0x141   : > { %v944_v61 = vpop.f32.mrf.mxu1 }
 0x142   : > { %v1710_v49 = vadd.f32 %v5851_v28, %v1282_v58  ;;  %v5251_v28 = vld [vmem:[%s5372_s9 + $0x68] sm:$0xff]  ;;  %v945_v34 = vadd.f32 %v944_v61, %v5756_v50  ;;  %v5065_v58 = vld [vmem:[%s6854_s1 + $0x210] sm:$0xff]  ;;  %v1896_v61 = vshll.u32 %v5886_v46, 16 }
 0x143   : > { %v1078_v18 = vrot.slane %v5251_v28, 1  ;;  %1669 = vmatmul.bf16.gmra.mxu3 %v1511_v24  ;;  %3462 = vmatpush.bf16.msra.mxu0 %v5065_v58 }
 0x144   : > { %v2050_v20 = vpop.f32.mrf.mxu0  ;;  %v5924_v60 = vadd.f32 %v2048_v17, %v1710_v49  ;;  %v1891_v17 = vsel %vm1766_vm2, %v1881_v22, %v1890_v52  ;;  %v5935_v26 = vpop.f32.mrf.mxu3 }
 0x145   : > { %v1079_v62 = vsel %vm1052_vm1, %v1076_v41, %v1078_v18 }
 0x147   : > { %v1189_v19 = vpop.f32.mrf.mxu2 }
 0x148   : > { %v1283_v15 = vadd.f32 %v1189_v19, %v945_v34  ;;  %v1512_v34 = vrot.slane %v5943_v6, 1  ;;  %v5252_v19 = vld [vmem:[%s5372_s9 + $0x70] sm:$0xff] }
 0x149   : > { %v947_v55 = vpop.f32.mrf.mxu1 }
 0x14a   : > { %v1711_v12 = vadd.f32 %v5866_v5, %v1283_v15  ;;  %v948_v41 = vadd.f32 %v947_v55, %v5765_v1  ;;  %v1893_v5 = vshrl.u32 %v5886_v46, 16  ;;  %v1080_v15 = vrot.slane %v5252_v19, 1 }
 0x14b   : > { %v1513_v46 = vsel %vm1052_vm1, %v1510_v56, %v1512_v34 }
 0x14c   : > { %v2053_v39 = vpop.f32.mrf.mxu0  ;;  %986 = vmatmul.bf16.gmra.mxu1 %v5250_v2  ;;  %1231 = vmatmul.bf16.gmra.mxu2 %v1079_v62  ;;  %v5937_v50 = vadd.f32 %v2050_v20, %v1711_v12  ;;  %v1895_v14 = vrot.slane %v1893_v5, 1  ;;  %v1898_v20 = vrot.slane %v1896_v61, 2  ;;  %v5946_v24 = vpop.f32.mrf.mxu3  ;;  %v1081_v58 = vsel %vm1052_vm1, %v1078_v18, %v1080_v15 }
 0x14e   : > { %v1899_v62 = vor.u32 %v1898_v20, %v1895_v14 }
 0x14f   : > { %2092 = vmatmul.bf16.gmra.mxu0 %v1891_v17  ;;  %v1192_v22 = vpop.f32.mrf.mxu2 }
 0x150   : > { %v1284_v49 = vadd.f32 %v1192_v22, %v948_v41  ;;  %v1902_v22 = vshrl.u32 %v5912_v25, 16 }
 0x151   : > { %v949_v53 = vpop.f32.mrf.mxu1 }
 0x152   : > { %v1712_v38 = vadd.f32 %v5877_v8, %v1284_v49  ;;  %v950_v55 = vadd.f32 %v949_v53, %v5785_v35  ;;  %v1905_v49 = vshll.u32 %v5912_v25, 16 }
 0x153   : > { %1674 = vmatmul.bf16.gmra.mxu3 %v1513_v46 }
 0x154   : > { %v2055_v2 = vpop.f32.mrf.mxu0  ;;  %v5949_v1 = vadd.f32 %v2053_v39, %v1712_v38  ;;  %v1900_v39 = vsel %vm1766_vm2, %v1890_v52, %v1899_v62  ;;  %v5957_v61 = vpop.f32.mrf.mxu3  ;;  %v5965_v38 = vld [vmem:[%s5372_s9 + $0x90] sm:$0xff]  ;;  %v1907_v20 = vrot.slane %v1905_v49, 2 }
 0x155   : > { %v1514_v46 = vrot.slane %v5965_v38, 1 }
 0x157   : > { %v1194_v12 = vpop.f32.mrf.mxu2  ;;  %v1515_v25 = vsel %vm1052_vm1, %v1512_v34, %v1514_v46 }
 0x158   : > { %v1285_v17 = vadd.f32 %v1194_v12, %v950_v55 }
 0x159   : > { %v952_v8 = vpop.f32.mrf.mxu1 }
 0x15a   : > { %v1713_v41 = vadd.f32 %v5889_v0, %v1285_v17  ;;  %v953_v35 = vadd.f32 %v952_v8, %v5799_v16  ;;  %v5253_v16 = vld [vmem:[%s5372_s9 + $0x78] sm:$0xff] }
 0x15b   : > { %v1082_v12 = vrot.slane %v5253_v16, 1 }
 0x15c   : > { %v2058_v5 = vpop.f32.mrf.mxu0  ;;  %991 = vmatmul.bf16.gmra.mxu1 %v5251_v28  ;;  %1236 = vmatmul.bf16.gmra.mxu2 %v1081_v58  ;;  %v5959_v56 = vadd.f32 %v2055_v2, %v1713_v41  ;;  %v1904_v28 = vrot.slane %v1902_v22, 1  ;;  %v5968_v2 = vpop.f32.mrf.mxu3 }
 0x15e   : > { %v1908_v8 = vor.u32 %v1907_v20, %v1904_v28  ;;  %v5996_v28 = vld [vmem:[%s5372_s9 + $0x98] sm:$0xff] }
 0x15f   : > { %2097 = vmatmul.bf16.gmra.mxu0 %v1900_v39  ;;  %v1197_v18 = vpop.f32.mrf.mxu2  ;;  %v1083_v39 = vsel %vm1052_vm1, %v1080_v15, %v1082_v12 }
 0x160   : > { %v1286_v53 = vadd.f32 %v1197_v18, %v953_v35  ;;  %v1909_v49 = vsel %vm1766_vm2, %v1899_v62, %v1908_v8  ;;  %v1911_v62 = vshrl.u32 %v5943_v6, 16 }
 0x161   : > { %v954_v0 = vpop.f32.mrf.mxu1 }
 0x162   : > { %v1714_v52 = vadd.f32 %v5900_v21, %v1286_v53  ;;  %v955_v17 = vadd.f32 %v954_v0, %v5812_v57  ;;  %v5056_v57 = vld [vmem:[%s6854_s1 + $0x1c8] sm:$0xff]  ;;  %v1914_v53 = vshll.u32 %v5943_v6, 16  ;;  %v1516_v6 = vrot.slane %v5996_v28, 1 }
 0x163   : > { %1679 = vmatmul.bf16.gmra.mxu3 %v1515_v25  ;;  %v1913_v25 = vrot.slane %v1911_v62, 1 }
 0x164   : > { %v2060_v14 = vpop.f32.mrf.mxu0  ;;  %v5971_v55 = vadd.f32 %v2058_v5, %v1714_v52  ;;  %v5048_v5 = vld [vmem:[%s6854_s1 + $0x188] sm:$0xff]  ;;  %v5982_v18 = vpop.f32.mrf.mxu3  ;;  %3177 = vmatpush.bf16.msra.mxu3 %v5056_v57 }
 0x165   : > { %2744 = vmatpush.bf16.msra.mxu2 %v5048_v5 }
 0x167   : > { %v1199_v58 = vpop.f32.mrf.mxu2 }
 0x168   : > { %v1287_v41 = vadd.f32 %v1199_v58, %v955_v17  ;;  %v1916_v17 = vrot.slane %v1914_v53, 2 }
 0x169   : > { %v957_v21 = vpop.f32.mrf.mxu1 }
 0x16a   : > { %v1715_v35 = vadd.f32 %v5918_v9, %v1287_v41  ;;  %v5021_v9 = vld [vmem:[%s6854_s1 + $0x148] sm:$0xff]  ;;  %v958_v15 = vadd.f32 %v957_v21, %v5668_v13  ;;  %v5254_v21 = vld [vmem:[%s5372_s9 + $0x80] sm:$0xff] }
 0x16b   : > { %2316 = vmatpush.bf16.msra.mxu1 %v5021_v9  ;;  %v5064_v13 = vld [vmem:[%s6854_s1 + $0x208] sm:$0xff] }
 0x16c   : > { %v2063_v22 = vpop.f32.mrf.mxu0  ;;  %996 = vmatmul.bf16.gmra.mxu1 %v5252_v19  ;;  %1241 = vmatmul.bf16.gmra.mxu2 %v1083_v39  ;;  %v5990_v34 = vadd.f32 %v2060_v14, %v1715_v35  ;;  %v5999_v58 = vpop.f32.mrf.mxu3  ;;  %v1084_v39 = vrot.slane %v5254_v21, 1  ;;  %v1517_v35 = vsel %vm1052_vm1, %v1514_v46, %v1516_v6 }
 0x16d   : > { %3463 = vmatpush.bf16.msra.mxu0 %v5064_v13 }
 0x16f   : > { %2102 = vmatmul.bf16.gmra.mxu0 %v1909_v49  ;;  %v1202_v0 = vpop.f32.mrf.mxu2  ;;  %v1917_v49 = vor.u32 %v1916_v17, %v1913_v25  ;;  %v6021_v25 = vld [vmem:[%s5372_s9 + $0xa0] sm:$0xff] }
 0x170   : > { %v1288_v19 = vadd.f32 %v1202_v0, %v958_v15  ;;  %v1085_v15 = vsel %vm1052_vm1, %v1082_v12, %v1084_v39 }
 0x171   : > { %v959_v52 = vpop.f32.mrf.mxu1 }
 0x172   : > { %v1716_v20 = vadd.f32 %v5935_v26, %v1288_v19  ;;  %v960_v26 = vadd.f32 %v959_v52, %v5677_v29  ;;  %v1920_v19 = vshrl.u32 %v5965_v38, 16  ;;  %v1923_v52 = vshll.u32 %v5965_v38, 16 }
 0x173   : > { %1684 = vmatmul.bf16.gmra.mxu3 %v1517_v35  ;;  %v1518_v35 = vrot.slane %v6021_v25, 1 }
 0x174   : > { %v2065_v14 = vpop.f32.mrf.mxu0  ;;  %v6005_v41 = vadd.f32 %v2063_v22, %v1716_v20  ;;  %v1918_v22 = vsel %vm1766_vm2, %v1908_v8, %v1917_v49  ;;  %v6013_v0 = vpop.f32.mrf.mxu3  ;;  %v1925_v13 = vrot.slane %v1923_v52, 2 }
 0x175   : > { %v1519_v38 = vsel %vm1052_vm1, %v1516_v6, %v1518_v35 }
 0x177   : > { %v1204_v5 = vpop.f32.mrf.mxu2 }
 0x178   : > { %v1289_v57 = vadd.f32 %v1204_v5, %v960_v26 }
 0x179   : > { %v962_v9 = vpop.f32.mrf.mxu1 }
 0x17a   : > { %v1717_v62 = vadd.f32 %v5946_v24, %v1289_v57  ;;  %v963_v29 = vadd.f32 %v962_v9, %v5686_v44  ;;  %v5255_v44 = vld [vmem:[%s5372_s9 + $0x88] sm:$0xff] }
 0x17b   : > { %v1086_v5 = vrot.slane %v5255_v44, 1 }
 0x17c   : > { %v2068_v53 = vpop.f32.mrf.mxu0  ;;  %1001 = vmatmul.bf16.gmra.mxu1 %v5253_v16  ;;  %1246 = vmatmul.bf16.gmra.mxu2 %v1085_v15  ;;  %v6015_v46 = vadd.f32 %v2065_v14, %v1717_v62  ;;  %v1922_v16 = vrot.slane %v1920_v19, 1  ;;  %v6024_v14 = vpop.f32.mrf.mxu3 }
 0x17e   : > { %v1926_v9 = vor.u32 %v1925_v13, %v1922_v16 }
 0x17f   : > { %2107 = vmatmul.bf16.gmra.mxu0 %v1918_v22  ;;  %v1207_v12 = vpop.f32.mrf.mxu2  ;;  %v1087_v22 = vsel %vm1052_vm1, %v1084_v39, %v1086_v5  ;;  %v1358_v39 = vld [vmem:[%s5372_s9 + $0xac] sm:$0x1] }
 0x180   : > { %v1290_v20 = vadd.f32 %v1207_v12, %v963_v29  ;;  %v1929_v12 = vshrl.u32 %v5996_v28, 16 }
 0x181   : > { %v964_v24 = vpop.f32.mrf.mxu1 }
 0x182   : > { %v1718_v8 = vadd.f32 %v5957_v61, %v1290_v20  ;;  %v965_v57 = vadd.f32 %v964_v24, %v5700_v37  ;;  %v1932_v20 = vshll.u32 %v5996_v28, 16  ;;  %v6043_v24 = vld [vmem:[%s5372_s9 + $0xa8] sm:$0xf]  ;;  %v5047_v28 = vld [vmem:[%s6854_s1 + $0x180] sm:$0xff] }
 0x183   : > { %1689 = vmatmul.bf16.gmra.mxu3 %v1519_v38  ;;  %v1931_v38 = vrot.slane %v1929_v12, 1  ;;  %2745 = vmatpush.bf16.msra.mxu2 %v5047_v28 }
 0x184   : > { %v2070_v17 = vpop.f32.mrf.mxu0  ;;  %v6027_v26 = vadd.f32 %v2068_v53, %v1718_v8  ;;  %v1927_v53 = vsel %vm1766_vm2, %v1917_v49, %v1926_v9  ;;  %v6035_v52 = vpop.f32.mrf.mxu3  ;;  %v1458_v8 = vunpack.c.l.b16 %v6043_v24  ;;  %v1459_v49 = vunpack.c.l.b16 %v1358_v39 }
 0x187   : > { %v1209_v15 = vpop.f32.mrf.mxu2 }
 0x188   : > { %v1291_v61 = vadd.f32 %v1209_v15, %v965_v57  ;;  %v1934_v57 = vrot.slane %v1932_v20, 2 }
 0x189   : > { %v967_v62 = vpop.f32.mrf.mxu1 }
 0x18a   : > { %v1719_v29 = vadd.f32 %v5968_v2, %v1291_v61  ;;  %v968_v37 = vadd.f32 %v967_v62, %v5717_v63  ;;  %v5055_v61 = vld [vmem:[%s6854_s1 + $0x1c0] sm:$0xff]  ;;  %v1935_v20 = vor.u32 %v1934_v57, %v1931_v38 }
 0x18b   : > { %3178 = vmatpush.bf16.msra.mxu3 %v5055_v61 }
 0x18c   : > { %v2073_v19 = vpop.f32.mrf.mxu0  ;;  %1006 = vmatmul.bf16.gmra.mxu1 %v5254_v21  ;;  %1251 = vmatmul.bf16.gmra.mxu2 %v1087_v22  ;;  %v6037_v6 = vadd.f32 %v2070_v17, %v1719_v29  ;;  %v1480_v17 = vpack.c.b16 %v1459_v49, %v1458_v8  ;;  %v6050_v15 = vpop.f32.mrf.mxu3  ;;  %v5020_v22 = vld [vmem:[%s6854_s1 + $0x140] sm:$0xff]  ;;  %v5256_v29 = vld [vmem:[%s5372_s9 + $0x90] sm:$0xff] }
 0x18d   : > { %2317 = vmatpush.bf16.msra.mxu1 %v5020_v22 }
 0x18e   : > { %v1520_v62 = vrot.slane %v1480_v17, 1 }
 0x18f   : > { %2112 = vmatmul.bf16.gmra.mxu0 %v1927_v53  ;;  %v1212_v2 = vpop.f32.mrf.mxu2  ;;  %v1088_v53 = vrot.slane %v5256_v29, 1 }
 0x190   : > { %v1292_v16 = vadd.f32 %v1212_v2, %v968_v37  ;;  %v1521_v37 = vsel %vm1052_vm1, %v1518_v35, %v1520_v62 }
 0x191   : > { %v969_v21 = vpop.f32.mrf.mxu1 }
 0x192   : > { %v1720_v13 = vadd.f32 %v5982_v18, %v1292_v16  ;;  %v970_v12 = vadd.f32 %v969_v21, %v5731_v11  ;;  %v1089_v16 = vsel %vm1052_vm1, %v1086_v5, %v1088_v53  ;;  %v5063_v11 = vld [vmem:[%s6854_s1 + $0x200] sm:$0xff]  ;;  %v1941_v21 = vshll.u32 %v6021_v25, 16 }
 0x193   : > { %1694 = vmatmul.bf16.gmra.mxu3 %v1521_v37  ;;  %3464 = vmatpush.bf16.msra.mxu0 %v5063_v11 }
 0x194   : > { %v2075_v63 = vpop.f32.mrf.mxu0  ;;  %v6061_v18 = vadd.f32 %v2073_v19, %v1720_v13  ;;  %v1936_v19 = vsel %vm1766_vm2, %v1926_v9, %v1935_v20  ;;  %v1943_v37 = vrot.slane %v1941_v21, 2 }
 0x196   : > { %v6069_v13 = vpop.f32.mrf.mxu3 }
 0x197   : > { %v1214_v39 = vpop.f32.mrf.mxu2 }
 0x198   : > { %v1293_v2 = vadd.f32 %v1214_v39, %v970_v12 }
 0x199   : > { %v972_v49 = vpop.f32.mrf.mxu1 }
 0x19a   : > { %v1721_v17 = vadd.f32 %v5999_v58, %v1293_v2  ;;  %v973_v5 = vadd.f32 %v972_v49, %v5742_v31  ;;  %v1938_v58 = vshrl.u32 %v6021_v25, 16  ;;  %v5257_v31 = vld [vmem:[%s5372_s9 + $0x98] sm:$0xff] }
 0x19b   : > { %v1090_v2 = vrot.slane %v5257_v31, 1 }
 0x19c   : > { %v2078_v28 = vpop.f32.mrf.mxu0  ;;  %1011 = vmatmul.bf16.gmra.mxu1 %v5255_v44  ;;  %1256 = vmatmul.bf16.gmra.mxu2 %v1089_v16  ;;  %v6074_v35 = vadd.f32 %v2075_v63, %v1721_v17  ;;  %v1940_v22 = vrot.slane %v1938_v58, 1  ;;  %v1745_v63 = vld [vmem:[%s5372_s9 + $0xac] sm:$0x3] }
 0x19d   : > { %v1764_v16 = vunpack.c.l.b16 %v1745_v63  ;;  %v1091_v11 = vsel %vm1052_vm1, %v1088_v53, %v1090_v2 }
 0x19e   : > { %v6080_v12 = vpop.f32.mrf.mxu3  ;;  %v1944_v49 = vor.u32 %v1943_v37, %v1940_v22 }
 0x19f   : > { %2117 = vmatmul.bf16.gmra.mxu0 %v1936_v19  ;;  %v1217_v9 = vpop.f32.mrf.mxu2  ;;  %v6092_v21 = vpack.c.b16 %v1764_v16, %v1458_v8 }
 0x1a0   : > { %v1294_v38 = vadd.f32 %v1217_v9, %v973_v5 }
 0x1a1   : > { %v974_v44 = vpop.f32.mrf.mxu1  ;;  %6878 = vst [vmem:[#allocation15_spill] sm:$0xff] %v6092_v21 }
 0x1a2   : > { %v1722_v57 = vadd.f32 %v6013_v0, %v1294_v38  ;;  %v975_v25 = vadd.f32 %v974_v44, %v5753_v47  ;;  %v2464_v47 = vld [vmem:[%s5372_s9 + $0x10] sm:$0xc]  ;;  %v6098_v38 = vld [vmem:[%s5372_s9 + $0x14] sm:$0xf] }
 0x1a3   : > { %1699 = vmatmul.bf16.gmra.mxu3 %v1520_v62  ;;  %v2565_v62 = vunpack.c.l.b16 %v2464_v47  ;;  %v6860_v44 = vunpack.c.l.b16 %v6098_v38 }
 0x1a4   : > { %v2080_v61 = vpop.f32.mrf.mxu0  ;;  %v6083_v39 = vadd.f32 %v2078_v28, %v1722_v57  ;;  %v1945_v28 = vsel %vm1766_vm2, %v1935_v20, %v1944_v49  ;;  %v1947_v20 = vshrl.u32 %v6092_v21, 16  ;;  %v1950_v57 = vshll.u32 %v6092_v21, 16 }
 0x1a5   : > { %v6108_v24 = vpack.c.b16 %v6860_v44, %v2565_v62 }
 0x1a6   : > { %6877 = vst [vmem:[#allocation14_spill] sm:$0xff] %v6083_v39  ;;  %v6094_v9 = vpop.f32.mrf.mxu3  ;;  %v1952_v47 = vrot.slane %v1950_v57, 2  ;;  %v1092_v39 = vrot.slane %v5514_v30, 1 }
 0x1a7   : > { %v1219_v17 = vpop.f32.mrf.mxu2  ;;  %v2915_v37 = vshrl.u32 %v6108_v24, 16 }
 0x1a8   : > { %v1295_v19 = vadd.f32 %v1219_v17, %v975_v25  ;;  %v1093_v57 = vsel %vm1052_vm1, %v1090_v2, %v1092_v39 }
 0x1a9   : > { %v977_v0 = vpop.f32.mrf.mxu1  ;;  %v2917_v17 = vrot.slane %v2915_v37, 2 }
 0x1aa   : > { %v1723_v5 = vadd.f32 %v6024_v14, %v1295_v19  ;;  %v6104_v14 = vld [vmem:[%s5372_s9 + $0x18] sm:$0xff]  ;;  %v978_v8 = vadd.f32 %v977_v0, %v5762_v51 }
 0x1ab   : > { %v2926_v63 = vshll.u32 %v6104_v14, 16 }
 0x1ac   : > { %v2083_v58 = vpop.f32.mrf.mxu0  ;;  %1016 = vmatmul.bf16.gmra.mxu1 %v5256_v29  ;;  %1261 = vmatmul.bf16.gmra.mxu2 %v1091_v11  ;;  %v6101_v53 = vadd.f32 %v2080_v61, %v1723_v5  ;;  %v2918_v29 = vshll.u32 %v6108_v24, 16  ;;  %v2923_v61 = vshrl.u32 %v6104_v14, 16 }
 0x1ad   : > { %v2928_v5 = vrot.slane %v2926_v63, 3 }
 0x1ae   : > { %6879 = vst [vmem:[#allocation16_spill] sm:$0xff] %v6101_v53  ;;  %v2920_v19 = vrot.slane %v2918_v29, 3  ;;  %v2925_v11 = vrot.slane %v2923_v61, 2  ;;  %v6118_v62 = vpop.f32.mrf.mxu3 }
 0x1af   : > { %2122 = vmatmul.bf16.gmra.mxu0 %v1945_v28  ;;  %v1222_v22 = vpop.f32.mrf.mxu2  ;;  %v1949_v28 = vrot.slane %v1947_v20, 1 }
 0x1b0   : > { %v1296_v25 = vadd.f32 %v1222_v22, %v978_v8  ;;  %v2921_v44 = vor.u32 %v2920_v19, %v2917_v17  ;;  %v2929_v21 = vor.u32 %v2928_v5, %v2925_v11 }
 0x1b1   : > { %v979_v16 = vpop.f32.mrf.mxu1  ;;  %v1953_v37 = vor.u32 %v1952_v47, %v1949_v28 }
 0x1b2   : > { %v1724_v51 = vadd.f32 %v6035_v52, %v1296_v25  ;;  %v2930_v8 = vsel %vm2913_vm3, %v2921_v44, %v2929_v21  ;;  %v980_v22 = vadd.f32 %v979_v16, %v5782_v33  ;;  %v6133_v33 = vld [vmem:[%s5372_s9 + $0x20] sm:$0xff] }
 0x1b3   : > { %3179 = vmatmul.bf16.vlgmr.msra.gmra.mxu3 %v2930_v8  ;;  %v2932_v17 = vshrl.u32 %v6133_v33, 16  ;;  %v2935_v2 = vshll.u32 %v6133_v33, 16 }
 0x1b4   : > { %v2085_v0 = vpop.f32.mrf.mxu0  ;;  %v6120_v53 = vadd.f32 %v2083_v58, %v1724_v51  ;;  %v1954_v58 = vsel %vm1766_vm2, %v1944_v49, %v1953_v37 }
 0x1b5   : > { %v2934_v49 = vrot.slane %v2932_v17, 2  ;;  %v2937_v11 = vrot.slane %v2935_v2, 3  ;;  %v6880_v2 = vunpack.c.l.b16 %v5594_v36 }
 0x1b6   : > { %v6128_v25 = vpop.f32.mrf.mxu3 }
 0x1b7   : > { %v1224_v29 = vpop.f32.mrf.mxu2 }
 0x1b8   : > { %v1297_v52 = vadd.f32 %v1224_v29, %v980_v22  ;;  %v848_v29 = vpack.c.b16 %v5498_v23, %v5498_v23 }
 0x1b9   : > { %v982_v20 = vpop.f32.mrf.mxu1 }
 0x1ba   : > { %v1725_v61 = vadd.f32 %v6050_v15, %v1297_v52  ;;  %v983_v44 = vadd.f32 %v982_v20, %v5796_v3  ;;  %v2178_v52 = vld [vmem:[%s5372_s9 + $0x8] sm:$0xc] }
 0x1bc   : > { %v2088_v63 = vpop.f32.mrf.mxu0  ;;  %1021 = vmatmul.bf16.gmra.mxu1 %v5257_v31  ;;  %1266 = vmatmul.bf16.gmra.mxu2 %v1093_v57  ;;  %v6130_v30 = vadd.f32 %v2085_v0, %v1725_v61  ;;  %v2938_v0 = vor.u32 %v2937_v11, %v2934_v49 }
 0x1be   : > { %v6140_v51 = vpop.f32.mrf.mxu3  ;;  %v2939_v28 = vsel %vm2913_vm3, %v2929_v21, %v2938_v0  ;;  %v3325_v21 = vld [vmem:[%s5372_s9 + $0x10] sm:$0x8] }
 0x1bf   : > { %2127 = vmatmul.bf16.gmra.mxu0 %v1954_v58  ;;  %v1227_v16 = vpop.f32.mrf.mxu2  ;;  %v6159_v58 = vld [vmem:[%s5372_s9 + $0x28] sm:$0xff] }
 0x1c0   : > { %v1298_v15 = vadd.f32 %v1227_v16, %v983_v44  ;;  %v3344_v44 = vunpack.c.l.b16 %v3325_v21 }
 0x1c1   : > { %v984_v19 = vpop.f32.mrf.mxu1 }
 0x1c2   : > { %v1726_v31 = vadd.f32 %v6069_v13, %v1298_v15  ;;  %v985_v47 = vadd.f32 %v984_v19, %v5807_v59  ;;  %v2197_v59 = vunpack.c.l.b16 %v2178_v52 }
 0x1c3   : > { %3184 = vmatmul.bf16.gmra.mxu3 %v2939_v28 }
 0x1c4   : > { %v2090_v5 = vpop.f32.mrf.mxu0  ;;  %v6142_v3 = vadd.f32 %v2088_v63, %v1726_v31  ;;  %v6881_v31 = vunpack.c.l.b16 %v6098_v38 }
 0x1c6   : > { %v6152_v61 = vpop.f32.mrf.mxu3 }
 0x1c7   : > { %v1229_v8 = vpop.f32.mrf.mxu2 }
 0x1c8   : > { %v1299_v22 = vadd.f32 %v1229_v8, %v985_v47  ;;  %v5301_v47 = vmov 0   ;;  %v3693_v8 = vld [vmem:[%s6165_s16] sm:$0xff] }
 0x1c9   : > { %v987_v13 = vpop.f32.mrf.mxu1  ;;  %5247 = vset.pattern.permute.xlu0 %v5301_v47  ;;  %5248 = vset.pattern.permute.xlu1 %v5301_v47 }
 0x1ca   : > { %v1727_v20 = vadd.f32 %v6080_v12, %v1299_v22  ;;  %v988_v23 = vadd.f32 %v987_v13, %v5675_v27  ;;  %v2941_v12 = vshrl.u32 %v6159_v58, 16  ;;  %3736 = vperm.xlu0 %5247, %v3693_v8   ;;  %5249 = vset.pattern.permute.xlu2 %v5301_v47  ;;  %v5258_v13 = vld [vmem:[%s5372_s9 + $0x10] sm:$0xff] }
 0x1cb   : > { %v2201_v52 = vrot.slane %v5258_v13, 2  ;;  %v3695_v13 = vld [vmem:[%s6165_s16 + $0x10] sm:$0xff] }
 0x1cc   : > { %v2093_v57 = vpop.f32.mrf.mxu0  ;;  %1026 = vmatmul.bf16.gmra.mxu1 %v848_v29  ;;  %1271 = vmatmul.bf16.gmra.mxu2 %v1092_v39  ;;  %v6156_v63 = vadd.f32 %v2090_v5, %v1727_v20  ;;  %v2944_v39 = vshll.u32 %v6159_v58, 16  ;;  %v2943_v19 = vrot.slane %v2941_v12, 2  ;;  %v3345_v5 = vpack.c.b16 %v6881_v31, %v3344_v44 }
 0x1cd   : > { %v2629_v20 = vrot.slane %v6104_v14, 2  ;;  %3746 = vperm.xlu1 %5248, %v3695_v13  }
 0x1ce   : > { %v2946_v27 = vrot.slane %v2944_v39, 3  ;;  %v6174_v28 = vpop.f32.mrf.mxu3 }
 0x1cf   : > { %2132 = vmatmul.bf16.gmra.mxu0 %v1953_v37  ;;  %v1232_v16 = vpop.f32.mrf.mxu2  ;;  %v2198_v37 = vpack.c.b16 %v6880_v2, %v2197_v59  ;;  %v3347_v59 = vrot.slane %v3345_v5, 3  ;;  %v3694_v2 = vld [vmem:[%s6165_s16 + $0x8] sm:$0xff] }
 0x1d0   : > { %v1300_v17 = vadd.f32 %v1232_v16, %v988_v23  ;;  %v2947_v22 = vor.u32 %v2946_v27, %v2943_v19  ;;  %v3348_v23 = vrot.slane %v6104_v14, 3 }
 0x1d1   : > { %v989_v15 = vpop.f32.mrf.mxu1  ;;  %v2200_v36 = vrot.slane %v2198_v37, 2  ;;  %v6195_v37 = vld [vmem:[%s5372_s9 + $0x30] sm:$0xff] }
 0x1d2   : > { %v1728_v49 = vadd.f32 %v6094_v9, %v1300_v17  ;;  %v2628_v9 = vrot.slane %v6108_v24, 2  ;;  %v2948_v38 = vsel %vm2913_vm3, %v2938_v0, %v2947_v22  ;;  %v990_v21 = vadd.f32 %v989_v15, %v5684_v43  ;;  %3741 = vperm.xlu0 %5247, %v3694_v2  }
 0x1d3   : > { %3189 = vmatmul.bf16.gmra.mxu3 %v2948_v38  ;;  %v2202_v12 = vsel %vm2199_vm4, %v2200_v36, %v2201_v52  ;;  %v3349_v17 = vsel %vm3346_vm5, %v3347_v59, %v3348_v23  ;;  %v2953_v27 = vshll.u32 %v6195_v37, 16  ;;  %v2631_v59 = vrot.slane %v6133_v33, 2 }
 0x1d4   : > { %v2095_v11 = vpop.f32.mrf.mxu0  ;;  %v6177_v29 = vadd.f32 %v2093_v57, %v1728_v49  ;;  %v2630_v24 = vsel %vm2199_vm4, %v2628_v9, %v2629_v20 }
 0x1d5   : > { %v2955_v47 = vrot.slane %v2953_v27, 3 }
 0x1d6   : > { %v6189_v43 = vpop.f32.mrf.mxu3 }
 0x1d7   : > { %v1234_v44 = vpop.f32.mrf.mxu2 }
 0x1d8   : > { %v1301_v57 = vadd.f32 %v1234_v44, %v990_v21 }
 0x1d9   : > { %v992_v16 = vpop.f32.mrf.mxu1 }
 0x1da   : > { %v1729_v39 = vadd.f32 %v6118_v62, %v1301_v57  ;;  %v993_v15 = vadd.f32 %v992_v16, %v5695_v48  ;;  %v2950_v62 = vshrl.u32 %v6195_v37, 16  ;;  %v5259_v48 = vld [vmem:[%s5372_s9 + $0x18] sm:$0xff]  ;;  %v3350_v16 = vrot.slane %v6133_v33, 3 }
 0x1db   : > { %v2203_v21 = vrot.slane %v5259_v48, 2  ;;  %v6221_v33 = vld [vmem:[%s5372_s9 + $0x38] sm:$0xff]  ;;  %v5260_v48 = vld [vmem:[%s5372_s9 + $0x20] sm:$0xff] }
 0x1dc   : > { %v2098_v0 = vpop.f32.mrf.mxu0  ;;  %2318 = vmatmul.bf16.vlgmr.msra.gmra.mxu1 %v2202_v12  ;;  %2746 = vmatmul.bf16.vlgmr.msra.gmra.mxu2 %v2630_v24  ;;  %v6192_v14 = vadd.f32 %v2095_v11, %v1729_v39  ;;  %v2952_v5 = vrot.slane %v2950_v62, 2  ;;  %v2962_v62 = vshll.u32 %v6221_v33, 16 }
 0x1dd   : > { %v2204_v39 = vsel %vm2199_vm4, %v2201_v52, %v2203_v21 }
 0x1de   : > { %v6201_v11 = vpop.f32.mrf.mxu3  ;;  %v2956_v9 = vor.u32 %v2955_v47, %v2952_v5 }
 0x1df   : > { %3465 = vmatmul.bf16.vlgmr.msra.gmra.mxu0 %v3349_v17  ;;  %v1237_v19 = vpop.f32.mrf.mxu2 }
 0x1e0   : > { %v1302_v49 = vadd.f32 %v1237_v19, %v993_v15  ;;  %v2957_v44 = vsel %vm2913_vm3, %v2947_v22, %v2956_v9  ;;  %v3351_v15 = vsel %vm3346_vm5, %v3348_v23, %v3350_v16  ;;  %v3696_v22 = vld [vmem:[%s6165_s16 + $0x18] sm:$0xff] }
 0x1e1   : > { %v994_v31 = vpop.f32.mrf.mxu1  ;;  %3751 = vperm.xlu1 %5248, %v3696_v22  }
 0x1e2   : > { %v1730_v8 = vadd.f32 %v6128_v25, %v1302_v49  ;;  %v995_v57 = vadd.f32 %v994_v31, %v5715_v7  ;;  %v2964_v31 = vrot.slane %v2962_v62, 3 }
 0x1e3   : > { %3194 = vmatmul.bf16.gmra.mxu3 %v2957_v44  ;;  %v2205_v44 = vrot.slane %v5260_v48, 2  ;;  %v3699_v48 = vld [vmem:[%s6165_s16 + $0x30] sm:$0xff] }
 0x1e4   : > { %v2100_v36 = vpop.f32.mrf.mxu0  ;;  %v6204_v38 = vadd.f32 %v2098_v0, %v1730_v8  ;;  %v2632_v0 = vsel %vm2199_vm4, %v2629_v20, %v2631_v59  ;;  %3766 = vperm.xlu0 %5247, %v3699_v48  }
 0x1e6   : > { %v6215_v19 = vpop.f32.mrf.mxu3 }
 0x1e7   : > { %v1239_v25 = vpop.f32.mrf.mxu2 }
 0x1e8   : > { %v1303_v12 = vadd.f32 %v1239_v25, %v995_v57  ;;  %v6882_v25 = vld [vmem:[#allocation6_spill] sm:$0xff] }
 0x1e9   : > { %v997_v24 = vpop.f32.mrf.mxu1 }
 0x1ea   : > { %v1731_v17 = vadd.f32 %v6140_v51, %v1303_v12  ;;  %v998_v52 = vadd.f32 %v997_v24, %v5729_v10  ;;  %v2959_v51 = vshrl.u32 %v6221_v33, 16  ;;  %v2633_v10 = vrot.slane %v6159_v58, 2 }
 0x1eb   : > { %v3352_v24 = vrot.slane %v6159_v58, 3  ;;  %v6245_v58 = vld [vmem:[%s5372_s9 + $0x40] sm:$0xff] }
 0x1ec   : > { %v2103_v2 = vpop.f32.mrf.mxu0  ;;  %2323 = vmatmul.bf16.gmra.mxu1 %v2204_v39  ;;  %2751 = vmatmul.bf16.gmra.mxu2 %v2632_v0  ;;  %v6218_v7 = vadd.f32 %v2100_v36, %v1731_v17  ;;  %v2961_v49 = vrot.slane %v2959_v51, 2  ;;  %v2206_v17 = vsel %vm2199_vm4, %v2203_v21, %v2205_v44  ;;  %v6883_v51 = vld [vmem:[#allocation8_spill] sm:$0xff] }
 0x1ee   : > { %v6227_v8 = vpop.f32.mrf.mxu3  ;;  %v2965_v36 = vor.u32 %v2964_v31, %v2961_v49 }
 0x1ef   : > { %3470 = vmatmul.bf16.gmra.mxu0 %v3351_v15  ;;  %v1242_v20 = vpop.f32.mrf.mxu2 }
 0x1f0   : > { %v1304_v23 = vadd.f32 %v1242_v20, %v998_v52  ;;  %v2966_v57 = vsel %vm2913_vm3, %v2956_v9, %v2965_v36  ;;  %v3353_v52 = vsel %vm3346_vm5, %v3350_v16, %v3352_v24 }
 0x1f1   : > { %v999_v27 = vpop.f32.mrf.mxu1 }
 0x1f2   : > { %v1732_v5 = vadd.f32 %v6152_v61, %v1304_v23  ;;  %v1000_v12 = vadd.f32 %v999_v27, %v6882_v25 }
 0x1f3   : > { %3199 = vmatmul.bf16.gmra.mxu3 %v2966_v57 }
 0x1f4   : > { %v2105_v47 = vpop.f32.mrf.mxu0  ;;  %v6229_v13 = vadd.f32 %v2103_v2, %v1732_v5  ;;  %v2634_v2 = vsel %vm2199_vm4, %v2631_v59, %v2633_v10  ;;  %v2968_v59 = vshrl.u32 %v6245_v58, 16 }
 0x1f6   : > { %v6240_v20 = vpop.f32.mrf.mxu3  ;;  %v2970_v27 = vrot.slane %v2968_v59, 2 }
 0x1f7   : > { %v1244_v39 = vpop.f32.mrf.mxu2 }
 0x1f8   : > { %v1305_v61 = vadd.f32 %v1244_v39, %v1000_v12  ;;  %v5261_v12 = vld [vmem:[%s5372_s9 + $0x28] sm:$0xff] }
 0x1f9   : > { %v1002_v0 = vpop.f32.mrf.mxu1  ;;  %v2207_v39 = vrot.slane %v5261_v12, 2 }
 0x1fa   : > { %v1733_v15 = vadd.f32 %v6174_v28, %v1305_v61  ;;  %v1003_v21 = vadd.f32 %v1002_v0, %v6883_v51  ;;  %v2971_v28 = vshll.u32 %v6245_v58, 16  ;;  %v2635_v61 = vrot.slane %v6195_v37, 2 }
 0x1fc   : > { %v2108_v22 = vpop.f32.mrf.mxu0  ;;  %2328 = vmatmul.bf16.gmra.mxu1 %v2206_v17  ;;  %2756 = vmatmul.bf16.gmra.mxu2 %v2634_v2  ;;  %v6242_v9 = vadd.f32 %v2105_v47, %v1733_v15  ;;  %v2973_v49 = vrot.slane %v2971_v28, 3  ;;  %v6884_v17 = vld [vmem:[#allocation9_spill] sm:$0xff] }
 0x1fe   : > { %v6251_v47 = vpop.f32.mrf.mxu3  ;;  %v2974_v57 = vor.u32 %v2973_v49, %v2970_v27 }
 0x1ff   : > { %3475 = vmatmul.bf16.gmra.mxu0 %v3353_v52  ;;  %v1247_v62 = vpop.f32.mrf.mxu2 }
 0x200   : > { %v1306_v23 = vadd.f32 %v1247_v62, %v1003_v21  ;;  %v2975_v0 = vsel %vm2913_vm3, %v2965_v36, %v2974_v57  ;;  %v2636_v21 = vsel %vm2199_vm4, %v2633_v10, %v2635_v61  ;;  %v3697_v36 = vld [vmem:[%s6165_s16 + $0x20] sm:$0xff] }
 0x201   : > { %v1004_v16 = vpop.f32.mrf.mxu1  ;;  %3756 = vperm.xlu2 %5249, %v3697_v36   ;;  %v6885_v10 = vld [vmem:[#allocation10_spill] sm:$0xff]  ;;  %v6886_v36 = vld [vmem:[#allocation11_spill] sm:$0xff] }
 0x202   : > { %v1734_v31 = vadd.f32 %v6189_v43, %v1306_v23  ;;  %v1005_v2 = vadd.f32 %v1004_v16, %v6884_v17  ;;  %v3354_v43 = vrot.slane %v6195_v37, 3  ;;  %v3700_v16 = vld [vmem:[%s6165_s16 + $0x38] sm:$0xff] }
 0x203   : > { %3204 = vmatmul.bf16.gmra.mxu3 %v2975_v0  ;;  %3771 = vperm.xlu1 %5248, %v3700_v16  }
 0x204   : > { %v2110_v5 = vpop.f32.mrf.mxu0  ;;  %v6254_v25 = vadd.f32 %v2108_v22, %v1734_v31  ;;  %v2208_v22 = vsel %vm2199_vm4, %v2205_v44, %v2207_v39  ;;  %v3355_v28 = vsel %vm3346_vm5, %v3352_v24, %v3354_v43  ;;  %v6272_v44 = vld [vmem:[%s5372_s9 + $0x48] sm:$0xff] }
 0x205   : > { %v2977_v24 = vshrl.u32 %v6272_v44, 16  ;;  %v2980_v49 = vshll.u32 %v6272_v44, 16 }
 0x206   : > { %v6265_v23 = vpop.f32.mrf.mxu3 }
 0x207   : > { %v1249_v15 = vpop.f32.mrf.mxu2  ;;  %v2979_v12 = vrot.slane %v2977_v24, 2  ;;  %v2982_v0 = vrot.slane %v2980_v49, 3 }
 0x208   : > { %v1307_v52 = vadd.f32 %v1249_v15, %v1005_v2  ;;  %v3698_v15 = vld [vmem:[%s6165_s16 + $0x28] sm:$0xff] }
 0x209   : > { %v1007_v51 = vpop.f32.mrf.mxu1  ;;  %3761 = vperm.xlu2 %5249, %v3698_v15  }
 0x20a   : > { %v1735_v62 = vadd.f32 %v6201_v11, %v1307_v52  ;;  %v1008_v11 = vadd.f32 %v1007_v51, %v6885_v10  ;;  %v2983_v52 = vor.u32 %v2982_v0, %v2979_v12  ;;  %v5262_v51 = vld [vmem:[%s5372_s9 + $0x30] sm:$0xff]  ;;  %v3356_v10 = vrot.slane %v6221_v33, 3 }
 0x20c   : > { %v2113_v59 = vpop.f32.mrf.mxu0  ;;  %2333 = vmatmul.bf16.gmra.mxu1 %v2208_v22  ;;  %2761 = vmatmul.bf16.gmra.mxu2 %v2636_v21  ;;  %v6269_v37 = vadd.f32 %v2110_v5, %v1735_v62  ;;  %v2209_v21 = vrot.slane %v5262_v51, 2  ;;  %v2637_v62 = vrot.slane %v6221_v33, 2  ;;  %v3357_v12 = vsel %vm3346_vm5, %v3354_v43, %v3356_v10 }
 0x20e   : > { %v6278_v5 = vpop.f32.mrf.mxu3  ;;  %v2210_v24 = vsel %vm2199_vm4, %v2207_v39, %v2209_v21  ;;  %v6887_v39 = vld [vmem:[#allocation12_spill] sm:$0xff] }
 0x20f   : > { %3480 = vmatmul.bf16.gmra.mxu0 %v3355_v28  ;;  %v1252_v27 = vpop.f32.mrf.mxu2  ;;  %v2984_v28 = vsel %vm2913_vm3, %v2974_v57, %v2983_v52  ;;  %v3702_v57 = vld [vmem:[%s6165_s16 + $0x48] sm:$0xff] }
 0x210   : > { %v1308_v31 = vadd.f32 %v1252_v27, %v1008_v11  ;;  %3781 = vperm.xlu0 %5247, %v3702_v57  }
 0x211   : > { %v1009_v48 = vpop.f32.mrf.mxu1 }
 0x212   : > { %v1736_v17 = vadd.f32 %v6215_v19, %v1308_v31  ;;  %v1010_v16 = vadd.f32 %v1009_v48, %v6886_v36  ;;  %v6298_v48 = vld [vmem:[%s5372_s9 + $0x50] sm:$0xff] }
 0x213   : > { %3209 = vmatmul.bf16.gmra.mxu3 %v2984_v28  ;;  %v2989_v43 = vshll.u32 %v6298_v48, 16 }
 0x214   : > { %v2115_v2 = vpop.f32.mrf.mxu0  ;;  %v6281_v22 = vadd.f32 %v2113_v59, %v1736_v17  ;;  %v2638_v59 = vsel %vm2199_vm4, %v2635_v61, %v2637_v62 }
 0x215   : > { %v2991_v36 = vrot.slane %v2989_v43, 3 }
 0x216   : > { %v6292_v0 = vpop.f32.mrf.mxu3 }
 0x217   : > { %v1254_v19 = vpop.f32.mrf.mxu2 }
 0x218   : > { %v1309_v11 = vadd.f32 %v1254_v19, %v1010_v16 }
 0x219   : > { %v1012_v27 = vpop.f32.mrf.mxu1 }
 0x21a   : > { %v1737_v49 = vadd.f32 %v6227_v8, %v1309_v11  ;;  %v1013_v61 = vadd.f32 %v1012_v27, %v6887_v39  ;;  %v2986_v8 = vshrl.u32 %v6298_v48, 16  ;;  %v3703_v11 = vld [vmem:[%s6165_s16 + $0x50] sm:$0xff]  ;;  %v5263_v27 = vld [vmem:[%s5372_s9 + $0x38] sm:$0xff] }
 0x21b   : > { %3786 = vperm.xlu1 %5248, %v3703_v11   ;;  %v6889_v39 = vld [vmem:[#allocation13_spill] sm:$0xff] }
 0x21c   : > { %v2118_v31 = vpop.f32.mrf.mxu0  ;;  %2338 = vmatmul.bf16.gmra.mxu1 %v2210_v24  ;;  %2766 = vmatmul.bf16.gmra.mxu2 %v2638_v59  ;;  %v6295_v33 = vadd.f32 %v2115_v2, %v1737_v49  ;;  %v2988_v28 = vrot.slane %v2986_v8, 2  ;;  %v2211_v49 = vrot.slane %v5263_v27, 2 }
 0x21e   : > { %v6304_v2 = vpop.f32.mrf.mxu3  ;;  %v2992_v24 = vor.u32 %v2991_v36, %v2988_v28 }
 0x21f   : > { %3485 = vmatmul.bf16.gmra.mxu0 %v3357_v12  ;;  %v1257_v17 = vpop.f32.mrf.mxu2  ;;  %v2639_v12 = vrot.slane %v6245_v58, 2 }
 0x220   : > { %v1310_v15 = vadd.f32 %v1257_v17, %v1013_v61  ;;  %v2993_v57 = vsel %vm2913_vm3, %v2983_v52, %v2992_v24  ;;  %v3358_v17 = vrot.slane %v6245_v58, 3  ;;  %v3701_v52 = vld [vmem:[%s6165_s16 + $0x40] sm:$0xff] }
 0x221   : > { %v1014_v51 = vpop.f32.mrf.mxu1  ;;  %3776 = vperm.xlu2 %5249, %v3701_v52   ;;  %v5264_v52 = vld [vmem:[%s5372_s9 + $0x40] sm:$0xff] }
 0x222   : > { %v1738_v16 = vadd.f32 %v6240_v20, %v1310_v15  ;;  %v1015_v61 = vadd.f32 %v1014_v51, %v6889_v39  ;;  %v2212_v15 = vsel %vm2199_vm4, %v2209_v21, %v2211_v49  ;;  %v6324_v51 = vld [vmem:[%s5372_s9 + $0x58] sm:$0xff]  ;;  %v6891_v21 = vld [vmem:[#allocation2_spill] sm:$0xff] }
 0x223   : > { %3214 = vmatmul.bf16.gmra.mxu3 %v2993_v57 }
 0x224   : > { %v2120_v19 = vpop.f32.mrf.mxu0  ;;  %v6307_v59 = vadd.f32 %v2118_v31, %v1738_v16  ;;  %v2640_v31 = vsel %vm2199_vm4, %v2637_v62, %v2639_v12  ;;  %v3359_v16 = vsel %vm3346_vm5, %v3356_v10, %v3358_v17  ;;  %v2998_v10 = vshll.u32 %v6324_v51, 16 }
 0x226   : > { %6888 = vst [vmem:[#allocation6_spill] sm:$0xff] %v6307_v59  ;;  %v6318_v11 = vpop.f32.mrf.mxu3 }
 0x227   : > { %v1259_v20 = vpop.f32.mrf.mxu2 }
 0x228   : > { %v1311_v8 = vadd.f32 %v1259_v20, %v1015_v61  ;;  %v3000_v20 = vrot.slane %v2998_v10, 3 }
 0x229   : > { %v1017_v43 = vpop.f32.mrf.mxu1 }
 0x22a   : > { %v1739_v28 = vadd.f32 %v6251_v47, %v1311_v8  ;;  %v1018_v62 = vadd.f32 %v1017_v43, %v6891_v21  ;;  %v2995_v47 = vshrl.u32 %v6324_v51, 16  ;;  %v2213_v43 = vrot.slane %v5264_v52, 2 }
 0x22b   : > { %v2641_v21 = vrot.slane %v6272_v44, 2 }
 0x22c   : > { %v2123_v36 = vpop.f32.mrf.mxu0  ;;  %2343 = vmatmul.bf16.gmra.mxu1 %v2212_v15  ;;  %2771 = vmatmul.bf16.gmra.mxu2 %v2640_v31  ;;  %v6321_v58 = vadd.f32 %v2120_v19, %v1739_v28  ;;  %v2997_v61 = vrot.slane %v2995_v47, 2  ;;  %v3705_v31 = vld [vmem:[%s6165_s16 + $0x60] sm:$0xff]  ;;  %v3360_v47 = vrot.slane %v6272_v44, 3 }
 0x22d   : > { %3796 = vperm.xlu0 %5247, %v3705_v31  }
 0x22e   : > { %6890 = vst [vmem:[#allocation8_spill] sm:$0xff] %v6321_v58  ;;  %v1702_v19 = vpop.f32.mrf.mxu3  ;;  %v3001_v28 = vor.u32 %v3000_v20, %v2997_v61  ;;  %v2214_v61 = vsel %vm2199_vm4, %v2211_v49, %v2213_v43  ;;  %v6895_v49 = vld [vmem:[#allocation4_spill] sm:$0xff] }
 0x22f   : > { %3490 = vmatmul.bf16.gmra.mxu0 %v3359_v16  ;;  %v1262_v27 = vpop.f32.mrf.mxu2  ;;  %v3361_v19 = vsel %vm3346_vm5, %v3358_v17, %v3360_v47 }
 0x230   : > { %v1312_v57 = vadd.f32 %v1262_v27, %v1018_v62  ;;  %v3002_v58 = vsel %vm2913_vm3, %v2992_v24, %v3001_v28  ;;  %v6893_v62 = vld [vmem:[#allocation3_spill] sm:$0xff] }
 0x231   : > { %v1019_v39 = vpop.f32.mrf.mxu1  ;;  %v3706_v24 = vld [vmem:[%s6165_s16 + $0x68] sm:$0xff] }
 0x232   : > { %v1740_v8 = vadd.f32 %v6265_v23, %v1312_v57  ;;  %v1020_v27 = vadd.f32 %v1019_v39, %v6893_v62  ;;  %3801 = vperm.xlu1 %5248, %v3706_v24  }
 0x233   : > { %3219 = vmatmul.bf16.gmra.mxu3 %v3002_v58  ;;  %v6348_v58 = vld [vmem:[%s5372_s9 + $0x60] sm:$0xff] }
 0x234   : > { %v2125_v15 = vpop.f32.mrf.mxu0  ;;  %v6331_v16 = vadd.f32 %v2123_v36, %v1740_v8  ;;  %v2642_v36 = vsel %vm2199_vm4, %v2639_v12, %v2641_v21  ;;  %v3007_v17 = vshll.u32 %v6348_v58, 16 }
 0x236   : > { %6892 = vst [vmem:[#allocation9_spill] sm:$0xff] %v6331_v16  ;;  %v6342_v31 = vpop.f32.mrf.mxu3  ;;  %v3710_v16 = vld [vmem:[%s6165_s16 + $0x88] sm:$0xff] }
 0x237   : > { %v1264_v10 = vpop.f32.mrf.mxu2 }
 0x238   : > { %v1313_v23 = vadd.f32 %v1264_v10, %v1020_v27  ;;  %v3009_v10 = vrot.slane %v3007_v17, 3  ;;  %v3362_v17 = vrot.slane %v6298_v48, 3 }
 0x239   : > { %v1022_v57 = vpop.f32.mrf.mxu1 }
 0x23a   : > { %v1741_v20 = vadd.f32 %v6278_v5, %v1313_v23  ;;  %v1023_v12 = vadd.f32 %v1022_v57, %v6895_v49  ;;  %v3004_v5 = vshrl.u32 %v6348_v58, 16  ;;  %v5265_v57 = vld [vmem:[%s5372_s9 + $0x48] sm:$0xff]  ;;  %v2643_v49 = vrot.slane %v6298_v48, 2 }
 0x23b   : > { %v2215_v24 = vrot.slane %v5265_v57, 2 }
 0x23c   : > { %v2128_v8 = vpop.f32.mrf.mxu0  ;;  %2348 = vmatmul.bf16.gmra.mxu1 %v2214_v61  ;;  %2776 = vmatmul.bf16.gmra.mxu2 %v2642_v36  ;;  %v6345_v44 = vadd.f32 %v2125_v15, %v1741_v20  ;;  %v3006_v27 = vrot.slane %v3004_v5, 2  ;;  %v3704_v36 = vld [vmem:[%s6165_s16 + $0x58] sm:$0xff] }
 0x23d   : > { %3791 = vperm.xlu2 %5249, %v3704_v36   ;;  %v3363_v36 = vsel %vm3346_vm5, %v3360_v47, %v3362_v17 }
 0x23e   : > { %6894 = vst [vmem:[#allocation10_spill] sm:$0xff] %v6345_v44  ;;  %v6354_v15 = vpop.f32.mrf.mxu3  ;;  %v3010_v20 = vor.u32 %v3009_v10, %v3006_v27  ;;  %v2216_v27 = vsel %vm2199_vm4, %v2213_v43, %v2215_v24  ;;  %v6899_v43 = vld [vmem:[#allocation7_spill] sm:$0xff] }
 0x23f   : > { %3495 = vmatmul.bf16.gmra.mxu0 %v3361_v19  ;;  %v1267_v39 = vpop.f32.mrf.mxu2 }
 0x240   : > { %v1314_v52 = vadd.f32 %v1267_v39, %v1023_v12  ;;  %v3011_v12 = vsel %vm2913_vm3, %v3001_v28, %v3010_v20  ;;  %v6897_v39 = vld [vmem:[#allocation5_spill] sm:$0xff] }
 0x241   : > { %v1024_v62 = vpop.f32.mrf.mxu1  ;;  %v3708_v28 = vld [vmem:[%s6165_s16 + $0x78] sm:$0xff] }
 0x242   : > { %v1742_v23 = vadd.f32 %v6292_v0, %v1314_v52  ;;  %v1025_v5 = vadd.f32 %v1024_v62, %v6897_v39  ;;  %3811 = vperm.xlu0 %5247, %v3708_v28   ;;  %v6374_v62 = vld [vmem:[%s5372_s9 + $0x68] sm:$0xff] }
 0x243   : > { %3224 = vmatmul.bf16.gmra.mxu3 %v3011_v12  ;;  %v3016_v47 = vshll.u32 %v6374_v62, 16 }
 0x244   : > { %v2130_v61 = vpop.f32.mrf.mxu0  ;;  %v6357_v19 = vadd.f32 %v2128_v8, %v1742_v23  ;;  %v2644_v8 = vsel %vm2199_vm4, %v2641_v21, %v2643_v49 }
 0x246   : > { %6896 = vst [vmem:[#allocation11_spill] sm:$0xff] %v6357_v19  ;;  %v6368_v57 = vpop.f32.mrf.mxu3 }
 0x247   : > { %v1269_v0 = vpop.f32.mrf.mxu2 }
 0x248   : > { %v1315_v52 = vadd.f32 %v1269_v0, %v1025_v5 }
 0x249   : > { %v1027_v44 = vpop.f32.mrf.mxu1 }
 0x24a   : > { %v1743_v10 = vadd.f32 %v6304_v2, %v1315_v52  ;;  %v1028_v21 = vadd.f32 %v1027_v44, %v6899_v43  ;;  %v3013_v2 = vshrl.u32 %v6374_v62, 16  ;;  %v3018_v52 = vrot.slane %v3016_v47, 3  ;;  %v5266_v44 = vld [vmem:[%s5372_s9 + $0x50] sm:$0xff] }
 0x24b   : > { %v2217_v43 = vrot.slane %v5266_v44, 2 }
 0x24c   : > { %v2133_v23 = vpop.f32.mrf.mxu0  ;;  %2353 = vmatmul.bf16.gmra.mxu1 %v2216_v27  ;;  %2781 = vmatmul.bf16.gmra.mxu2 %v2644_v8  ;;  %v6371_v48 = vadd.f32 %v2130_v61, %v1743_v10  ;;  %v3015_v0 = vrot.slane %v3013_v2, 2  ;;  %v3709_v10 = vld [vmem:[%s6165_s16 + $0x80] sm:$0xff] }
 0x24d   : > { %3816 = vperm.xlu1 %5248, %v3709_v10   ;;  %v2218_v47 = vsel %vm2199_vm4, %v2215_v24, %v2217_v43  ;;  %v3737_v10 = vpop.permute.xlu0 %3736 }
 0x24e   : > { %6898 = vst [vmem:[#allocation12_spill] sm:$0xff] %v6371_v48  ;;  %v6380_v61 = vpop.f32.mrf.mxu3  ;;  %v2645_v48 = vrot.slane %v6324_v51, 2 }
 0x24f   : > { %3500 = vmatmul.bf16.gmra.mxu0 %v3363_v36  ;;  %v1272_v12 = vpop.f32.mrf.mxu2  ;;  %v3019_v36 = vor.u32 %v3018_v52, %v3015_v0  ;;  %v3707_v52 = vld [vmem:[%s6165_s16 + $0x70] sm:$0xff] }
 0x250   : > { %v1316_v39 = vadd.f32 %v1272_v12, %v1028_v21  ;;  %v3364_v12 = vrot.slane %v6324_v51, 3  ;;  %3806 = vperm.xlu2 %5249, %v3707_v52  }
 0x251   : > { %v1029_v5 = vpop.f32.mrf.mxu1  ;;  %v3020_v21 = vsel %vm2913_vm3, %v3010_v20, %v3019_v36  ;;  %v6396_v20 = vld [vmem:[%s5372_s9 + $0x70] sm:$0xff] }
 0x252   : > { %v1744_v27 = vadd.f32 %v6318_v11, %v1316_v39  ;;  %v2646_v39 = vsel %vm2199_vm4, %v2643_v49, %v2645_v48  ;;  %v3022_v24 = vshrl.u32 %v6396_v20, 16  ;;  %v3025_v49 = vshll.u32 %v6396_v20, 16 }
 0x253   : > { %3229 = vmatmul.bf16.gmra.mxu3 %v3020_v21 }
 0x254   : > { %v2135_v8 = vpop.f32.mrf.mxu0  ;;  %v6383_v28 = vadd.f32 %v2133_v23, %v1744_v27  ;;  %v3365_v23 = vsel %vm3346_vm5, %v3362_v17, %v3364_v12  ;;  %v3024_v44 = vrot.slane %v3022_v24, 2  ;;  %v3027_v21 = vrot.slane %v3025_v49, 3 }
 0x255   : > { %v6862_v24 = vrot.slane %v6348_v58, 3 }
 0x256   : > { %6900 = vst [vmem:[#allocation13_spill] sm:$0xff] %v6383_v28  ;;  %v6392_v0 = vpop.f32.mrf.mxu3  ;;  %v6863_v28 = vrot.slane %v6348_v58, 2 }
 0x257   : > { %v1274_v2 = vpop.f32.mrf.mxu2 }
 0x258   : > { %3821 = vperm.xlu2 %5249, %v3710_v16  }
 0x259   : > { %v2319_v11 = vpop.f32.mrf.mxu1 }
 0x25a   : > { %v2423_v51 = vadd.f32 %v2319_v11, %v5840_v4  ;;  %v6406_v4 = vld [vmem:[%s5372_s9 + $0x58] sm:$0xff] }
 0x25b   : > { %v6864_v11 = vrot.slane %v6406_v4, 2 }
 0x25c   : > { %v3466_v5 = vpop.f32.mrf.mxu0  ;;  %2358 = vmatmul.bf16.gmra.mxu1 %v2218_v47  ;;  %2786 = vmatmul.bf16.gmra.mxu2 %v2646_v39  ;;  %v3711_v47 = vld [vmem:[%s6165_s16 + $0x90] sm:$0xff]  ;;  %v3028_v39 = vor.u32 %v3027_v21, %v3024_v44 }
 0x25d   : > { %3826 = vperm.xlu0 %5247, %v3711_v47  }
 0x25e   : > { %v6401_v52 = vpop.f32.mrf.mxu3 }
 0x25f   : > { %3505 = vmatmul.bf16.gmra.mxu0 %v3365_v23  ;;  %v2747_v27 = vpop.f32.mrf.mxu2 }
 0x260   : > { %v2851_v8 = vadd.f32 %v2747_v27, %v2423_v51  ;;  %v3029_v51 = vsel %vm2913_vm3, %v3019_v36, %v3028_v39 }
 0x261   : > { %v2321_v17 = vpop.f32.mrf.mxu1 }
 0x262   : > { %v3284_v23 = vadd.f32 %v6342_v31, %v2851_v8  ;;  %v2424_v27 = vadd.f32 %v2321_v17, %v5854_v32  ;;  %v2220_v31 = vsel %vm2199_vm4, %v2217_v43, %v6864_v11  ;;  %v2648_v8 = vsel %vm2199_vm4, %v2645_v48, %v6863_v28  ;;  %v3712_v17 = vld [vmem:[%s6165_s16 + $0x98] sm:$0xff] }
 0x263   : > { %3234 = vmatmul.bf16.gmra.mxu3 %v3029_v51  ;;  %v3367_v32 = vsel %vm3346_vm5, %v3364_v12, %v6862_v24  ;;  %3831 = vperm.xlu1 %5248, %v3712_v17  }
 0x264   : > { %v3468_v2 = vpop.f32.mrf.mxu0  ;;  %v3570_v47 = vadd.f32 %v3466_v5, %v3284_v23  ;;  %v3742_v23 = vpop.permute.xlu0 %3741 }
 0x266   : > { %v6424_v5 = vpop.f32.mrf.mxu3  ;;  %v3939_v51 = vmul.f32 %v3737_v10, %v3570_v47 }
 0x267   : > { %v2749_v49 = vpop.f32.mrf.mxu2 }
 0x268   : > { %v2852_v44 = vadd.f32 %v2749_v49, %v2424_v27 }
 0x269   : > { %v2324_v21 = vpop.f32.mrf.mxu1 }
 0x26a   : > { %v3285_v36 = vadd.f32 %v6354_v15, %v2852_v44  ;;  %v6433_v15 = vld [vmem:[%s5372_s9 + $0x78] sm:$0xff]  ;;  %v2425_v48 = vadd.f32 %v2324_v21, %v5869_v42 }
 0x26b   : > { %v3031_v10 = vshrl.u32 %v6433_v15, 16  ;;  %v3034_v44 = vshll.u32 %v6433_v15, 16 }
 0x26c   : > { %v3471_v19 = vpop.f32.mrf.mxu0  ;;  %2363 = vmatmul.bf16.gmra.mxu1 %v2220_v31  ;;  %2791 = vmatmul.bf16.gmra.mxu2 %v2648_v8  ;;  %v3571_v43 = vadd.f32 %v3468_v2, %v3285_v36  ;;  %v4027_v2 = vmul.f32 %v3939_v51, %v3570_v47 }
 0x26d   : > { %v3033_v24 = vrot.slane %v3031_v10, 2  ;;  %v3036_v28 = vrot.slane %v3034_v44, 3 }
 0x26e   : > { %v5078_v12 = vpack.c.bf16 %v3571_v43, %v3570_v47  ;;  %v3940_v27 = vmul.f32 %v3742_v23, %v3571_v43  ;;  %v6440_v23 = vpop.f32.mrf.mxu3 }
 0x26f   : > { %3510 = vmatmul.bf16.gmra.mxu0 %v3367_v32  ;;  %v2752_v49 = vpop.f32.mrf.mxu2  ;;  %v3747_v32 = vpop.permute.xlu1 %3746  ;;  %v3037_v59 = vor.u32 %v3036_v28, %v3033_v24 }
 0x270   : > { %5079 = vst [vmem:[%s6430_s24] sm:$0xff] %v5078_v12   ;;  %v3980_v31 = vadd.f32 %v3940_v27, %v3939_v51  ;;  %v4028_v8 = vmul.f32 %v3940_v27, %v3571_v43  ;;  %v2853_v36 = vadd.f32 %v2752_v49, %v2425_v48  ;;  %v6444_v12 = vld [vmem:[%s5372_s9 + $0x60] sm:$0xff]  ;;  %v2649_v43 = vrot.slane %v6374_v62, 2 }
 0x271   : > { %v2326_v17 = vpop.f32.mrf.mxu1  ;;  %v2221_v51 = vrot.slane %v6444_v12, 2  ;;  %v3038_v48 = vsel %vm2913_vm3, %v3028_v39, %v3037_v59 }
 0x272   : > { %v4068_v11 = vadd.f32 %v4028_v8, %v4027_v2  ;;  %v3286_v42 = vadd.f32 %v6368_v57, %v2853_v36  ;;  %v2426_v27 = vadd.f32 %v2326_v17, %v5880_v45  ;;  %v3368_v57 = vrot.slane %v6374_v62, 3 }
 0x273   : > { %3239 = vmatmul.bf16.gmra.mxu3 %v3038_v48  ;;  %v6901_v2 = vrot.slane %v6406_v4, 2  ;;  %v6902_v45 = vrot.slane %v6348_v58, 2  ;;  %v3715_v48 = vld [vmem:[%s6165_s16 + $0xb0] sm:$0xff] }
 0x274   : > { %v3473_v21 = vpop.f32.mrf.mxu0  ;;  %v3572_v47 = vadd.f32 %v3471_v19, %v3286_v42  ;;  %v3714_v19 = vld [vmem:[%s6165_s16 + $0xa8] sm:$0xff]  ;;  %3846 = vperm.xlu1 %5248, %v3715_v48  }
 0x275   : > { %v2222_v39 = vsel %vm2199_vm4, %v6901_v2, %v2221_v51  ;;  %v2650_v8 = vsel %vm2199_vm4, %v6902_v45, %v2649_v43  ;;  %3841 = vperm.xlu0 %5247, %v3714_v19  }
 0x276   : > { %v3941_v49 = vmul.f32 %v3747_v32, %v3572_v47  ;;  %v6903_v32 = vrot.slane %v6348_v58, 3  ;;  %v6468_v42 = vpop.f32.mrf.mxu3 }
 0x277   : > { %v2754_v10 = vpop.f32.mrf.mxu2 }
 0x278   : > { %v3981_v44 = vadd.f32 %v3980_v31, %v3941_v49  ;;  %v4029_v16 = vmul.f32 %v3941_v49, %v3572_v47  ;;  %v2854_v28 = vadd.f32 %v2754_v10, %v2426_v27  ;;  %v3369_v4 = vsel %vm3346_vm5, %v6903_v32, %v3368_v57  ;;  %v3752_v27 = vpop.permute.xlu1 %3751 }
 0x279   : > { %v2329_v24 = vpop.f32.mrf.mxu1 }
 0x27a   : > { %v4069_v36 = vadd.f32 %v4068_v11, %v4029_v16  ;;  %v3287_v31 = vadd.f32 %v6380_v61, %v2854_v28  ;;  %v6472_v11 = vld [vmem:[%s5372_s9 + $0x80] sm:$0xff]  ;;  %v2427_v61 = vadd.f32 %v2329_v24, %v5892_v40 }
 0x27b   : > { %v3040_v28 = vshrl.u32 %v6472_v11, 16  ;;  %v3043_v19 = vshll.u32 %v6472_v11, 16 }
 0x27c   : > { %v3476_v17 = vpop.f32.mrf.mxu0  ;;  %2368 = vmatmul.bf16.gmra.mxu1 %v2222_v39  ;;  %2796 = vmatmul.bf16.gmra.mxu2 %v2650_v8  ;;  %v3573_v49 = vadd.f32 %v3473_v21, %v3287_v31  ;;  %v3717_v8 = vld [vmem:[%s6165_s16 + $0xc0] sm:$0xff]  ;;  %v3757_v31 = vpop.permute.xlu2 %3756 }
 0x27d   : > { %3856 = vperm.xlu0 %5247, %v3717_v8   ;;  %v3042_v32 = vrot.slane %v3040_v28, 2  ;;  %v3720_v8 = vld [vmem:[%s6165_s16 + $0xd8] sm:$0xff] }
 0x27e   : > { %v5083_v10 = vpack.c.bf16 %v3573_v49, %v3572_v47  ;;  %v3942_v16 = vmul.f32 %v3752_v27, %v3573_v49  ;;  %v6480_v48 = vpop.f32.mrf.mxu3  ;;  %v3718_v27 = vld [vmem:[%s6165_s16 + $0xc8] sm:$0xff] }
 0x27f   : > { %3515 = vmatmul.bf16.gmra.mxu0 %v3369_v4  ;;  %v2757_v58 = vpop.f32.mrf.mxu2  ;;  %v3045_v4 = vrot.slane %v3043_v19, 3  ;;  %3861 = vperm.xlu1 %5248, %v3718_v27  }
 0x280   : > { %5178 = vst [vmem:[%s6430_s24 + $0x8] sm:$0xff] %v5083_v10   ;;  %v3982_v2 = vadd.f32 %v3981_v44, %v3942_v16  ;;  %v4030_v45 = vmul.f32 %v3942_v16, %v3573_v49  ;;  %v2855_v39 = vadd.f32 %v2757_v58, %v2427_v61  ;;  %v6484_v49 = vld [vmem:[%s5372_s9 + $0x68] sm:$0xff]  ;;  %v2651_v16 = vrot.slane %v6396_v20, 2 }
 0x281   : > { %v2331_v21 = vpop.f32.mrf.mxu1  ;;  %v3046_v10 = vor.u32 %v3045_v4, %v3042_v32  ;;  %v2223_v61 = vrot.slane %v6484_v49, 2 }
 0x282   : > { %v4070_v40 = vadd.f32 %v4069_v36, %v4030_v45  ;;  %v3288_v47 = vadd.f32 %v6392_v0, %v2855_v39  ;;  %v2428_v36 = vadd.f32 %v2331_v21, %v5903_v54  ;;  %v3370_v0 = vrot.slane %v6396_v20, 3  ;;  %v3716_v20 = vld [vmem:[%s6165_s16 + $0xb8] sm:$0xff] }
 0x283   : > { %v3047_v58 = vsel %vm2913_vm3, %v3037_v59, %v3046_v10  ;;  %v2224_v59 = vsel %vm2199_vm4, %v2221_v51, %v2223_v61  ;;  %v2652_v54 = vsel %vm2199_vm4, %v2649_v43, %v2651_v16  ;;  %v3713_v51 = vld [vmem:[%s6165_s16 + $0xa0] sm:$0xff] }
 0x284   : > { %v3478_v24 = vpop.f32.mrf.mxu0  ;;  %v3574_v44 = vadd.f32 %v3476_v17, %v3288_v47  ;;  %3244 = vmatmul.bf16.gmra.mxu3 %v3047_v58  ;;  %v3371_v12 = vsel %vm3346_vm5, %v3368_v57, %v3370_v0  ;;  %v3721_v47 = vld [vmem:[%s6165_s16 + $0xe0] sm:$0xff]  ;;  %v3762_v27 = vpop.permute.xlu2 %3761  ;;  %3836 = vperm.xlu2 %5249, %v3713_v51  }
 0x285   : > { %3871 = vperm.xlu0 %5247, %v3720_v8   ;;  %v3723_v8 = vld [vmem:[%s6165_s16 + $0xf0] sm:$0xff]  ;;  %v3767_v51 = vpop.permute.xlu0 %3766 }
 0x286   : > { %v3943_v28 = vmul.f32 %v3757_v31, %v3574_v44  ;;  %v6508_v4 = vpop.f32.mrf.mxu3 }
 0x287   : > { %v2759_v19 = vpop.f32.mrf.mxu2  ;;  %3876 = vperm.xlu1 %5248, %v3721_v47  }
 0x288   : > { %v3983_v45 = vadd.f32 %v3982_v2, %v3943_v28  ;;  %v4031_v39 = vmul.f32 %v3943_v28, %v3574_v44  ;;  %v2856_v17 = vadd.f32 %v2759_v19, %v2428_v36 }
 0x289   : > { %v2334_v32 = vpop.f32.mrf.mxu1 }
 0x28a   : > { %v4071_v21 = vadd.f32 %v4070_v40, %v4031_v39  ;;  %v3289_v2 = vadd.f32 %v6401_v52, %v2856_v17  ;;  %v6513_v52 = vld [vmem:[%s5372_s9 + $0x88] sm:$0xff]  ;;  %v2429_v40 = vadd.f32 %v2334_v32, %v5924_v60 }
 0x28b   : > { %v3049_v36 = vshrl.u32 %v6513_v52, 16  ;;  %v3052_v28 = vshll.u32 %v6513_v52, 16 }
 0x28c   : > { %v3481_v31 = vpop.f32.mrf.mxu0  ;;  %2373 = vmatmul.bf16.gmra.mxu1 %v2224_v59  ;;  %2801 = vmatmul.bf16.gmra.mxu2 %v2652_v54  ;;  %v3575_v43 = vadd.f32 %v3478_v24, %v3289_v2 }
 0x28d   : > { %3886 = vperm.xlu0 %5247, %v3723_v8   ;;  %v3051_v59 = vrot.slane %v3049_v36, 2  ;;  %v3054_v54 = vrot.slane %v3052_v28, 3  ;;  %3851 = vperm.xlu2 %5249, %v3716_v20  }
 0x28e   : > { %v5088_v62 = vpack.c.bf16 %v3575_v43, %v3574_v44  ;;  %v3944_v58 = vmul.f32 %v3762_v27, %v3575_v43  ;;  %v6521_v32 = vpop.f32.mrf.mxu3  ;;  %v6525_v27 = vld [vmem:[%s5372_s9 + $0x70] sm:$0xff] }
 0x28f   : > { %3520 = vmatmul.bf16.gmra.mxu0 %v3371_v12  ;;  %v2762_v57 = vpop.f32.mrf.mxu2  ;;  %v3724_v12 = vld [vmem:[%s6165_s16 + $0xf8] sm:$0xff]  ;;  %v3055_v47 = vor.u32 %v3054_v54, %v3051_v59  ;;  %v3772_v54 = vpop.permute.xlu1 %3771 }
 0x290   : > { %5179 = vst [vmem:[%s6430_s24 + $0x10] sm:$0xff] %v5088_v62   ;;  %v3984_v19 = vadd.f32 %v3983_v45, %v3944_v58  ;;  %v4032_v39 = vmul.f32 %v3944_v58, %v3575_v43  ;;  %v2857_v17 = vadd.f32 %v2762_v57, %v2429_v40  ;;  %3891 = vperm.xlu1 %5248, %v3724_v12   ;;  %v2225_v43 = vrot.slane %v6525_v27, 2 }
 0x291   : > { %v2336_v24 = vpop.f32.mrf.mxu1  ;;  %v2653_v40 = vrot.slane %v6433_v15, 2  ;;  %v3056_v62 = vsel %vm2913_vm3, %v3046_v10, %v3055_v47  ;;  %v3372_v58 = vrot.slane %v6433_v15, 3 }
 0x292   : > { %v4072_v2 = vadd.f32 %v4071_v21, %v4032_v39  ;;  %v3290_v60 = vadd.f32 %v6424_v5, %v2857_v17  ;;  %v2430_v21 = vadd.f32 %v2336_v24, %v5937_v50  ;;  %v2226_v10 = vsel %vm2199_vm4, %v2223_v61, %v2225_v43  ;;  %v3727_v61 = vld [vmem:[%s6165_s16 + $0x110] sm:$0xff] }
 0x293   : > { %v2654_v50 = vsel %vm2199_vm4, %v2651_v16, %v2653_v40  ;;  %v3373_v49 = vsel %vm3346_vm5, %v3370_v0, %v3372_v58 }
 0x294   : > { %v3483_v44 = vpop.f32.mrf.mxu0  ;;  %v3576_v45 = vadd.f32 %v3481_v31, %v3290_v60  ;;  %3249 = vmatmul.bf16.gmra.mxu3 %v3056_v62  ;;  %v3726_v31 = vld [vmem:[%s6165_s16 + $0x108] sm:$0xff] }
 0x295   : > { %3901 = vperm.xlu0 %5247, %v3726_v31  }
 0x296   : > { %v3945_v5 = vmul.f32 %v3767_v51, %v3576_v45  ;;  %v6549_v59 = vpop.f32.mrf.mxu3 }
 0x297   : > { %v2764_v57 = vpop.f32.mrf.mxu2 }
 0x298   : > { %v3985_v36 = vadd.f32 %v3984_v19, %v3945_v5  ;;  %v4033_v28 = vmul.f32 %v3945_v5, %v3576_v45  ;;  %v2858_v39 = vadd.f32 %v2764_v57, %v2430_v21  ;;  %3906 = vperm.xlu1 %5248, %v3727_v61   ;;  %v3729_v57 = vld [vmem:[%s6165_s16 + $0x120] sm:$0xff]  ;;  %v6566_v61 = vld [vmem:[%s5372_s9 + $0x78] sm:$0xff] }
 0x299   : > { %v2339_v17 = vpop.f32.mrf.mxu1 }
 0x29a   : > { %v4073_v8 = vadd.f32 %v4072_v2, %v4033_v28  ;;  %v3291_v19 = vadd.f32 %v6440_v23, %v2858_v39  ;;  %v6553_v2 = vld [vmem:[%s5372_s9 + $0x90] sm:$0xff]  ;;  %v2431_v23 = vadd.f32 %v2339_v17, %v5949_v1 }
 0x29b   : > { %v3058_v0 = vshrl.u32 %v6553_v2, 16  ;;  %v3061_v62 = vshll.u32 %v6553_v2, 16 }
 0x29c   : > { %v3486_v24 = vpop.f32.mrf.mxu0  ;;  %2378 = vmatmul.bf16.gmra.mxu1 %v2226_v10  ;;  %2806 = vmatmul.bf16.gmra.mxu2 %v2654_v50  ;;  %v3577_v16 = vadd.f32 %v3483_v44, %v3291_v19  ;;  %v3730_v50 = vld [vmem:[%s6165_s16 + $0x128] sm:$0xff]  ;;  %v3777_v19 = vpop.permute.xlu2 %3776 }
 0x29d   : > { %3916 = vperm.xlu0 %5247, %v3729_v57   ;;  %v3060_v39 = vrot.slane %v3058_v0, 2  ;;  %v3063_v1 = vrot.slane %v3061_v62, 3  ;;  %v3732_v62 = vld [vmem:[%s6165_s16 + $0x138] sm:$0xff] }
 0x29e   : > { %v5093_v60 = vpack.c.bf16 %v3577_v16, %v3576_v45  ;;  %v3946_v12 = vmul.f32 %v3772_v54, %v3577_v16  ;;  %v6562_v10 = vpop.f32.mrf.mxu3  ;;  %v2227_v54 = vrot.slane %v6566_v61, 2 }
 0x29f   : > { %3525 = vmatmul.bf16.gmra.mxu0 %v3373_v49  ;;  %v2767_v51 = vpop.f32.mrf.mxu2  ;;  %v3064_v49 = vor.u32 %v3063_v1, %v3060_v39  ;;  %v3782_v39 = vpop.permute.xlu0 %3781  ;;  %v6595_v1 = vld [vmem:[%s5372_s9 + $0x98] sm:$0xff] }
 0x2a0   : > { %5180 = vst [vmem:[%s6430_s24 + $0x18] sm:$0xff] %v5093_v60   ;;  %v3986_v21 = vadd.f32 %v3985_v36, %v3946_v12  ;;  %v4034_v5 = vmul.f32 %v3946_v12, %v3577_v16  ;;  %v2859_v44 = vadd.f32 %v2767_v51, %v2431_v23  ;;  %3921 = vperm.xlu1 %5248, %v3730_v50   ;;  %v2655_v16 = vrot.slane %v6472_v11, 2  ;;  %v3719_v12 = vld [vmem:[%s6165_s16 + $0xd0] sm:$0xff]  ;;  %v3722_v50 = vld [vmem:[%s6165_s16 + $0xe8] sm:$0xff] }
 0x2a1   : > { %v2341_v28 = vpop.f32.mrf.mxu1  ;;  %v3374_v60 = vrot.slane %v6472_v11, 3  ;;  %3866 = vperm.xlu2 %5249, %v3719_v12  }
 0x2a2   : > { %v4074_v45 = vadd.f32 %v4073_v8, %v4034_v5  ;;  %v3292_v31 = vadd.f32 %v6468_v42, %v2859_v44  ;;  %v3065_v8 = vsel %vm2913_vm3, %v3055_v47, %v3064_v49  ;;  %v2432_v23 = vadd.f32 %v2341_v28, %v5959_v56 }
 0x2a3   : > { %v2228_v56 = vsel %vm2199_vm4, %v2225_v43, %v2227_v54  ;;  %v2656_v47 = vsel %vm2199_vm4, %v2653_v40, %v2655_v16  ;;  %v3375_v27 = vsel %vm3346_vm5, %v3372_v58, %v3374_v60  ;;  %v3733_v43 = vld [vmem:[%s6165_s16 + $0x140] sm:$0xff]  ;;  %v3067_v58 = vshrl.u32 %v6595_v1, 16 }
 0x2a4   : > { %v3488_v17 = vpop.f32.mrf.mxu0  ;;  %v3578_v36 = vadd.f32 %v3486_v24, %v3292_v31  ;;  %3254 = vmatmul.bf16.gmra.mxu3 %v3065_v8 }
 0x2a5   : > { %3931 = vperm.xlu0 %5247, %v3732_v62   ;;  %v3069_v12 = vrot.slane %v3067_v58, 2  ;;  %v3787_v62 = vpop.permute.xlu1 %3786 }
 0x2a6   : > { %v3947_v42 = vmul.f32 %v3777_v19, %v3578_v36  ;;  %v6591_v28 = vpop.f32.mrf.mxu3  ;;  %v3070_v19 = vshll.u32 %v6595_v1, 16 }
 0x2a7   : > { %v2769_v20 = vpop.f32.mrf.mxu2 }
 0x2a8   : > { %v3987_v51 = vadd.f32 %v3986_v21, %v3947_v42  ;;  %v4035_v24 = vmul.f32 %v3947_v42, %v3578_v36  ;;  %v2860_v0 = vadd.f32 %v2769_v20, %v2432_v23  ;;  %3936 = vperm.xlu1 %5248, %v3733_v43   ;;  %v3072_v20 = vrot.slane %v3070_v19, 3 }
 0x2a9   : > { %v2344_v5 = vpop.f32.mrf.mxu1  ;;  %3881 = vperm.xlu2 %5249, %v3722_v50  }
 0x2aa   : > { %v4075_v44 = vadd.f32 %v4074_v45, %v4035_v24  ;;  %v3293_v21 = vadd.f32 %v6480_v48, %v2860_v0  ;;  %v2433_v48 = vadd.f32 %v2344_v5, %v5971_v55  ;;  %v3073_v5 = vor.u32 %v3072_v20, %v3069_v12 }
 0x2ac   : > { %v3491_v57 = vpop.f32.mrf.mxu0  ;;  %2383 = vmatmul.bf16.gmra.mxu1 %v2228_v56  ;;  %2811 = vmatmul.bf16.gmra.mxu2 %v2656_v47  ;;  %v3579_v40 = vadd.f32 %v3488_v17, %v3293_v21  ;;  %v6606_v47 = vld [vmem:[%s5372_s9 + $0x80] sm:$0xff] }
 0x2ad   : > { %v2229_v21 = vrot.slane %v6606_v47, 2 }
 0x2ae   : > { %v5098_v45 = vpack.c.bf16 %v3579_v40, %v3578_v36  ;;  %v3948_v31 = vmul.f32 %v3782_v39, %v3579_v40  ;;  %v6603_v0 = vpop.f32.mrf.mxu3 }
 0x2af   : > { %3530 = vmatmul.bf16.gmra.mxu0 %v3375_v27  ;;  %v2772_v15 = vpop.f32.mrf.mxu2  ;;  %v3074_v27 = vsel %vm2913_vm3, %v3064_v49, %v3073_v5  ;;  %v2230_v49 = vsel %vm2199_vm4, %v2227_v54, %v2229_v21  ;;  %v3792_v54 = vpop.permute.xlu2 %3791 }
 0x2b0   : > { %5181 = vst [vmem:[%s6430_s24 + $0x20] sm:$0xff] %v5098_v45   ;;  %v3988_v8 = vadd.f32 %v3987_v51, %v3948_v31  ;;  %v4036_v23 = vmul.f32 %v3948_v31, %v3579_v40  ;;  %v2861_v42 = vadd.f32 %v2772_v15, %v2433_v48  ;;  %v2657_v51 = vrot.slane %v6513_v52, 2 }
 0x2b1   : > { %v2346_v17 = vpop.f32.mrf.mxu1 }
 0x2b2   : > { %v4076_v24 = vadd.f32 %v4075_v44, %v4036_v23  ;;  %v3294_v55 = vadd.f32 %v6508_v4, %v2861_v42  ;;  %v2434_v43 = vadd.f32 %v2346_v17, %v5990_v34  ;;  %v3376_v44 = vrot.slane %v6513_v52, 3  ;;  %v3725_v4 = vld [vmem:[%s6165_s16 + $0x100] sm:$0xff]  ;;  %v3728_v17 = vld [vmem:[%s6165_s16 + $0x118] sm:$0xff] }
 0x2b3   : > { %3896 = vperm.xlu2 %5249, %v3725_v4   ;;  %v2658_v34 = vsel %vm2199_vm4, %v2655_v16, %v2657_v51  ;;  %v6633_v23 = vld [vmem:[%s5372_s9 + $0xa0] sm:$0xff]  ;;  %v3797_v4 = vpop.permute.xlu0 %3796 }
 0x2b4   : > { %v3493_v36 = vpop.f32.mrf.mxu0  ;;  %v3580_v56 = vadd.f32 %v3491_v57, %v3294_v55  ;;  %3259 = vmatmul.bf16.gmra.mxu3 %v3074_v27  ;;  %v3377_v19 = vsel %vm3346_vm5, %v3374_v60, %v3376_v44  ;;  %v3076_v11 = vshrl.u32 %v6633_v23, 16  ;;  %v3079_v60 = vshll.u32 %v6633_v23, 16 }
 0x2b6   : > { %v3949_v39 = vmul.f32 %v3787_v62, %v3580_v56  ;;  %v6630_v61 = vpop.f32.mrf.mxu3  ;;  %v3078_v62 = vrot.slane %v3076_v11, 2  ;;  %v3081_v27 = vrot.slane %v3079_v60, 3  ;;  %v3802_v11 = vpop.permute.xlu1 %3801 }
 0x2b7   : > { %v2774_v40 = vpop.f32.mrf.mxu2 }
 0x2b8   : > { %v3989_v48 = vadd.f32 %v3988_v8, %v3949_v39  ;;  %v4037_v57 = vmul.f32 %v3949_v39, %v3580_v56  ;;  %v2862_v45 = vadd.f32 %v2774_v40, %v2434_v43  ;;  %v3082_v40 = vor.u32 %v3081_v27, %v3078_v62 }
 0x2b9   : > { %v2349_v31 = vpop.f32.mrf.mxu1 }
 0x2ba   : > { %v4077_v50 = vadd.f32 %v4076_v24, %v4037_v57  ;;  %v3295_v15 = vadd.f32 %v6521_v32, %v2862_v45  ;;  %v2435_v16 = vadd.f32 %v2349_v31, %v6005_v41  ;;  %v6644_v45 = vld [vmem:[%s5372_s9 + $0x88] sm:$0xff] }
 0x2bb   : > { %3911 = vperm.xlu2 %5249, %v3728_v17   ;;  %v2231_v31 = vrot.slane %v6644_v45, 2 }
 0x2bc   : > { %v3496_v58 = vpop.f32.mrf.mxu0  ;;  %2388 = vmatmul.bf16.gmra.mxu1 %v2230_v49  ;;  %2816 = vmatmul.bf16.gmra.mxu2 %v2658_v34  ;;  %v3581_v8 = vadd.f32 %v3493_v36, %v3295_v15  ;;  %v3083_v49 = vsel %vm2913_vm3, %v3073_v5, %v3082_v40 }
 0x2be   : > { %v5103_v32 = vpack.c.bf16 %v3581_v8, %v3580_v56  ;;  %v3950_v42 = vmul.f32 %v3792_v54, %v3581_v8  ;;  %v6641_v39 = vpop.f32.mrf.mxu3 }
 0x2bf   : > { %3535 = vmatmul.bf16.gmra.mxu0 %v3377_v19  ;;  %v2777_v12 = vpop.f32.mrf.mxu2 }
 0x2c0   : > { %5182 = vst [vmem:[%s6430_s24 + $0x28] sm:$0xff] %v5103_v32   ;;  %v3990_v20 = vadd.f32 %v3989_v48, %v3950_v42  ;;  %v4038_v24 = vmul.f32 %v3950_v42, %v3581_v8  ;;  %v2863_v55 = vadd.f32 %v2777_v12, %v2435_v16  ;;  %v2659_v48 = vrot.slane %v6553_v2, 2 }
 0x2c1   : > { %v2351_v36 = vpop.f32.mrf.mxu1  ;;  %v2232_v32 = vsel %vm2199_vm4, %v2229_v21, %v2231_v31  ;;  %v6665_v21 = vld [vmem:[%s5372_s9 + $0xa8] sm:$0xff] }
 0x2c2   : > { %v4078_v43 = vadd.f32 %v4077_v50, %v4038_v24  ;;  %v3296_v41 = vadd.f32 %v6549_v59, %v2863_v55  ;;  %v2436_v34 = vadd.f32 %v2351_v36, %v6015_v46  ;;  %v3378_v50 = vrot.slane %v6553_v2, 3  ;;  %v3731_v59 = vld [vmem:[%s6165_s16 + $0x130] sm:$0xff] }
 0x2c3   : > { %3926 = vperm.xlu2 %5249, %v3731_v59   ;;  %v2660_v46 = vsel %vm2199_vm4, %v2657_v51, %v2659_v48  ;;  %v3085_v24 = vshrl.u32 %v6665_v21, 16  ;;  %v3088_v52 = vshll.u32 %v6665_v21, 16  ;;  %v2661_v59 = vrot.slane %v6595_v1, 2 }
 0x2c4   : > { %v3498_v56 = vpop.f32.mrf.mxu0  ;;  %v3582_v57 = vadd.f32 %v3496_v58, %v3296_v41  ;;  %3264 = vmatmul.bf16.gmra.mxu3 %v3083_v49  ;;  %v3379_v17 = vsel %vm3346_vm5, %v3376_v44, %v3378_v50 }
 0x2c5   : > { %v3087_v27 = vrot.slane %v3085_v24, 2 }
 0x2c6   : > { %v3951_v15 = vmul.f32 %v3797_v4, %v3582_v57  ;;  %v6662_v12 = vpop.f32.mrf.mxu3 }
 0x2c7   : > { %v2779_v19 = vpop.f32.mrf.mxu2 }
 0x2c8   : > { %v3991_v54 = vadd.f32 %v3990_v20, %v3951_v15  ;;  %v4039_v58 = vmul.f32 %v3951_v15, %v3582_v57  ;;  %v2864_v8 = vadd.f32 %v2779_v19, %v2436_v34  ;;  %v6675_v34 = vld [vmem:[%s5372_s9 + $0x90] sm:$0xff] }
 0x2c9   : > { %v2354_v16 = vpop.f32.mrf.mxu1  ;;  %v2233_v15 = vrot.slane %v6675_v34, 2 }
 0x2ca   : > { %v4079_v5 = vadd.f32 %v4078_v43, %v4039_v58  ;;  %v3297_v2 = vadd.f32 %v6562_v10, %v2864_v8  ;;  %v2437_v51 = vadd.f32 %v2354_v16, %v6027_v26  ;;  %v3090_v43 = vrot.slane %v3088_v52, 3 }
 0x2cc   : > { %v3501_v42 = vpop.f32.mrf.mxu0  ;;  %2393 = vmatmul.bf16.gmra.mxu1 %v2232_v32  ;;  %2821 = vmatmul.bf16.gmra.mxu2 %v2660_v46  ;;  %v3583_v47 = vadd.f32 %v3498_v56, %v3297_v2  ;;  %v3091_v45 = vor.u32 %v3090_v43, %v3087_v27  ;;  %v2234_v2 = vsel %vm2199_vm4, %v2231_v31, %v2233_v15 }
 0x2ce   : > { %v5108_v60 = vpack.c.bf16 %v3583_v47, %v3582_v57  ;;  %v3952_v20 = vmul.f32 %v3802_v11, %v3583_v47  ;;  %v6672_v26 = vpop.f32.mrf.mxu3  ;;  %v3807_v57 = vpop.permute.xlu2 %3806  ;;  %v3092_v19 = vsel %vm2913_vm3, %v3082_v40, %v3091_v45  ;;  %v2662_v40 = vsel %vm2199_vm4, %v2659_v48, %v2661_v59 }
 0x2cf   : > { %3540 = vmatmul.bf16.gmra.mxu0 %v3379_v17  ;;  %v2782_v10 = vpop.f32.mrf.mxu2 }
 0x2d0   : > { %5183 = vst [vmem:[%s6430_s24 + $0x30] sm:$0xff] %v5108_v60   ;;  %v3992_v44 = vadd.f32 %v3991_v54, %v3952_v20  ;;  %v4040_v55 = vmul.f32 %v3952_v20, %v3583_v47  ;;  %v2865_v36 = vadd.f32 %v2782_v10, %v2437_v51  ;;  %v6695_v51 = vld [vmem:[%s5372_s9 + $0xb0] sm:$0xf]  ;;  %v2892_v60 = vld [vmem:[%s5372_s9 + $0xb4] sm:$0x7]  ;;  %v3812_v20 = vpop.permute.xlu0 %3811 }
 0x2d1   : > { %v2356_v62 = vpop.f32.mrf.mxu1  ;;  %v2605_v31 = vunpack.c.l.b16 %v6695_v51  ;;  %v2911_v10 = vunpack.c.l.b16 %v2892_v60 }
 0x2d2   : > { %v4080_v41 = vadd.f32 %v4079_v5, %v4040_v55  ;;  %v3298_v56 = vadd.f32 %v6591_v28, %v2865_v36  ;;  %v2438_v54 = vadd.f32 %v2356_v62, %v6037_v6  ;;  %v3380_v28 = vrot.slane %v6595_v1, 3 }
 0x2d4   : > { %v3503_v4 = vpop.f32.mrf.mxu0  ;;  %v3584_v49 = vadd.f32 %v3501_v42, %v3298_v56  ;;  %3269 = vmatmul.bf16.gmra.mxu3 %v3092_v19  ;;  %v3381_v11 = vsel %vm3346_vm5, %v3378_v50, %v3380_v28  ;;  %v6702_v50 = vpack.c.b16 %v2911_v10, %v2605_v31  ;;  %v3817_v19 = vpop.permute.xlu1 %3816 }
 0x2d6   : > { %v3953_v58 = vmul.f32 %v3807_v57, %v3584_v49  ;;  %v6692_v47 = vpop.f32.mrf.mxu3  ;;  %v3094_v27 = vshrl.u32 %v6702_v50, 16 }
 0x2d7   : > { %v2784_v8 = vpop.f32.mrf.mxu2 }
 0x2d8   : > { %v3993_v16 = vadd.f32 %v3992_v44, %v3953_v58  ;;  %v4041_v32 = vmul.f32 %v3953_v58, %v3584_v49  ;;  %v2866_v46 = vadd.f32 %v2784_v8, %v2438_v54  ;;  %v5275_v8 = vld [vmem:[%s5372_s9 + $0x98] sm:$0xff] }
 0x2d9   : > { %v2359_v5 = vpop.f32.mrf.mxu1 }
 0x2da   : > { %v4081_v6 = vadd.f32 %v4080_v41, %v4041_v32  ;;  %v3299_v42 = vadd.f32 %v6603_v0, %v2866_v46  ;;  %v2439_v0 = vadd.f32 %v2359_v5, %v6061_v18  ;;  %v3097_v41 = vshll.u32 %v6702_v50, 16 }
 0x2db   : > { %v2235_v32 = vrot.slane %v5275_v8, 2 }
 0x2dc   : > { %v3506_v17 = vpop.f32.mrf.mxu0  ;;  %2398 = vmatmul.bf16.gmra.mxu1 %v2234_v2  ;;  %2826 = vmatmul.bf16.gmra.mxu2 %v2662_v40  ;;  %v3585_v48 = vadd.f32 %v3503_v4, %v3299_v42  ;;  %v3099_v54 = vrot.slane %v3097_v41, 3  ;;  %v3382_v40 = vrot.slane %v6633_v23, 3 }
 0x2de   : > { %v5113_v24 = vpack.c.bf16 %v3585_v48, %v3584_v49  ;;  %v3954_v52 = vmul.f32 %v3812_v20, %v3585_v48  ;;  %v6708_v57 = vpop.f32.mrf.mxu3  ;;  %v3096_v49 = vrot.slane %v3094_v27, 2 }
 0x2df   : > { %3545 = vmatmul.bf16.gmra.mxu0 %v3381_v11  ;;  %v2787_v44 = vpop.f32.mrf.mxu2 }
 0x2e0   : > { %5184 = vst [vmem:[%s6430_s24 + $0x38] sm:$0xff] %v5113_v24   ;;  %v3994_v55 = vadd.f32 %v3993_v16, %v3954_v52  ;;  %v4042_v36 = vmul.f32 %v3954_v52, %v3585_v48  ;;  %v2867_v62 = vadd.f32 %v2787_v44, %v2439_v0  ;;  %v2663_v16 = vrot.slane %v6633_v23, 2  ;;  %v3822_v24 = vpop.permute.xlu2 %3821 }
 0x2e1   : > { %v2361_v43 = vpop.f32.mrf.mxu1  ;;  %v3100_v46 = vor.u32 %v3099_v54, %v3096_v49  ;;  %v6905_v54 = vld [vmem:[#allocation16_spill] sm:$0xff] }
 0x2e2   : > { %v4082_v56 = vadd.f32 %v4081_v6, %v4042_v36  ;;  %v3300_v18 = vadd.f32 %v6630_v61, %v2867_v62  ;;  %v2440_v5 = vadd.f32 %v2361_v43, %v6074_v35  ;;  %v2664_v35 = vsel %vm2199_vm4, %v2661_v59, %v2663_v16 }
 0x2e3   : > { %v3101_v61 = vsel %vm2913_vm3, %v3091_v45, %v3100_v46  ;;  %v3383_v45 = vsel %vm3346_vm5, %v3380_v28, %v3382_v40 }
 0x2e4   : > { %v3508_v4 = vpop.f32.mrf.mxu0  ;;  %v3586_v58 = vadd.f32 %v3506_v17, %v3300_v18  ;;  %3274 = vmatmul.bf16.gmra.mxu3 %v3101_v61  ;;  %v2236_v17 = vsel %vm2199_vm4, %v2233_v15, %v2235_v32  ;;  %v6904_v15 = vld [vmem:[#allocation14_spill] sm:$0xff] }
 0x2e6   : > { %v3955_v2 = vmul.f32 %v3817_v19, %v3586_v58  ;;  %v6725_v0 = vpop.f32.mrf.mxu3  ;;  %v2665_v19 = vrot.slane %v6665_v21, 2 }
 0x2e7   : > { %v2789_v6 = vpop.f32.mrf.mxu2 }
 0x2e8   : > { %v3995_v42 = vadd.f32 %v3994_v55, %v3955_v2  ;;  %v4043_v11 = vmul.f32 %v3955_v2, %v3586_v58  ;;  %v2868_v60 = vadd.f32 %v2789_v6, %v2440_v5  ;;  %v3384_v5 = vrot.slane %v6665_v21, 3  ;;  %v3832_v21 = vpop.permute.xlu1 %3831 }
 0x2e9   : > { %v2364_v20 = vpop.f32.mrf.mxu1 }
 0x2ea   : > { %v4083_v48 = vadd.f32 %v4082_v56, %v4043_v11  ;;  %v3301_v23 = vadd.f32 %v6641_v39, %v2868_v60  ;;  %v2441_v52 = vadd.f32 %v2364_v20, %v6904_v15  ;;  %v3827_v56 = vpop.permute.xlu0 %3826  ;;  %v2666_v60 = vsel %vm2199_vm4, %v2663_v16, %v2665_v19 }
 0x2ec   : > { %v3511_v10 = vpop.f32.mrf.mxu0  ;;  %2403 = vmatmul.bf16.gmra.mxu1 %v2236_v17  ;;  %2831 = vmatmul.bf16.gmra.mxu2 %v2664_v35  ;;  %v3587_v34 = vadd.f32 %v3508_v4, %v3301_v23  ;;  %v5276_v4 = vld [vmem:[%s5372_s9 + $0xa0] sm:$0xff]  ;;  %v2505_v23 = vld [vmem:[%s5372_s9 + $0xb4] sm:$0x3] }
 0x2ed   : > { %v2237_v49 = vrot.slane %v5276_v4, 2 }
 0x2ee   : > { %v5118_v44 = vpack.c.bf16 %v3587_v34, %v3586_v58  ;;  %v3956_v59 = vmul.f32 %v3822_v24, %v3587_v34  ;;  %v6730_v41 = vpop.f32.mrf.mxu3 }
 0x2ef   : > { %3550 = vmatmul.bf16.gmra.mxu0 %v3383_v45  ;;  %v2792_v55 = vpop.f32.mrf.mxu2  ;;  %v2238_v11 = vsel %vm2199_vm4, %v2235_v32, %v2237_v49 }
 0x2f0   : > { %5185 = vst [vmem:[%s6430_s24 + $0x40] sm:$0xff] %v5118_v44   ;;  %v3996_v39 = vadd.f32 %v3995_v42, %v3956_v59  ;;  %v4044_v36 = vmul.f32 %v3956_v59, %v3587_v34  ;;  %v2869_v62 = vadd.f32 %v2792_v55, %v2441_v52 }
 0x2f1   : > { %v2366_v1 = vpop.f32.mrf.mxu1 }
 0x2f2   : > { %v4084_v27 = vadd.f32 %v4083_v48, %v4044_v36  ;;  %v3302_v28 = vadd.f32 %v6662_v12, %v2869_v62  ;;  %v2442_v58 = vadd.f32 %v2366_v1, %v6905_v54  ;;  %v3385_v48 = vsel %vm3346_vm5, %v3382_v40, %v3384_v5  ;;  %v3837_v62 = vpop.permute.xlu2 %3836 }
 0x2f4   : > { %v3513_v43 = vpop.f32.mrf.mxu0  ;;  %v3588_v18 = vadd.f32 %v3511_v10, %v3302_v28  ;;  %3279 = vmatmul.bf16.gmra.mxu3 %v3100_v46  ;;  %v2606_v46 = vunpack.c.l.b16 %v2505_v23 }
 0x2f6   : > { %v3957_v8 = vmul.f32 %v3827_v56, %v3588_v18  ;;  %v6741_v10 = vpop.f32.mrf.mxu3  ;;  %v2627_v40 = vpack.c.b16 %v2606_v46, %v2605_v31  ;;  %v3847_v46 = vpop.permute.xlu1 %3846 }
 0x2f7   : > { %v2794_v2 = vpop.f32.mrf.mxu2 }
 0x2f8   : > { %v3997_v6 = vadd.f32 %v3996_v39, %v3957_v8  ;;  %v4045_v61 = vmul.f32 %v3957_v8, %v3588_v18  ;;  %v2870_v42 = vadd.f32 %v2794_v2, %v2442_v58  ;;  %v2667_v28 = vrot.slane %v2627_v40, 2 }
 0x2f9   : > { %v2369_v12 = vpop.f32.mrf.mxu1 }
 0x2fa   : > { %v4085_v20 = vadd.f32 %v4084_v27, %v4045_v61  ;;  %v3303_v17 = vadd.f32 %v6672_v26, %v2870_v42  ;;  %v2443_v32 = vadd.f32 %v2369_v12, %v6120_v53  ;;  %v6906_v27 = vld [vmem:[#allocation15_spill] sm:$0xff]  ;;  %v2668_v8 = vsel %vm2199_vm4, %v2665_v19, %v2667_v28 }
 0x2fb   : > { %v2239_v53 = vrot.slane %v6906_v27, 2 }
 0x2fc   : > { %v3516_v35 = vpop.f32.mrf.mxu0  ;;  %v3589_v45 = vadd.f32 %v3513_v43, %v3303_v17  ;;  %2408 = vmatmul.bf16.gmra.mxu1 %v2238_v11  ;;  %2836 = vmatmul.bf16.gmra.mxu2 %v2666_v60 }
 0x2fe   : > { %v5123_v24 = vpack.c.bf16 %v3589_v45, %v3588_v18  ;;  %v3958_v16 = vmul.f32 %v3832_v21, %v3589_v45  ;;  %v6748_v36 = vpop.f32.mrf.mxu3  ;;  %v3386_v18 = vrot.slane %v6702_v50, 3  ;;  %v3842_v50 = vpop.permute.xlu0 %3841 }
 0x2ff   : > { %3555 = vmatmul.bf16.gmra.mxu0 %v3385_v48  ;;  %v2797_v34 = vpop.f32.mrf.mxu2 }
 0x300   : > { %5186 = vst [vmem:[%s6430_s24 + $0x48] sm:$0xff] %v5123_v24   ;;  %v3998_v15 = vadd.f32 %v3997_v6, %v3958_v16  ;;  %v4046_v26 = vmul.f32 %v3958_v16, %v3589_v45  ;;  %v2871_v52 = vadd.f32 %v2797_v34, %v2443_v32  ;;  %v3387_v42 = vsel %vm3346_vm5, %v3384_v5, %v3386_v18 }
 0x301   : > { %v2371_v44 = vpop.f32.mrf.mxu1 }
 0x302   : > { %v4086_v59 = vadd.f32 %v4085_v20, %v4046_v26  ;;  %v3304_v55 = vadd.f32 %v6692_v47, %v2871_v52  ;;  %v2444_v43 = vadd.f32 %v2371_v44, %v6130_v30  ;;  %v2240_v47 = vsel %vm2199_vm4, %v2237_v49, %v2239_v53 }
 0x304   : > { %v3518_v39 = vpop.f32.mrf.mxu0  ;;  %v3590_v1 = vadd.f32 %v3516_v35, %v3304_v55  ;;  %v3852_v55 = vpop.permute.xlu2 %3851 }
 0x306   : > { %v3959_v56 = vmul.f32 %v3837_v62, %v3590_v1 }
 0x307   : > { %v2799_v4 = vpop.f32.mrf.mxu2  ;;  %v6757_v30 = vpop.f32.mrf.mxu3 }
 0x308   : > { %v3999_v54 = vadd.f32 %v3998_v15, %v3959_v56  ;;  %v4047_v51 = vmul.f32 %v3959_v56, %v3590_v1  ;;  %v2872_v31 = vadd.f32 %v2799_v4, %v2444_v43 }
 0x309   : > { %v2374_v58 = vpop.f32.mrf.mxu1 }
 0x30a   : > { %v4087_v2 = vadd.f32 %v4086_v59, %v4047_v51  ;;  %v3305_v6 = vadd.f32 %v6708_v57, %v2872_v31  ;;  %v2445_v60 = vadd.f32 %v2374_v58, %v6142_v3 }
 0x30c   : > { %v3521_v61 = vpop.f32.mrf.mxu0  ;;  %v3591_v12 = vadd.f32 %v3518_v39, %v3305_v6  ;;  %2413 = vmatmul.bf16.gmra.mxu1 %v2240_v47  ;;  %2841 = vmatmul.bf16.gmra.mxu2 %v2668_v8 }
 0x30e   : > { %v5128_v11 = vpack.c.bf16 %v3591_v12, %v3590_v1  ;;  %v3960_v49 = vmul.f32 %v3842_v50, %v3591_v12 }
 0x30f   : > { %3560 = vmatmul.bf16.gmra.mxu0 %v3387_v42  ;;  %v2802_v20 = vpop.f32.mrf.mxu2  ;;  %v6762_v21 = vpop.f32.mrf.mxu3 }
 0x310   : > { %5187 = vst [vmem:[%s6430_s24 + $0x50] sm:$0xff] %v5128_v11   ;;  %v4000_v19 = vadd.f32 %v3999_v54, %v3960_v49  ;;  %v4048_v17 = vmul.f32 %v3960_v49, %v3591_v12  ;;  %v2873_v35 = vadd.f32 %v2802_v20, %v2445_v60  ;;  %v3862_v11 = vpop.permute.xlu1 %3861 }
 0x311   : > { %v2376_v57 = vpop.f32.mrf.mxu1 }
 0x312   : > { %v4088_v48 = vadd.f32 %v4087_v2, %v4048_v17  ;;  %v3306_v5 = vadd.f32 %v6725_v0, %v2873_v35  ;;  %v2446_v24 = vadd.f32 %v2376_v57, %v6156_v63 }
 0x314   : > { %v3523_v23 = vpop.f32.mrf.mxu0  ;;  %v3592_v45 = vadd.f32 %v3521_v61, %v3306_v5 }
 0x316   : > { %v3961_v32 = vmul.f32 %v3847_v46, %v3592_v45  ;;  %v3867_v46 = vpop.permute.xlu2 %3866 }
 0x317   : > { %v2804_v16 = vpop.f32.mrf.mxu2  ;;  %v6766_v59 = vpop.f32.mrf.mxu3 }
 0x318   : > { %v2874_v3 = vadd.f32 %v2804_v16, %v2446_v24  ;;  %v4001_v34 = vadd.f32 %v4000_v19, %v3961_v32  ;;  %v4049_v15 = vmul.f32 %v3961_v32, %v3592_v45 }
 0x319   : > { %v2379_v26 = vpop.f32.mrf.mxu1 }
 0x31a   : > { %v3307_v52 = vadd.f32 %v6730_v41, %v2874_v3  ;;  %v4089_v44 = vadd.f32 %v4088_v48, %v4049_v15  ;;  %v2447_v62 = vadd.f32 %v2379_v26, %v6177_v29 }
 0x31c   : > { %v3526_v40 = vpop.f32.mrf.mxu0  ;;  %v3593_v0 = vadd.f32 %v3523_v23, %v3307_v52  ;;  %2418 = vmatmul.bf16.gmra.mxu1 %v2239_v53  ;;  %2846 = vmatmul.bf16.gmra.mxu2 %v2667_v28  ;;  %v3857_v28 = vpop.permute.xlu0 %3856 }
 0x31e   : > { %v5133_v39 = vpack.c.bf16 %v3593_v0, %v3592_v45  ;;  %v3962_v63 = vmul.f32 %v3852_v55, %v3593_v0 }
 0x31f   : > { %3565 = vmatmul.bf16.gmra.mxu0 %v3386_v18  ;;  %v2807_v1 = vpop.f32.mrf.mxu2  ;;  %v6771_v31 = vpop.f32.mrf.mxu3 }
 0x320   : > { %5188 = vst [vmem:[%s6430_s24 + $0x58] sm:$0xff] %v5133_v39   ;;  %v4002_v27 = vadd.f32 %v4001_v34, %v3962_v63  ;;  %v4050_v43 = vmul.f32 %v3962_v63, %v3593_v0  ;;  %v2875_v56 = vadd.f32 %v2807_v1, %v2447_v62 }
 0x321   : > { %v2381_v4 = vpop.f32.mrf.mxu1 }
 0x322   : > { %v4090_v41 = vadd.f32 %v4089_v44, %v4050_v43  ;;  %v3308_v54 = vadd.f32 %v6741_v10, %v2875_v56  ;;  %v2448_v18 = vadd.f32 %v2381_v4, %v6192_v14 }
 0x324   : > { %v3528_v51 = vpop.f32.mrf.mxu0  ;;  %v3594_v53 = vadd.f32 %v3526_v40, %v3308_v54  ;;  %v3872_v0 = vpop.permute.xlu0 %3871 }
 0x326   : > { %v3963_v58 = vmul.f32 %v3857_v28, %v3594_v53 }
 0x327   : > { %v2809_v47 = vpop.f32.mrf.mxu2  ;;  %v6775_v50 = vpop.f32.mrf.mxu3 }
 0x328   : > { %v4003_v29 = vadd.f32 %v4002_v27, %v3963_v58  ;;  %v4051_v8 = vmul.f32 %v3963_v58, %v3594_v53  ;;  %v2876_v2 = vadd.f32 %v2809_v47, %v2448_v18 }
 0x329   : > { %v2384_v6 = vpop.f32.mrf.mxu1 }
 0x32a   : > { %v4091_v61 = vadd.f32 %v4090_v41, %v4051_v8  ;;  %v3309_v42 = vadd.f32 %v6748_v36, %v2876_v2  ;;  %v2449_v20 = vadd.f32 %v2384_v6, %v6204_v38 }
 0x32c   : > { %v3531_v12 = vpop.f32.mrf.mxu0  ;;  %v3595_v10 = vadd.f32 %v3528_v51, %v3309_v42  ;;  %v3877_v51 = vpop.permute.xlu1 %3876 }
 0x32d   : > { %v3882_v42 = vpop.permute.xlu2 %3881 }
 0x32e   : > { %v5138_v60 = vpack.c.bf16 %v3595_v10, %v3594_v53  ;;  %v3964_v49 = vmul.f32 %v3862_v11, %v3595_v10 }
 0x32f   : > { %v2812_v19 = vpop.f32.mrf.mxu2  ;;  %v6780_v36 = vpop.f32.mrf.mxu3 }
 0x330   : > { %5189 = vst [vmem:[%s6430_s24 + $0x60] sm:$0xff] %v5138_v60   ;;  %v4004_v14 = vadd.f32 %v4003_v29, %v3964_v49  ;;  %v4052_v17 = vmul.f32 %v3964_v49, %v3595_v10  ;;  %v2877_v35 = vadd.f32 %v2812_v19, %v2449_v20 }
 0x331   : > { %v2386_v57 = vpop.f32.mrf.mxu1 }
 0x332   : > { %v4092_v48 = vadd.f32 %v4091_v61, %v4052_v17  ;;  %v3310_v5 = vadd.f32 %v6757_v30, %v2877_v35  ;;  %v2450_v32 = vadd.f32 %v2386_v57, %v6218_v7 }
 0x334   : > { %v3533_v23 = vpop.f32.mrf.mxu0  ;;  %v3596_v45 = vadd.f32 %v3531_v12, %v3310_v5 }
 0x336   : > { %v3965_v24 = vmul.f32 %v3867_v46, %v3596_v45 }
 0x337   : > { %v2814_v16 = vpop.f32.mrf.mxu2  ;;  %v6784_v40 = vpop.f32.mrf.mxu3 }
 0x338   : > { %v4005_v38 = vadd.f32 %v4004_v14, %v3965_v24  ;;  %v4053_v3 = vmul.f32 %v3965_v24, %v3596_v45  ;;  %v2878_v34 = vadd.f32 %v2814_v16, %v2450_v32 }
 0x339   : > { %v2389_v15 = vpop.f32.mrf.mxu1 }
 0x33a   : > { %v4093_v26 = vadd.f32 %v4092_v48, %v4053_v3  ;;  %v3311_v52 = vadd.f32 %v6762_v21, %v2878_v34  ;;  %v2451_v63 = vadd.f32 %v2389_v15, %v6229_v13  ;;  %v3887_v48 = vpop.permute.xlu0 %3886  ;;  %v3892_v15 = vpop.permute.xlu1 %3891 }
 0x33c   : > { %v3536_v44 = vpop.f32.mrf.mxu0  ;;  %v3597_v30 = vadd.f32 %v3533_v23, %v3311_v52 }
 0x33e   : > { %v5143_v55 = vpack.c.bf16 %v3597_v30, %v3596_v45  ;;  %v3966_v39 = vmul.f32 %v3872_v0, %v3597_v30 }
 0x33f   : > { %v2817_v62 = vpop.f32.mrf.mxu2  ;;  %v6789_v21 = vpop.f32.mrf.mxu3 }
 0x340   : > { %5190 = vst [vmem:[%s6430_s24 + $0x68] sm:$0xff] %v5143_v55   ;;  %v4006_v7 = vadd.f32 %v4005_v38, %v3966_v39  ;;  %v4054_v1 = vmul.f32 %v3966_v39, %v3597_v30  ;;  %v2879_v27 = vadd.f32 %v2817_v62, %v2451_v63 }
 0x341   : > { %v2391_v43 = vpop.f32.mrf.mxu1 }
 0x342   : > { %v4094_v56 = vadd.f32 %v4093_v26, %v4054_v1  ;;  %v3312_v4 = vadd.f32 %v6766_v59, %v2879_v27  ;;  %v2452_v28 = vadd.f32 %v2391_v43, %v6242_v9  ;;  %v3897_v27 = vpop.permute.xlu2 %3896 }
 0x344   : > { %v3538_v41 = vpop.f32.mrf.mxu0  ;;  %v3598_v54 = vadd.f32 %v3536_v44, %v3312_v4 }
 0x346   : > { %v3967_v53 = vmul.f32 %v3877_v51, %v3598_v54 }
 0x347   : > { %v2819_v58 = vpop.f32.mrf.mxu2  ;;  %v6793_v61 = vpop.f32.mrf.mxu3 }
 0x348   : > { %v4007_v13 = vadd.f32 %v4006_v7, %v3967_v53  ;;  %v4055_v18 = vmul.f32 %v3967_v53, %v3598_v54  ;;  %v2880_v47 = vadd.f32 %v2819_v58, %v2452_v28 }
 0x349   : > { %v2394_v29 = vpop.f32.mrf.mxu1 }
 0x34a   : > { %v4095_v8 = vadd.f32 %v4094_v56, %v4055_v18  ;;  %v3313_v2 = vadd.f32 %v6771_v31, %v2880_v47  ;;  %v2453_v11 = vadd.f32 %v2394_v29, %v6254_v25  ;;  %v3902_v18 = vpop.permute.xlu0 %3901 }
 0x34c   : > { %v3541_v6 = vpop.f32.mrf.mxu0  ;;  %v3599_v59 = vadd.f32 %v3538_v41, %v3313_v2 }
 0x34e   : > { %v5148_v12 = vpack.c.bf16 %v3599_v59, %v3598_v54  ;;  %v3968_v10 = vmul.f32 %v3882_v42, %v3599_v59 }
 0x34f   : > { %v2822_v60 = vpop.f32.mrf.mxu2  ;;  %v6798_v31 = vpop.f32.mrf.mxu3 }
 0x350   : > { %5191 = vst [vmem:[%s6430_s24 + $0x70] sm:$0xff] %v5148_v12   ;;  %v4008_v9 = vadd.f32 %v4007_v13, %v3968_v10  ;;  %v4056_v49 = vmul.f32 %v3968_v10, %v3599_v59  ;;  %v2881_v20 = vadd.f32 %v2822_v60, %v2453_v11 }
 0x351   : > { %v2396_v19 = vpop.f32.mrf.mxu1 }
 0x352   : > { %v4096_v14 = vadd.f32 %v4095_v8, %v4056_v49  ;;  %v3314_v17 = vadd.f32 %v6775_v50, %v2881_v20  ;;  %v2454_v23 = vadd.f32 %v2396_v19, %v6269_v37  ;;  %v6907_v8 = vld [vmem:[#allocation6_spill] sm:$0xff]  ;;  %v3907_v49 = vpop.permute.xlu1 %3906  ;;  %v6908_v19 = vld [vmem:[#allocation8_spill] sm:$0xff] }
 0x354   : > { %v3543_v35 = vpop.f32.mrf.mxu0  ;;  %v3600_v57 = vadd.f32 %v3541_v6, %v3314_v17 }
 0x356   : > { %v3969_v5 = vmul.f32 %v3887_v48, %v3600_v57 }
 0x357   : > { %v2824_v45 = vpop.f32.mrf.mxu2  ;;  %v6802_v34 = vpop.f32.mrf.mxu3 }
 0x358   : > { %v4009_v25 = vadd.f32 %v4008_v9, %v3969_v5  ;;  %v4057_v46 = vmul.f32 %v3969_v5, %v3600_v57  ;;  %v2882_v24 = vadd.f32 %v2824_v45, %v2454_v23 }
 0x359   : > { %v2399_v32 = vpop.f32.mrf.mxu1 }
 0x35a   : > { %v4097_v16 = vadd.f32 %v4096_v14, %v4057_v46  ;;  %v3315_v38 = vadd.f32 %v6780_v36, %v2882_v24  ;;  %v2455_v44 = vadd.f32 %v2399_v32, %v6281_v22  ;;  %v3912_v24 = vpop.permute.xlu2 %3911 }
 0x35c   : > { %v3546_v3 = vpop.f32.mrf.mxu0  ;;  %v3601_v50 = vadd.f32 %v3543_v35, %v3315_v38  ;;  %v6909_v38 = vld [vmem:[#allocation9_spill] sm:$0xff] }
 0x35e   : > { %v5153_v26 = vpack.c.bf16 %v3601_v50, %v3600_v57  ;;  %v3970_v52 = vmul.f32 %v3892_v15, %v3601_v50 }
 0x35f   : > { %v2827_v30 = vpop.f32.mrf.mxu2  ;;  %v6807_v36 = vpop.f32.mrf.mxu3 }
 0x360   : > { %5192 = vst [vmem:[%s6430_s24 + $0x78] sm:$0xff] %v5153_v26   ;;  %v4010_v37 = vadd.f32 %v4009_v25, %v3970_v52  ;;  %v4058_v0 = vmul.f32 %v3970_v52, %v3601_v50  ;;  %v2883_v55 = vadd.f32 %v2827_v30, %v2455_v44 }
 0x361   : > { %v2401_v39 = vpop.f32.mrf.mxu1 }
 0x362   : > { %v4098_v63 = vadd.f32 %v4097_v16, %v4058_v0  ;;  %v3316_v62 = vadd.f32 %v6784_v40, %v2883_v55  ;;  %v2456_v56 = vadd.f32 %v2401_v39, %v6295_v33  ;;  %v3917_v39 = vpop.permute.xlu0 %3916 }
 0x364   : > { %v3548_v7 = vpop.f32.mrf.mxu0  ;;  %v3602_v1 = vadd.f32 %v3546_v3, %v3316_v62  ;;  %v6910_v62 = vld [vmem:[#allocation10_spill] sm:$0xff] }
 0x366   : > { %v3971_v43 = vmul.f32 %v3897_v27, %v3602_v1 }
 0x367   : > { %v2829_v4 = vpop.f32.mrf.mxu2  ;;  %v6811_v13 = vpop.f32.mrf.mxu3 }
 0x368   : > { %v4011_v22 = vadd.f32 %v4010_v37, %v3971_v43  ;;  %v4059_v41 = vmul.f32 %v3971_v43, %v3602_v1  ;;  %v2884_v54 = vadd.f32 %v2829_v4, %v2456_v56 }
 0x369   : > { %v2404_v51 = vpop.f32.mrf.mxu1 }
 0x36a   : > { %v4099_v53 = vadd.f32 %v4098_v63, %v4059_v41  ;;  %v3317_v28 = vadd.f32 %v6789_v21, %v2884_v54  ;;  %v2457_v2 = vadd.f32 %v2404_v51, %v6907_v8 }
 0x36c   : > { %v3551_v58 = vpop.f32.mrf.mxu0  ;;  %v3603_v40 = vadd.f32 %v3548_v7, %v3317_v28 }
 0x36e   : > { %v5158_v47 = vpack.c.bf16 %v3603_v40, %v3602_v1  ;;  %v3972_v29 = vmul.f32 %v3902_v18, %v3603_v40 }
 0x36f   : > { %v2832_v6 = vpop.f32.mrf.mxu2  ;;  %v6816_v21 = vpop.f32.mrf.mxu3 }
 0x370   : > { %5193 = vst [vmem:[%s6430_s24 + $0x80] sm:$0xff] %v5158_v47   ;;  %v4012_v33 = vadd.f32 %v4011_v22, %v3972_v29  ;;  %v4060_v59 = vmul.f32 %v3972_v29, %v3603_v40  ;;  %v2885_v42 = vadd.f32 %v2832_v6, %v2457_v2 }
 0x371   : > { %v2406_v12 = vpop.f32.mrf.mxu1 }
 0x372   : > { %v4100_v10 = vadd.f32 %v4099_v53, %v4060_v59  ;;  %v3318_v11 = vadd.f32 %v6793_v61, %v2885_v42  ;;  %v2458_v14 = vadd.f32 %v2406_v12, %v6908_v19  ;;  %v3922_v53 = vpop.permute.xlu1 %3921  ;;  %v3927_v12 = vpop.permute.xlu2 %3926 }
 0x374   : > { %v3553_v60 = vpop.f32.mrf.mxu0  ;;  %v3604_v9 = vadd.f32 %v3551_v58, %v3318_v11  ;;  %v6911_v58 = vld [vmem:[#allocation11_spill] sm:$0xff] }
 0x376   : > { %v3973_v20 = vmul.f32 %v3907_v49, %v3604_v9 }
 0x377   : > { %v2834_v17 = vpop.f32.mrf.mxu2  ;;  %v6820_v46 = vpop.f32.mrf.mxu3 }
 0x378   : > { %v4013_v35 = vadd.f32 %v4012_v33, %v3973_v20  ;;  %v4061_v57 = vmul.f32 %v3973_v20, %v3604_v9  ;;  %v2886_v48 = vadd.f32 %v2834_v17, %v2458_v14 }
 0x379   : > { %v2409_v5 = vpop.f32.mrf.mxu1 }
 0x37a   : > { %v4101_v23 = vadd.f32 %v4100_v10, %v4061_v57  ;;  %v3319_v45 = vadd.f32 %v6798_v31, %v2886_v48  ;;  %v2459_v3 = vadd.f32 %v2409_v5, %v6909_v38  ;;  %v6912_v10 = vld [vmem:[#allocation12_spill] sm:$0xff]  ;;  %v3932_v48 = vpop.permute.xlu0 %3931 }
 0x37c   : > { %v3556_v25 = vpop.f32.mrf.mxu0  ;;  %v3605_v61 = vadd.f32 %v3553_v60, %v3319_v45 }
 0x37e   : > { %v5163_v32 = vpack.c.bf16 %v3605_v61, %v3604_v9  ;;  %v3974_v16 = vmul.f32 %v3912_v24, %v3605_v61 }
 0x37f   : > { %v2837_v50 = vpop.f32.mrf.mxu2  ;;  %v3282_v31 = vpop.f32.mrf.mxu3 }
 0x380   : > { %5194 = vst [vmem:[%s6430_s24 + $0x88] sm:$0xff] %v5163_v32   ;;  %v4014_v15 = vadd.f32 %v4013_v35, %v3974_v16  ;;  %v4062_v26 = vmul.f32 %v3974_v16, %v3605_v61  ;;  %v2887_v52 = vadd.f32 %v2837_v50, %v2459_v3 }
 0x381   : > { %v2411_v44 = vpop.f32.mrf.mxu1 }
 0x382   : > { %v4102_v30 = vadd.f32 %v4101_v23, %v4062_v26  ;;  %v3320_v37 = vadd.f32 %v6802_v34, %v2887_v52  ;;  %v2460_v7 = vadd.f32 %v2411_v44, %v6910_v62  ;;  %v6913_v23 = vld [vmem:[#allocation13_spill] sm:$0xff] }
 0x384   : > { %v3558_v0 = vpop.f32.mrf.mxu0  ;;  %v3606_v55 = vadd.f32 %v3556_v25, %v3320_v37 }
 0x386   : > { %v3975_v63 = vmul.f32 %v3917_v39, %v3606_v55 }
 0x387   : > { %v2839_v1 = vpop.f32.mrf.mxu2 }
 0x388   : > { %v4015_v27 = vadd.f32 %v4014_v15, %v3975_v63  ;;  %v4063_v43 = vmul.f32 %v3975_v63, %v3606_v55  ;;  %v2888_v56 = vadd.f32 %v2839_v1, %v2460_v7 }
 0x389   : > { %v2414_v4 = vpop.f32.mrf.mxu1 }
 0x38a   : > { %v4103_v22 = vadd.f32 %v4102_v30, %v4063_v43  ;;  %v3321_v41 = vadd.f32 %v6807_v36, %v2888_v56  ;;  %v2461_v40 = vadd.f32 %v2414_v4, %v6911_v58 }
 0x38c   : > { %v3561_v54 = vpop.f32.mrf.mxu0  ;;  %v3607_v51 = vadd.f32 %v3558_v0, %v3321_v41 }
 0x38e   : > { %v5168_v34 = vpack.c.bf16 %v3607_v51, %v3606_v55  ;;  %v3976_v28 = vmul.f32 %v3922_v53, %v3607_v51 }
 0x38f   : > { %v2842_v18 = vpop.f32.mrf.mxu2 }
 0x390   : > { %5195 = vst [vmem:[%s6430_s24 + $0x90] sm:$0xff] %v5168_v34   ;;  %v4016_v47 = vadd.f32 %v4015_v27, %v3976_v28  ;;  %v4064_v29 = vmul.f32 %v3976_v28, %v3607_v51  ;;  %v2889_v8 = vadd.f32 %v2842_v18, %v2461_v40 }
 0x391   : > { %v2416_v2 = vpop.f32.mrf.mxu1 }
 0x392   : > { %v4104_v6 = vadd.f32 %v4103_v22, %v4064_v29  ;;  %v3322_v33 = vadd.f32 %v6811_v13, %v2889_v8  ;;  %v2462_v11 = vadd.f32 %v2416_v2, %v6912_v10 }
 0x394   : > { %v3563_v59 = vpop.f32.mrf.mxu0  ;;  %v3608_v42 = vadd.f32 %v3561_v54, %v3322_v33 }
 0x396   : > { %v3977_v36 = vmul.f32 %v3927_v12, %v3608_v42 }
 0x397   : > { %v2844_v60 = vpop.f32.mrf.mxu2 }
 0x398   : > { %v4017_v9 = vadd.f32 %v4016_v47, %v3977_v36  ;;  %v4065_v49 = vmul.f32 %v3977_v36, %v3608_v42  ;;  %v2890_v20 = vadd.f32 %v2844_v60, %v2462_v11 }
 0x399   : > { %v2419_v19 = vpop.f32.mrf.mxu1 }
 0x39a   : > { %v4105_v14 = vadd.f32 %v4104_v6, %v4065_v49  ;;  %v3323_v17 = vadd.f32 %v6816_v21, %v2890_v20  ;;  %v2463_v45 = vadd.f32 %v2419_v19, %v6913_v23  ;;  %v3937_v21 = vpop.permute.xlu1 %3936 }
 0x39c   : > { %v3566_v35 = vpop.f32.mrf.mxu0  ;;  %v3609_v57 = vadd.f32 %v3563_v59, %v3323_v17 }
 0x39e   : > { %v5173_v5 = vpack.c.bf16 %v3609_v57, %v3608_v42  ;;  %v3978_v13 = vmul.f32 %v3932_v48, %v3609_v57 }
 0x39f   : > { %v2847_v25 = vpop.f32.mrf.mxu2 }
 0x3a0   : > { %5196 = vst [vmem:[%s6430_s24 + $0x98] sm:$0xff] %v5173_v5   ;;  %v4018_v61 = vadd.f32 %v4017_v9, %v3978_v13  ;;  %v4066_v24 = vmul.f32 %v3978_v13, %v3609_v57  ;;  %v2891_v32 = vadd.f32 %v2847_v25, %v2463_v45 }
 0x3a1   : > { %v2421_v16 = vpop.f32.mrf.mxu1 }
 0x3a2   : > { %v4106_v38 = vadd.f32 %v4105_v14, %v4066_v24  ;;  %v3324_v3 = vadd.f32 %v6820_v46, %v2891_v32 }
 0x3a4   : > { %v3568_v50 = vpop.f32.mrf.mxu0  ;;  %v3610_v15 = vadd.f32 %v3566_v35, %v3324_v3 }
 0x3a6   : > { %v3651_v26 = vpack.c.bf16 %v3610_v15, %v3610_v15  ;;  %v3979_v52 = vmul.f32 %v3937_v21, %v3610_v15 }
 0x3a7   : > { %v2849_v44 = vpop.f32.mrf.mxu2 }
 0x3a8   : > { %3692 = vst [vmem:[%s6430_s24 + $0xa0] sm:$0xf] %v3651_v26  ;;  %v4019_v30 = vadd.f32 %v4018_v61, %v3979_v52  ;;  %v4067_v37 = vmul.f32 %v3979_v52, %v3610_v15 }
 0x3aa   : > { %v4020_v0 = vrot.slane %v4019_v30, 4  ;;  %v4107_v31 = vadd.f32 %v4106_v38, %v4067_v37 }
 0x3ac   : > { %v4021_v55 = vadd.f32 %v4020_v0, %v4019_v30  ;;  %v4108_v39 = vrot.slane %v4107_v31, 4 }
 0x3ae   : > { %v4022_v63 = vrot.slane %v4021_v55, 2  ;;  %v4109_v62 = vadd.f32 %v4108_v39, %v4107_v31 }
 0x3b0   : > { %v4023_v7 = vadd.f32 %v4022_v63, %v4021_v55  ;;  %v4110_v1 = vrot.slane %v4109_v62, 2 }
 0x3b2   : > { %v4024_v46 = vrot.slane %v4023_v7, 1  ;;  %v4111_v27 = vadd.f32 %v4110_v1, %v4109_v62 }
 0x3b4   : > { %v4025_v43 = vadd.f32 %v4024_v46, %v4023_v7  ;;  %v4112_v56 = vrot.slane %v4111_v27, 1 }
 0x3b6   : > { %4026 = vst [vmem:[%s311_s27] sm:$0x1] %v4025_v43  ;;  %v4113_v4 = vadd.f32 %v4112_v56, %v4111_v27 }
 0x3b8   : > { %4114 = vst [vmem:[%s317_s30] sm:$0x1] %v4113_v4 }
 0x3b9 PF: > { %s16_s20 = sadd.s32 1, %s5299_s20   ;;  %s6914_s18 = smov %s5295_s19 }
 0x3ba   : > { %p13_p6 = scmp.ge.s32.totalorder %s16_s20, 4   ;;  %s6915_s19 = smov %s6917_s21 }
 0x3bc   :  { %15 = sbr.rel (!%p13_p6) target bundleno = 2 (0x2), region = 100 }

</bundles_post_ra>
